<compile_context>
chip_gen: v5e
topology: v5e:2x2
jax: 0.10.0
libtpu: 0.0.40
codegen_flags: <defaults>
</compile_context>

<pallas_src>
import functools

import jax
import jax.numpy as jnp
from jax.experimental import pallas as pl
from jax.experimental.pallas import tpu as pltpu


def _mha_kernel(xq_ref, xk_ref, xv_ref,
                wq_ref, wk_ref, wv_ref, wfc_ref,
                gamma_ref, beta_ref,
                out_ref, *rest,
                n_head, d_k, d_v, eps, matmul_dtype):
    if len(rest) == 2:
        attn_ref, oheads_ref = rest
    else:
        attn_ref = None
        (oheads_ref,) = rest

    tb, l2, d_model = xq_ref.shape
    rows = tb * l2

    def cast(x):
        return x if matmul_dtype is None else x.astype(matmul_dtype)

    # (TB, L2, D) -> (TB*L2, D): merge leading dims only (no lane relayout).
    xq = xq_ref[...].reshape(rows, d_model)      # residual source (kept f32)
    xk = xk_ref[...].reshape(rows, d_model)
    xv = xv_ref[...].reshape(rows, d_model)

    # Q/K/V projections: weights pre-transposed (and pre-scaled for Q) in the
    # wrapper -> plain x @ W on the MXU with M = TB*L2.
    q = jnp.dot(cast(xq), wq_ref[...], preferred_element_type=jnp.float32)
    k = jnp.dot(cast(xk), wk_ref[...], preferred_element_type=jnp.float32)
    v = jnp.dot(cast(xv), wv_ref[...], preferred_element_type=jnp.float32)

    q = q.reshape(tb, l2, n_head * d_k)
    k = k.reshape(tb, l2, n_head * d_k)
    v = v.reshape(tb, l2, n_head * d_v)

    # approx reciprocal (EUP slot) only when bf16-matmul noise already
    # dominates; the exact-f32 path stays exact.
    approx_recip = matmul_dtype is not None

    # Per-head attention, batched over the TB slabs.  Each head's output is
    # stored into a (rows, H*d_v) VMEM scratch so the output projection is a
    # single matmul with K = H*d_v (fills the MXU systolic depth).
    for h in range(n_head):                      # static, small
        qh = q[:, :, h * d_k:(h + 1) * d_k]      # (TB, L2, dk), scale pre-folded
        kh = k[:, :, h * d_k:(h + 1) * d_k]
        vh = v[:, :, h * d_v:(h + 1) * d_v]

        s = jnp.einsum('bqd,bkd->bqk', cast(qh), cast(kh),
                       preferred_element_type=jnp.float32)      # (TB, L2, L2)
        s = s - jnp.max(s, axis=-1, keepdims=True)
        e = jnp.exp(s)
        p = e * pl.reciprocal(jnp.sum(e, axis=-1, keepdims=True),
                              approx=approx_recip)

        if attn_ref is not None:
            # lane-dense packing: head h occupies lanes [h*L2, (h+1)*L2).
            attn_ref[:, :, h * l2:(h + 1) * l2] = p.astype(attn_ref.dtype)

        oh = jnp.einsum('bqk,bkd->bqd', cast(p), cast(vh),
                        preferred_element_type=jnp.float32)     # (TB, L2, dv)
        oheads_ref[:, h * d_v:(h + 1) * d_v] = oh.reshape(rows, d_v)

    # single output projection: (rows, H*dv) @ (H*dv, D)
    o = jnp.dot(cast(oheads_ref[...]), wfc_ref[...],
                preferred_element_type=jnp.float32)

    # residual + LayerNorm (biased variance, eps=1e-6), all in f32.
    o = o + xq.astype(jnp.float32)
    mean = jnp.mean(o, axis=-1, keepdims=True)
    var = jnp.mean((o - mean) ** 2, axis=-1, keepdims=True)
    o = (o - mean) * jax.lax.rsqrt(var + eps)
    o = o * gamma_ref[...] + beta_ref[...]
    out_ref[...] = o.reshape(tb, l2, d_model).astype(out_ref.dtype)


def _vmem_capacity_bytes():
    try:
        return int(pltpu.get_tpu_info().vmem_capacity_bytes)
    except Exception:
        return 64 * 2 ** 20                      # conservative (v7x per-TC)


def _step_vmem_bytes(tb, L2, D, H, d_k, d_v, in_itemsize, out_itemsize,
                     attn_itemsize, w_bytes, return_attn):
    """Per-grid-step VMEM estimate: double-buffered I/O blocks, single-buffered
    weights, and live f32 intermediates (projections, score/exp/prob tiles,
    head-output scratch, projection output / LN temps)."""
    rows = tb * L2
    io = (3 * tb * L2 * D * in_itemsize          # q/k/v input blocks
          + tb * L2 * D * out_itemsize)          # output block
    if return_attn:
        io += tb * L2 * H * L2 * attn_itemsize   # packed (L2, H*L2) attn block
    io *= 2                                      # pipeline double-buffering
    inter = 4 * rows * (3 * D                    # loaded x slabs
                        + 2 * H * d_k + H * d_v  # q/k/v f32 projections
                        + H * d_v                # head-output scratch
                        + 2 * D)                 # proj output + LN temps
    inter += 3 * tb * L2 * L2 * 4                # s/e/p tiles (one head live)
    return io + w_bytes + inter


def _pick_block_slabs(BL, L2, D, H, d_k, d_v, return_attn, in_itemsize,
                      out_itemsize, attn_itemsize, w_bytes, vmem_budget,
                      row_target=1024):
    """Largest divisor TB of BL whose per-step footprint fits vmem_budget,
    preferring TB*L2 aligned to 256 (MXU systolic width on v6e/v7x)."""
    best = 1
    for tb in range(1, BL + 1):
        if BL % tb:
            continue
        need = _step_vmem_bytes(tb, L2, D, H, d_k, d_v, in_itemsize,
                                out_itemsize, attn_itemsize, w_bytes,
                                return_attn)
        if need > vmem_budget and tb > 1:
            break
        best = tb
        rows = tb * L2
        if rows >= row_target and rows % 256 == 0:
            break
        if rows >= 8 * row_target:
            break
    return best


def multi_head_attention(q, k, v, params, *, n_head, d_k, d_v, eps=1e-6,
                         block_slabs=None, return_attn=True, attn_dtype=None,
                         matmul_dtype=jnp.bfloat16, interpret=False):
    """q, k, v: (B, L1, L2, d_model).  Returns (out, attn) like the PyTorch module.

    matmul_dtype=jnp.bfloat16 (default) keeps all MXU operands bf16 (native
    throughput on v5e/v6e/v7x); pass matmul_dtype=None for exact f32.
    return_attn=False skips the (B,L1,H,L2,L2) attention writeback (largest
    HBM-store cost) and returns attn=None.
    """
    B, L1, L2, D = q.shape
    BL = B * L1
    attn_dt = q.dtype if attn_dtype is None else jnp.dtype(attn_dtype)

    qf = q.reshape(BL, L2, D)
    kf = k.reshape(BL, L2, D)
    vf = v.reshape(BL, L2, D)

    # Pre-transpose (PyTorch Linear stores (out, in)), pre-cast to the matmul
    # dtype, and fold the 1/sqrt(d_k) attention scale into the Q weights.
    w_dt = q.dtype if matmul_dtype is None else matmul_dtype
    inv_temp = 1.0 / (d_k ** 0.5)
    wq_t = (params["wq"].T * inv_temp).astype(w_dt)   # (D, H*d_k), pre-scaled
    wk_t = params["wk"].T.astype(w_dt)                # (D, H*d_k)
    wv_t = params["wv"].T.astype(w_dt)                # (D, H*d_v)
    wfc_t = params["wfc"].T.astype(w_dt)              # (H*d_v, D)
    gamma = params["gamma"].reshape(1, D).astype(jnp.float32)
    beta = params["beta"].reshape(1, D).astype(jnp.float32)

    w_bytes = sum(int(w.size) * w.dtype.itemsize
                  for w in (wq_t, wk_t, wv_t, wfc_t, gamma, beta))

    vmem_cap = _vmem_capacity_bytes()             # 64 MiB v7x, 128 MiB v5e/v6e
    attn_isz = jnp.dtype(attn_dt).itemsize
    if block_slabs is None:
        block_slabs = _pick_block_slabs(
            BL, L2, D, n_head, d_k, d_v, return_attn,
            q.dtype.itemsize, q.dtype.itemsize, attn_isz, w_bytes,
            vmem_budget=int(0.45 * vmem_cap))
    tb = block_slabs
    assert BL % tb == 0, "block_slabs must divide B*L1"
    grid = (BL // tb,)

    need = _step_vmem_bytes(tb, L2, D, n_head, d_k, d_v,
                            q.dtype.itemsize, q.dtype.itemsize, attn_isz,
                            w_bytes, return_attn)
    vmem_limit = int(max(32 * 2 ** 20, 1.25 * need + 2 * 2 ** 20))
    vmem_limit = int(min(vmem_limit, vmem_cap - 8 * 2 ** 20))

    kernel = functools.partial(_mha_kernel, n_head=n_head, d_k=d_k, d_v=d_v,
                               eps=eps, matmul_dtype=matmul_dtype)

    def build(single_buffer_weights):
        def per_slab(shape):
            return pl.BlockSpec(shape, lambda i: (i,) + (0,) * (len(shape) - 1))

        def resident(shape):
            nd = len(shape)
            if single_buffer_weights:
                # constant index_map across the grid -> one VMEM buffer is enough
                return pl.BlockSpec(shape, lambda i: (0,) * nd,
                                    pipeline_mode=pl.Buffered(1))
            return pl.BlockSpec(shape, lambda i: (0,) * nd)

        in_specs = [
            per_slab((tb, L2, D)),                    # q slab
            per_slab((tb, L2, D)),                    # k slab
            per_slab((tb, L2, D)),                    # v slab
            resident(wq_t.shape),
            resident(wk_t.shape),
            resident(wv_t.shape),
            resident(wfc_t.shape),
            resident((1, D)),                         # gamma
            resident((1, D)),                         # beta
        ]
        out_shapes = [jax.ShapeDtypeStruct((BL, L2, D), q.dtype)]
        out_specs = [per_slab((tb, L2, D))]
        if return_attn:
            # lane-dense packed attn (last dim H*L2); unpacked in the wrapper.
            out_shapes.append(jax.ShapeDtypeStruct((BL, L2, n_head * L2), attn_dt))
            out_specs.append(per_slab((tb, L2, n_head * L2)))

        return pl.pallas_call(
            kernel,
            out_shape=tuple(out_shapes),
            grid_spec=pltpu.PrefetchScalarGridSpec(
                num_scalar_prefetch=0,
                grid=grid,
                in_specs=in_specs,
                out_specs=tuple(out_specs),
                scratch_shapes=[pltpu.VMEM((tb * L2, n_head * d_v), jnp.float32)],
            ),
            compiler_params=pltpu.CompilerParams(
                # slab axis is independent -> shard across TCs (v7x megacore);
                # no-op on single-TC v5e/v6e.
                dimension_semantics=("parallel",),
                vmem_limit_bytes=vmem_limit,
            ),
            interpret=interpret,
        )

    args = (qf, kf, vf, wq_t, wk_t, wv_t, wfc_t, gamma, beta)
    try:
        outs = build(single_buffer_weights=True)(*args)
        jax.block_until_ready(outs)
    except Exception:
        # fallback: default double-buffered weight blocks
        outs = build(single_buffer_weights=False)(*args)

    if return_attn:
        out_flat, attn_flat = outs
        attn = attn_flat.reshape(BL, L2, n_head, L2)
        attn = jnp.transpose(attn, (0, 2, 1, 3)).reshape(B, L1, n_head, L2, L2)
        return out_flat.reshape(B, L1, L2, D), attn
    out_flat = outs[0] if isinstance(outs, (tuple, list)) else outs
    return out_flat.reshape(B, L1, L2, D), None


def _reference(q, k, v, params, *, n_head, d_k, d_v, eps=1e-6):
    """Pure-JAX reference mirroring the PyTorch forward (eval mode)."""
    B, L1, L2, D = q.shape
    residual = q
    qp = jnp.einsum("blsd,od->blso", q, params["wq"]).reshape(B, L1, L2, n_head, d_k)
    kp = jnp.einsum("blsd,od->blso", k, params["wk"]).reshape(B, L1, L2, n_head, d_k)
    vp = jnp.einsum("blsd,od->blso", v, params["wv"]).reshape(B, L1, L2, n_head, d_v)
    qp, kp, vp = (jnp.swapaxes(t, 2, 3) for t in (qp, kp, vp))     # (B,L1,H,L2,d)
    scores = jnp.einsum("blhqd,blhkd->blhqk", qp / (d_k ** 0.5), kp)
    attn = jax.nn.softmax(scores, axis=-1)
    o = jnp.einsum("blhqk,blhkd->blhqd", attn, vp)
    o = jnp.swapaxes(o, 2, 3).reshape(B, L1, L2, n_head * d_v)
    o = jnp.einsum("blso,do->blsd", o, params["wfc"]) + residual
    mean = jnp.mean(o, axis=-1, keepdims=True)
    var = jnp.mean((o - mean) ** 2, axis=-1, keepdims=True)
    o = (o - mean) / jnp.sqrt(var + eps) * params["gamma"] + params["beta"]
    return o, attn


if __name__ == "__main__":
    # small deterministic config
    n_head, d_model, d_k, d_v = 4, 32, 8, 8
    B, L1, L2 = 2, 2, 8

    key = jax.random.PRNGKey(0)
    kq, kk, kv, k1, k2, k3, k4 = jax.random.split(key, 7)

    q = jax.random.normal(kq, (B, L1, L2, d_model), jnp.float32)
    k = jax.random.normal(kk, (B, L1, L2, d_model), jnp.float32)
    v = jax.random.normal(kv, (B, L1, L2, d_model), jnp.float32)

    scale = 1.0 / (d_model ** 0.5)
    params = {
        "wq": jax.random.normal(k1, (n_head * d_k, d_model), jnp.float32) * scale,
        "wk": jax.random.normal(k2, (n_head * d_k, d_model), jnp.float32) * scale,
        "wv": jax.random.normal(k3, (n_head * d_v, d_model), jnp.float32) * scale,
        "wfc": jax.random.normal(k4, (d_model, n_head * d_v), jnp.float32) * scale,
        "gamma": jnp.ones((d_model,), jnp.float32),
        "beta": jnp.zeros((d_model,), jnp.float32),
    }

    ref_out, ref_attn = _reference(q, k, v, params,
                                   n_head=n_head, d_k=d_k, d_v=d_v)

    # exact-f32 path: tight tolerances (algorithm check)
    out32, attn32 = multi_head_attention(q, k, v, params, n_head=n_head,
                                         d_k=d_k, d_v=d_v, matmul_dtype=None)
    jax.block_until_ready((out32, attn32))
    assert jnp.allclose(out32, ref_out, atol=2e-4, rtol=2e-4)
    assert jnp.allclose(attn32, ref_attn, atol=5e-5, rtol=5e-5)

    # default perf path: bf16 MXU operands (tolerances reflect bf16 rounding)
    out, attn = multi_head_attention(q, k, v, params,
                                     n_head=n_head, d_k=d_k, d_v=d_v)
    jax.block_until_ready((out, attn))
    assert jnp.allclose(out, ref_out, atol=8e-2, rtol=8e-2)
    assert jnp.allclose(attn, ref_attn, atol=5e-2, rtol=5e-2)

    print("KERNEL_OK")
</pallas_src>

<mosaic_0001>
module attributes {stable_mosaic.version = 11 : i64} {
  func.func @_mha_kernel(%arg0: i32, %arg1: memref<4x8x32xf32, #tpu.memory_space<vmem>>, %arg2: memref<4x8x32xf32, #tpu.memory_space<vmem>>, %arg3: memref<4x8x32xf32, #tpu.memory_space<vmem>>, %arg4: memref<32x32xf32, #tpu.memory_space<vmem>>, %arg5: memref<32x32xf32, #tpu.memory_space<vmem>>, %arg6: memref<32x32xf32, #tpu.memory_space<vmem>>, %arg7: memref<32x32xf32, #tpu.memory_space<vmem>>, %arg8: memref<1x32xf32, #tpu.memory_space<vmem>>, %arg9: memref<1x32xf32, #tpu.memory_space<vmem>>, %arg10: memref<4x8x32xf32, #tpu.memory_space<vmem>>, %arg11: memref<4x8x32xf32, #tpu.memory_space<vmem>>, %arg12: memref<32x32xf32, #tpu.memory_space<vmem>>) attributes {dimension_semantics = [#tpu.dimension_semantics<parallel>], iteration_bounds = array<i64: 1>, scalar_prefetch = 0 : i64, scratch_operands = 1 : i64, tpu.core_type = #tpu.core_type<tc>, window_params = [{transform_indices = @transform_0, window_bounds = array<i64: 4, 8, 32>}, {transform_indices = @transform_1, window_bounds = array<i64: 4, 8, 32>}, {transform_indices = @transform_2, window_bounds = array<i64: 4, 8, 32>}, {pipeline_mode = #tpu.pipeline_mode<synchronous>, transform_indices = @transform_3, window_bounds = array<i64: 32, 32>}, {pipeline_mode = #tpu.pipeline_mode<synchronous>, transform_indices = @transform_4, window_bounds = array<i64: 32, 32>}, {pipeline_mode = #tpu.pipeline_mode<synchronous>, transform_indices = @transform_5, window_bounds = array<i64: 32, 32>}, {pipeline_mode = #tpu.pipeline_mode<synchronous>, transform_indices = @transform_6, window_bounds = array<i64: 32, 32>}, {pipeline_mode = #tpu.pipeline_mode<synchronous>, transform_indices = @transform_7, window_bounds = array<i64: 1, 32>}, {pipeline_mode = #tpu.pipeline_mode<synchronous>, transform_indices = @transform_8, window_bounds = array<i64: 1, 32>}, {transform_indices = @transform_9, window_bounds = array<i64: 4, 8, 32>}, {transform_indices = @transform_10, window_bounds = array<i64: 4, 8, 32>}]} {
    %c0 = arith.constant 0 : index
    %c0_0 = arith.constant 0 : index
    %c0_1 = arith.constant 0 : index
    %0 = vector.load %arg1[%c0, %c0_0, %c0_1] : memref<4x8x32xf32, #tpu.memory_space<vmem>>, vector<4x8x32xf32>
    %1 = vector.shape_cast %0 : vector<4x8x32xf32> to vector<32x32xf32>
    %c0_2 = arith.constant 0 : index
    %c0_3 = arith.constant 0 : index
    %c0_4 = arith.constant 0 : index
    %2 = vector.load %arg2[%c0_2, %c0_3, %c0_4] : memref<4x8x32xf32, #tpu.memory_space<vmem>>, vector<4x8x32xf32>
    %3 = vector.shape_cast %2 : vector<4x8x32xf32> to vector<32x32xf32>
    %c0_5 = arith.constant 0 : index
    %c0_6 = arith.constant 0 : index
    %c0_7 = arith.constant 0 : index
    %4 = vector.load %arg3[%c0_5, %c0_6, %c0_7] : memref<4x8x32xf32, #tpu.memory_space<vmem>>, vector<4x8x32xf32>
    %5 = vector.shape_cast %4 : vector<4x8x32xf32> to vector<32x32xf32>
    %c0_8 = arith.constant 0 : index
    %c0_9 = arith.constant 0 : index
    %6 = vector.load %arg4[%c0_8, %c0_9] : memref<32x32xf32, #tpu.memory_space<vmem>>, vector<32x32xf32>
    %cst = arith.constant dense<0.000000e+00> : vector<32x32xf32>
    %7 = tpu.matmul %1, %6, %cst {dimension_numbers = #tpu.dot_dimension_numbers<[1], [0], [0], [1], [0, 0, 1, 1], [], []>} : vector<32x32xf32>, vector<32x32xf32>, vector<32x32xf32> -> vector<32x32xf32>
    %c0_10 = arith.constant 0 : index
    %c0_11 = arith.constant 0 : index
    %8 = vector.load %arg5[%c0_10, %c0_11] : memref<32x32xf32, #tpu.memory_space<vmem>>, vector<32x32xf32>
    %cst_12 = arith.constant dense<0.000000e+00> : vector<32x32xf32>
    %9 = tpu.matmul %3, %8, %cst_12 {dimension_numbers = #tpu.dot_dimension_numbers<[1], [0], [0], [1], [0, 0, 1, 1], [], []>} : vector<32x32xf32>, vector<32x32xf32>, vector<32x32xf32> -> vector<32x32xf32>
    %c0_13 = arith.constant 0 : index
    %c0_14 = arith.constant 0 : index
    %10 = vector.load %arg6[%c0_13, %c0_14] : memref<32x32xf32, #tpu.memory_space<vmem>>, vector<32x32xf32>
    %cst_15 = arith.constant dense<0.000000e+00> : vector<32x32xf32>
    %11 = tpu.matmul %5, %10, %cst_15 {dimension_numbers = #tpu.dot_dimension_numbers<[1], [0], [0], [1], [0, 0, 1, 1], [], []>} : vector<32x32xf32>, vector<32x32xf32>, vector<32x32xf32> -> vector<32x32xf32>
    %12 = vector.shape_cast %7 : vector<32x32xf32> to vector<4x8x32xf32>
    %13 = vector.shape_cast %9 : vector<32x32xf32> to vector<4x8x32xf32>
    %14 = vector.shape_cast %11 : vector<32x32xf32> to vector<4x8x32xf32>
    %15 = vector.extract_strided_slice %12 {offsets = [0, 0, 0], sizes = [4, 8, 8], strides = [1, 1, 1]} : vector<4x8x32xf32> to vector<4x8x8xf32>
    %16 = vector.extract_strided_slice %13 {offsets = [0, 0, 0], sizes = [4, 8, 8], strides = [1, 1, 1]} : vector<4x8x32xf32> to vector<4x8x8xf32>
    %17 = vector.extract_strided_slice %14 {offsets = [0, 0, 0], sizes = [4, 8, 8], strides = [1, 1, 1]} : vector<4x8x32xf32> to vector<4x8x8xf32>
    "tpu.trace_start"() <{level = 10 : i32, message = "bqd,bkd->bqk"}> : () -> ()
    %cst_16 = arith.constant dense<0.000000e+00> : vector<4x8x8xf32>
    %18 = tpu.matmul %15, %16, %cst_16 {dimension_numbers = #tpu.dot_dimension_numbers<[2], [2], [1], [1], [0, 0, 0, 1, 1, 1], [0], [0]>} : vector<4x8x8xf32>, vector<4x8x8xf32>, vector<4x8x8xf32> -> vector<4x8x8xf32>
    "tpu.trace_stop"() : () -> ()
    %cst_17 = arith.constant dense<0xFF800000> : vector<4x8xf32>
    %19 = vector.multi_reduction <maximumf>, %18, %cst_17 [2] : vector<4x8x8xf32> to vector<4x8xf32>
    %20 = vector.shape_cast %19 : vector<4x8xf32> to vector<4x8x1xf32>
    %21 = vector.broadcast %20 : vector<4x8x1xf32> to vector<4x8x8xf32>
    %22 = arith.subf %18, %21 : vector<4x8x8xf32>
    %23 = math.exp %22 : vector<4x8x8xf32>
    %cst_18 = arith.constant dense<0.000000e+00> : vector<4x8xf32>
    %24 = vector.multi_reduction <add>, %23, %cst_18 [2] : vector<4x8x8xf32> to vector<4x8xf32>
    %25 = vector.shape_cast %24 : vector<4x8xf32> to vector<4x8x1xf32>
    %26 = tpu.reciprocal %25 : vector<4x8x1xf32> -> vector<4x8x1xf32>
    %27 = vector.broadcast %26 : vector<4x8x1xf32> to vector<4x8x8xf32>
    %28 = arith.mulf %23, %27 : vector<4x8x8xf32>
    %c0_19 = arith.constant 0 : index
    %c0_20 = arith.constant 0 : index
    %c0_21 = arith.constant 0 : index
    %29 = vector.load %arg11[%c0_19, %c0_20, %c0_21] : memref<4x8x32xf32, #tpu.memory_space<vmem>>, vector<4x8x8xf32>
    tpu.vector_store %arg11[%c0_19, %c0_20, %c0_21], %28 {strides = array<i32>} : memref<4x8x32xf32, #tpu.memory_space<vmem>>, vector<4x8x8xf32>,
    "tpu.trace_start"() <{level = 10 : i32, message = "bqk,bkd->bqd"}> : () -> ()
    %cst_22 = arith.constant dense<0.000000e+00> : vector<4x8x8xf32>
    %30 = tpu.matmul %28, %17, %cst_22 {dimension_numbers = #tpu.dot_dimension_numbers<[2], [1], [1], [2], [0, 0, 0, 1, 1, 2], [0], [0]>} : vector<4x8x8xf32>, vector<4x8x8xf32>, vector<4x8x8xf32> -> vector<4x8x8xf32>
    "tpu.trace_stop"() : () -> ()
    %31 = vector.shape_cast %30 : vector<4x8x8xf32> to vector<32x8xf32>
    %c0_23 = arith.constant 0 : index
    %c0_24 = arith.constant 0 : index
    %32 = vector.load %arg12[%c0_23, %c0_24] : memref<32x32xf32, #tpu.memory_space<vmem>>, vector<32x8xf32>
    tpu.vector_store %arg12[%c0_23, %c0_24], %31 {strides = array<i32>} : memref<32x32xf32, #tpu.memory_space<vmem>>, vector<32x8xf32>,
    %33 = vector.extract_strided_slice %12 {offsets = [0, 0, 8], sizes = [4, 8, 8], strides = [1, 1, 1]} : vector<4x8x32xf32> to vector<4x8x8xf32>
    %34 = vector.extract_strided_slice %13 {offsets = [0, 0, 8], sizes = [4, 8, 8], strides = [1, 1, 1]} : vector<4x8x32xf32> to vector<4x8x8xf32>
    %35 = vector.extract_strided_slice %14 {offsets = [0, 0, 8], sizes = [4, 8, 8], strides = [1, 1, 1]} : vector<4x8x32xf32> to vector<4x8x8xf32>
    "tpu.trace_start"() <{level = 10 : i32, message = "bqd,bkd->bqk"}> : () -> ()
    %cst_25 = arith.constant dense<0.000000e+00> : vector<4x8x8xf32>
    %36 = tpu.matmul %33, %34, %cst_25 {dimension_numbers = #tpu.dot_dimension_numbers<[2], [2], [1], [1], [0, 0, 0, 1, 1, 1], [0], [0]>} : vector<4x8x8xf32>, vector<4x8x8xf32>, vector<4x8x8xf32> -> vector<4x8x8xf32>
    "tpu.trace_stop"() : () -> ()
    %cst_26 = arith.constant dense<0xFF800000> : vector<4x8xf32>
    %37 = vector.multi_reduction <maximumf>, %36, %cst_26 [2] : vector<4x8x8xf32> to vector<4x8xf32>
    %38 = vector.shape_cast %37 : vector<4x8xf32> to vector<4x8x1xf32>
    %39 = vector.broadcast %38 : vector<4x8x1xf32> to vector<4x8x8xf32>
    %40 = arith.subf %36, %39 : vector<4x8x8xf32>
    %41 = math.exp %40 : vector<4x8x8xf32>
    %cst_27 = arith.constant dense<0.000000e+00> : vector<4x8xf32>
    %42 = vector.multi_reduction <add>, %41, %cst_27 [2] : vector<4x8x8xf32> to vector<4x8xf32>
    %43 = vector.shape_cast %42 : vector<4x8xf32> to vector<4x8x1xf32>
    %44 = tpu.reciprocal %43 : vector<4x8x1xf32> -> vector<4x8x1xf32>
    %45 = vector.broadcast %44 : vector<4x8x1xf32> to vector<4x8x8xf32>
    %46 = arith.mulf %41, %45 : vector<4x8x8xf32>
    %c0_28 = arith.constant 0 : index
    %c0_29 = arith.constant 0 : index
    %c8 = arith.constant 8 : index
    %47 = vector.load %arg11[%c0_28, %c0_29, %c8] : memref<4x8x32xf32, #tpu.memory_space<vmem>>, vector<4x8x8xf32>
    tpu.vector_store %arg11[%c0_28, %c0_29, %c8], %46 {strides = array<i32>} : memref<4x8x32xf32, #tpu.memory_space<vmem>>, vector<4x8x8xf32>,
    "tpu.trace_start"() <{level = 10 : i32, message = "bqk,bkd->bqd"}> : () -> ()
    %cst_30 = arith.constant dense<0.000000e+00> : vector<4x8x8xf32>
    %48 = tpu.matmul %46, %35, %cst_30 {dimension_numbers = #tpu.dot_dimension_numbers<[2], [1], [1], [2], [0, 0, 0, 1, 1, 2], [0], [0]>} : vector<4x8x8xf32>, vector<4x8x8xf32>, vector<4x8x8xf32> -> vector<4x8x8xf32>
    "tpu.trace_stop"() : () -> ()
    %49 = vector.shape_cast %48 : vector<4x8x8xf32> to vector<32x8xf32>
    %c0_31 = arith.constant 0 : index
    %c8_32 = arith.constant 8 : index
    %50 = vector.load %arg12[%c0_31, %c8_32] : memref<32x32xf32, #tpu.memory_space<vmem>>, vector<32x8xf32>
    tpu.vector_store %arg12[%c0_31, %c8_32], %49 {strides = array<i32>} : memref<32x32xf32, #tpu.memory_space<vmem>>, vector<32x8xf32>,
    %51 = vector.extract_strided_slice %12 {offsets = [0, 0, 16], sizes = [4, 8, 8], strides = [1, 1, 1]} : vector<4x8x32xf32> to vector<4x8x8xf32>
    %52 = vector.extract_strided_slice %13 {offsets = [0, 0, 16], sizes = [4, 8, 8], strides = [1, 1, 1]} : vector<4x8x32xf32> to vector<4x8x8xf32>
    %53 = vector.extract_strided_slice %14 {offsets = [0, 0, 16], sizes = [4, 8, 8], strides = [1, 1, 1]} : vector<4x8x32xf32> to vector<4x8x8xf32>
    "tpu.trace_start"() <{level = 10 : i32, message = "bqd,bkd->bqk"}> : () -> ()
    %cst_33 = arith.constant dense<0.000000e+00> : vector<4x8x8xf32>
    %54 = tpu.matmul %51, %52, %cst_33 {dimension_numbers = #tpu.dot_dimension_numbers<[2], [2], [1], [1], [0, 0, 0, 1, 1, 1], [0], [0]>} : vector<4x8x8xf32>, vector<4x8x8xf32>, vector<4x8x8xf32> -> vector<4x8x8xf32>
    "tpu.trace_stop"() : () -> ()
    %cst_34 = arith.constant dense<0xFF800000> : vector<4x8xf32>
    %55 = vector.multi_reduction <maximumf>, %54, %cst_34 [2] : vector<4x8x8xf32> to vector<4x8xf32>
    %56 = vector.shape_cast %55 : vector<4x8xf32> to vector<4x8x1xf32>
    %57 = vector.broadcast %56 : vector<4x8x1xf32> to vector<4x8x8xf32>
    %58 = arith.subf %54, %57 : vector<4x8x8xf32>
    %59 = math.exp %58 : vector<4x8x8xf32>
    %cst_35 = arith.constant dense<0.000000e+00> : vector<4x8xf32>
    %60 = vector.multi_reduction <add>, %59, %cst_35 [2] : vector<4x8x8xf32> to vector<4x8xf32>
    %61 = vector.shape_cast %60 : vector<4x8xf32> to vector<4x8x1xf32>
    %62 = tpu.reciprocal %61 : vector<4x8x1xf32> -> vector<4x8x1xf32>
    %63 = vector.broadcast %62 : vector<4x8x1xf32> to vector<4x8x8xf32>
    %64 = arith.mulf %59, %63 : vector<4x8x8xf32>
    %c0_36 = arith.constant 0 : index
    %c0_37 = arith.constant 0 : index
    %c16 = arith.constant 16 : index
    %65 = vector.load %arg11[%c0_36, %c0_37, %c16] : memref<4x8x32xf32, #tpu.memory_space<vmem>>, vector<4x8x8xf32>
    tpu.vector_store %arg11[%c0_36, %c0_37, %c16], %64 {strides = array<i32>} : memref<4x8x32xf32, #tpu.memory_space<vmem>>, vector<4x8x8xf32>,
    "tpu.trace_start"() <{level = 10 : i32, message = "bqk,bkd->bqd"}> : () -> ()
    %cst_38 = arith.constant dense<0.000000e+00> : vector<4x8x8xf32>
    %66 = tpu.matmul %64, %53, %cst_38 {dimension_numbers = #tpu.dot_dimension_numbers<[2], [1], [1], [2], [0, 0, 0, 1, 1, 2], [0], [0]>} : vector<4x8x8xf32>, vector<4x8x8xf32>, vector<4x8x8xf32> -> vector<4x8x8xf32>
    "tpu.trace_stop"() : () -> ()
    %67 = vector.shape_cast %66 : vector<4x8x8xf32> to vector<32x8xf32>
    %c0_39 = arith.constant 0 : index
    %c16_40 = arith.constant 16 : index
    %68 = vector.load %arg12[%c0_39, %c16_40] : memref<32x32xf32, #tpu.memory_space<vmem>>, vector<32x8xf32>
    tpu.vector_store %arg12[%c0_39, %c16_40], %67 {strides = array<i32>} : memref<32x32xf32, #tpu.memory_space<vmem>>, vector<32x8xf32>,
    %69 = vector.extract_strided_slice %12 {offsets = [0, 0, 24], sizes = [4, 8, 8], strides = [1, 1, 1]} : vector<4x8x32xf32> to vector<4x8x8xf32>
    %70 = vector.extract_strided_slice %13 {offsets = [0, 0, 24], sizes = [4, 8, 8], strides = [1, 1, 1]} : vector<4x8x32xf32> to vector<4x8x8xf32>
    %71 = vector.extract_strided_slice %14 {offsets = [0, 0, 24], sizes = [4, 8, 8], strides = [1, 1, 1]} : vector<4x8x32xf32> to vector<4x8x8xf32>
    "tpu.trace_start"() <{level = 10 : i32, message = "bqd,bkd->bqk"}> : () -> ()
    %cst_41 = arith.constant dense<0.000000e+00> : vector<4x8x8xf32>
    %72 = tpu.matmul %69, %70, %cst_41 {dimension_numbers = #tpu.dot_dimension_numbers<[2], [2], [1], [1], [0, 0, 0, 1, 1, 1], [0], [0]>} : vector<4x8x8xf32>, vector<4x8x8xf32>, vector<4x8x8xf32> -> vector<4x8x8xf32>
    "tpu.trace_stop"() : () -> ()
    %cst_42 = arith.constant dense<0xFF800000> : vector<4x8xf32>
    %73 = vector.multi_reduction <maximumf>, %72, %cst_42 [2] : vector<4x8x8xf32> to vector<4x8xf32>
    %74 = vector.shape_cast %73 : vector<4x8xf32> to vector<4x8x1xf32>
    %75 = vector.broadcast %74 : vector<4x8x1xf32> to vector<4x8x8xf32>
    %76 = arith.subf %72, %75 : vector<4x8x8xf32>
    %77 = math.exp %76 : vector<4x8x8xf32>
    %cst_43 = arith.constant dense<0.000000e+00> : vector<4x8xf32>
    %78 = vector.multi_reduction <add>, %77, %cst_43 [2] : vector<4x8x8xf32> to vector<4x8xf32>
    %79 = vector.shape_cast %78 : vector<4x8xf32> to vector<4x8x1xf32>
    %80 = tpu.reciprocal %79 : vector<4x8x1xf32> -> vector<4x8x1xf32>
    %81 = vector.broadcast %80 : vector<4x8x1xf32> to vector<4x8x8xf32>
    %82 = arith.mulf %77, %81 : vector<4x8x8xf32>
    %c0_44 = arith.constant 0 : index
    %c0_45 = arith.constant 0 : index
    %c24 = arith.constant 24 : index
    %83 = vector.load %arg11[%c0_44, %c0_45, %c24] : memref<4x8x32xf32, #tpu.memory_space<vmem>>, vector<4x8x8xf32>
    tpu.vector_store %arg11[%c0_44, %c0_45, %c24], %82 {strides = array<i32>} : memref<4x8x32xf32, #tpu.memory_space<vmem>>, vector<4x8x8xf32>,
    "tpu.trace_start"() <{level = 10 : i32, message = "bqk,bkd->bqd"}> : () -> ()
    %cst_46 = arith.constant dense<0.000000e+00> : vector<4x8x8xf32>
    %84 = tpu.matmul %82, %71, %cst_46 {dimension_numbers = #tpu.dot_dimension_numbers<[2], [1], [1], [2], [0, 0, 0, 1, 1, 2], [0], [0]>} : vector<4x8x8xf32>, vector<4x8x8xf32>, vector<4x8x8xf32> -> vector<4x8x8xf32>
    "tpu.trace_stop"() : () -> ()
    %85 = vector.shape_cast %84 : vector<4x8x8xf32> to vector<32x8xf32>
    %c0_47 = arith.constant 0 : index
    %c24_48 = arith.constant 24 : index
    %86 = vector.load %arg12[%c0_47, %c24_48] : memref<32x32xf32, #tpu.memory_space<vmem>>, vector<32x8xf32>
    tpu.vector_store %arg12[%c0_47, %c24_48], %85 {strides = array<i32>} : memref<32x32xf32, #tpu.memory_space<vmem>>, vector<32x8xf32>,
    %c0_49 = arith.constant 0 : index
    %c0_50 = arith.constant 0 : index
    %87 = vector.load %arg12[%c0_49, %c0_50] : memref<32x32xf32, #tpu.memory_space<vmem>>, vector<32x32xf32>
    %c0_51 = arith.constant 0 : index
    %c0_52 = arith.constant 0 : index
    %88 = vector.load %arg7[%c0_51, %c0_52] : memref<32x32xf32, #tpu.memory_space<vmem>>, vector<32x32xf32>
    %cst_53 = arith.constant dense<0.000000e+00> : vector<32x32xf32>
    %89 = tpu.matmul %87, %88, %cst_53 {dimension_numbers = #tpu.dot_dimension_numbers<[1], [0], [0], [1], [0, 0, 1, 1], [], []>} : vector<32x32xf32>, vector<32x32xf32>, vector<32x32xf32> -> vector<32x32xf32>
    %90 = arith.addf %89, %1 : vector<32x32xf32>
    %cst_54 = arith.constant dense<0.000000e+00> : vector<32xf32>
    %91 = vector.multi_reduction <add>, %90, %cst_54 [1] : vector<32x32xf32> to vector<32xf32>
    %92 = vector.shape_cast %91 : vector<32xf32> to vector<32x1xf32>
    %cst_55 = arith.constant 3.200000e+01 : f32
    %93 = vector.broadcast %cst_55 : f32 to vector<32x1xf32>
    %94 = arith.divf %92, %93 : vector<32x1xf32>
    %95 = vector.broadcast %94 : vector<32x1xf32> to vector<32x32xf32>
    %96 = arith.subf %90, %95 : vector<32x32xf32>
    %97 = arith.mulf %96, %96 : vector<32x32xf32>
    %cst_56 = arith.constant dense<0.000000e+00> : vector<32xf32>
    %98 = vector.multi_reduction <add>, %97, %cst_56 [1] : vector<32x32xf32> to vector<32xf32>
    %99 = vector.shape_cast %98 : vector<32xf32> to vector<32x1xf32>
    %cst_57 = arith.constant 3.200000e+01 : f32
    %100 = vector.broadcast %cst_57 : f32 to vector<32x1xf32>
    %101 = arith.divf %99, %100 : vector<32x1xf32>
    %102 = vector.broadcast %94 : vector<32x1xf32> to vector<32x32xf32>
    %103 = arith.subf %90, %102 : vector<32x32xf32>
    %cst_58 = arith.constant 9.99999997E-7 : f32
    %104 = vector.broadcast %cst_58 : f32 to vector<32x1xf32>
    %105 = arith.addf %101, %104 : vector<32x1xf32>
    %106 = math.rsqrt %105 : vector<32x1xf32>
    %107 = vector.broadcast %106 : vector<32x1xf32> to vector<32x32xf32>
    %108 = arith.mulf %103, %107 : vector<32x32xf32>
    %c0_59 = arith.constant 0 : index
    %c0_60 = arith.constant 0 : index
    %109 = vector.load %arg8[%c0_59, %c0_60] : memref<1x32xf32, #tpu.memory_space<vmem>>, vector<1x32xf32>
    %110 = vector.broadcast %109 : vector<1x32xf32> to vector<32x32xf32>
    %111 = arith.mulf %108, %110 : vector<32x32xf32>
    %c0_61 = arith.constant 0 : index
    %c0_62 = arith.constant 0 : index
    %112 = vector.load %arg9[%c0_61, %c0_62] : memref<1x32xf32, #tpu.memory_space<vmem>>, vector<1x32xf32>
    %113 = vector.broadcast %112 : vector<1x32xf32> to vector<32x32xf32>
    %114 = arith.addf %111, %113 : vector<32x32xf32>
    %115 = vector.shape_cast %114 : vector<32x32xf32> to vector<4x8x32xf32>
    %c0_63 = arith.constant 0 : index
    %c0_64 = arith.constant 0 : index
    %c0_65 = arith.constant 0 : index
    %116 = vector.load %arg10[%c0_63, %c0_64, %c0_65] : memref<4x8x32xf32, #tpu.memory_space<vmem>>, vector<4x8x32xf32>
    tpu.vector_store %arg10[%c0_63, %c0_64, %c0_65], %115 {strides = array<i32>} : memref<4x8x32xf32, #tpu.memory_space<vmem>>, vector<4x8x32xf32>,
    return
  }
  func.func @transform_0(%arg0: i32) -> (i32, i32, i32) {
    %c0_i32 = arith.constant 0 : i32
    %c0_i32_0 = arith.constant 0 : i32
    %c0_i32_1 = arith.constant 0 : i32
    return %arg0, %c0_i32, %c0_i32_0 : i32, i32, i32
  }
  func.func @transform_1(%arg0: i32) -> (i32, i32, i32) {
    %c0_i32 = arith.constant 0 : i32
    %c0_i32_0 = arith.constant 0 : i32
    %c0_i32_1 = arith.constant 0 : i32
    return %arg0, %c0_i32, %c0_i32_0 : i32, i32, i32
  }
  func.func @transform_2(%arg0: i32) -> (i32, i32, i32) {
    %c0_i32 = arith.constant 0 : i32
    %c0_i32_0 = arith.constant 0 : i32
    %c0_i32_1 = arith.constant 0 : i32
    return %arg0, %c0_i32, %c0_i32_0 : i32, i32, i32
  }
  func.func @transform_3(%arg0: i32) -> (i32, i32) {
    %c0_i32 = arith.constant 0 : i32
    %c0_i32_0 = arith.constant 0 : i32
    %c0_i32_1 = arith.constant 0 : i32
    return %c0_i32, %c0_i32_0 : i32, i32
  }
  func.func @transform_4(%arg0: i32) -> (i32, i32) {
    %c0_i32 = arith.constant 0 : i32
    %c0_i32_0 = arith.constant 0 : i32
    %c0_i32_1 = arith.constant 0 : i32
    return %c0_i32, %c0_i32_0 : i32, i32
  }
  func.func @transform_5(%arg0: i32) -> (i32, i32) {
    %c0_i32 = arith.constant 0 : i32
    %c0_i32_0 = arith.constant 0 : i32
    %c0_i32_1 = arith.constant 0 : i32
    return %c0_i32, %c0_i32_0 : i32, i32
  }
  func.func @transform_6(%arg0: i32) -> (i32, i32) {
    %c0_i32 = arith.constant 0 : i32
    %c0_i32_0 = arith.constant 0 : i32
    %c0_i32_1 = arith.constant 0 : i32
    return %c0_i32, %c0_i32_0 : i32, i32
  }
  func.func @transform_7(%arg0: i32) -> (i32, i32) {
    %c0_i32 = arith.constant 0 : i32
    %c0_i32_0 = arith.constant 0 : i32
    %c0_i32_1 = arith.constant 0 : i32
    return %c0_i32, %c0_i32_0 : i32, i32
  }
  func.func @transform_8(%arg0: i32) -> (i32, i32) {
    %c0_i32 = arith.constant 0 : i32
    %c0_i32_0 = arith.constant 0 : i32
    %c0_i32_1 = arith.constant 0 : i32
    return %c0_i32, %c0_i32_0 : i32, i32
  }
  func.func @transform_9(%arg0: i32) -> (i32, i32, i32) {
    %c0_i32 = arith.constant 0 : i32
    %c0_i32_0 = arith.constant 0 : i32
    %c0_i32_1 = arith.constant 0 : i32
    return %arg0, %c0_i32, %c0_i32_0 : i32, i32, i32
  }
  func.func @transform_10(%arg0: i32) -> (i32, i32, i32) {
    %c0_i32 = arith.constant 0 : i32
    %c0_i32_0 = arith.constant 0 : i32
    %c0_i32_1 = arith.constant 0 : i32
    return %arg0, %c0_i32, %c0_i32_0 : i32, i32, i32
  }
}

module attributes {stable_mosaic.version = 11 : i64} {
  func.func @_mha_kernel(%arg0: i32, %arg1: memref<4x8x32xf32, #tpu.memory_space<vmem>>, %arg2: memref<4x8x32xf32, #tpu.memory_space<vmem>>, %arg3: memref<4x8x32xf32, #tpu.memory_space<vmem>>, %arg4: memref<32x32xf32, #tpu.memory_space<vmem>>, %arg5: memref<32x32xf32, #tpu.memory_space<vmem>>, %arg6: memref<32x32xf32, #tpu.memory_space<vmem>>, %arg7: memref<32x32xf32, #tpu.memory_space<vmem>>, %arg8: memref<1x32xf32, #tpu.memory_space<vmem>>, %arg9: memref<1x32xf32, #tpu.memory_space<vmem>>, %arg10: memref<4x8x32xf32, #tpu.memory_space<vmem>>, %arg11: memref<4x8x32xf32, #tpu.memory_space<vmem>>, %arg12: memref<32x32xf32, #tpu.memory_space<vmem>>) attributes {dimension_semantics = [#tpu.dimension_semantics<parallel>], iteration_bounds = array<i64: 1>, scalar_prefetch = 0 : i64, scratch_operands = 1 : i64, tpu.core_type = #tpu.core_type<tc>, window_params = [{transform_indices = @transform_0, window_bounds = array<i64: 4, 8, 32>}, {transform_indices = @transform_1, window_bounds = array<i64: 4, 8, 32>}, {transform_indices = @transform_2, window_bounds = array<i64: 4, 8, 32>}, {pipeline_mode = #tpu.pipeline_mode<synchronous>, transform_indices = @transform_3, window_bounds = array<i64: 32, 32>}, {pipeline_mode = #tpu.pipeline_mode<synchronous>, transform_indices = @transform_4, window_bounds = array<i64: 32, 32>}, {pipeline_mode = #tpu.pipeline_mode<synchronous>, transform_indices = @transform_5, window_bounds = array<i64: 32, 32>}, {pipeline_mode = #tpu.pipeline_mode<synchronous>, transform_indices = @transform_6, window_bounds = array<i64: 32, 32>}, {pipeline_mode = #tpu.pipeline_mode<synchronous>, transform_indices = @transform_7, window_bounds = array<i64: 1, 32>}, {pipeline_mode = #tpu.pipeline_mode<synchronous>, transform_indices = @transform_8, window_bounds = array<i64: 1, 32>}, {transform_indices = @transform_9, window_bounds = array<i64: 4, 8, 32>}, {transform_indices = @transform_10, window_bounds = array<i64: 4, 8, 32>}]} {
    %c0 = arith.constant 0 : index
    %c0_0 = arith.constant 0 : index
    %c0_1 = arith.constant 0 : index
    %0 = vector.load %arg1[%c0, %c0_0, %c0_1] : memref<4x8x32xf32, #tpu.memory_space<vmem>>, vector<4x8x32xf32>
    %1 = vector.shape_cast %0 : vector<4x8x32xf32> to vector<32x32xf32>
    %c0_2 = arith.constant 0 : index
    %c0_3 = arith.constant 0 : index
    %c0_4 = arith.constant 0 : index
    %2 = vector.load %arg2[%c0_2, %c0_3, %c0_4] : memref<4x8x32xf32, #tpu.memory_space<vmem>>, vector<4x8x32xf32>
    %3 = vector.shape_cast %2 : vector<4x8x32xf32> to vector<32x32xf32>
    %c0_5 = arith.constant 0 : index
    %c0_6 = arith.constant 0 : index
    %c0_7 = arith.constant 0 : index
    %4 = vector.load %arg3[%c0_5, %c0_6, %c0_7] : memref<4x8x32xf32, #tpu.memory_space<vmem>>, vector<4x8x32xf32>
    %5 = vector.shape_cast %4 : vector<4x8x32xf32> to vector<32x32xf32>
    %c0_8 = arith.constant 0 : index
    %c0_9 = arith.constant 0 : index
    %6 = vector.load %arg4[%c0_8, %c0_9] : memref<32x32xf32, #tpu.memory_space<vmem>>, vector<32x32xf32>
    %cst = arith.constant dense<0.000000e+00> : vector<32x32xf32>
    %7 = tpu.matmul %1, %6, %cst {dimension_numbers = #tpu.dot_dimension_numbers<[1], [0], [0], [1], [0, 0, 1, 1], [], []>} : vector<32x32xf32>, vector<32x32xf32>, vector<32x32xf32> -> vector<32x32xf32>
    %c0_10 = arith.constant 0 : index
    %c0_11 = arith.constant 0 : index
    %8 = vector.load %arg5[%c0_10, %c0_11] : memref<32x32xf32, #tpu.memory_space<vmem>>, vector<32x32xf32>
    %cst_12 = arith.constant dense<0.000000e+00> : vector<32x32xf32>
    %9 = tpu.matmul %3, %8, %cst_12 {dimension_numbers = #tpu.dot_dimension_numbers<[1], [0], [0], [1], [0, 0, 1, 1], [], []>} : vector<32x32xf32>, vector<32x32xf32>, vector<32x32xf32> -> vector<32x32xf32>
    %c0_13 = arith.constant 0 : index
    %c0_14 = arith.constant 0 : index
    %10 = vector.load %arg6[%c0_13, %c0_14] : memref<32x32xf32, #tpu.memory_space<vmem>>, vector<32x32xf32>
    %cst_15 = arith.constant dense<0.000000e+00> : vector<32x32xf32>
    %11 = tpu.matmul %5, %10, %cst_15 {dimension_numbers = #tpu.dot_dimension_numbers<[1], [0], [0], [1], [0, 0, 1, 1], [], []>} : vector<32x32xf32>, vector<32x32xf32>, vector<32x32xf32> -> vector<32x32xf32>
    %12 = vector.shape_cast %7 : vector<32x32xf32> to vector<4x8x32xf32>
    %13 = vector.shape_cast %9 : vector<32x32xf32> to vector<4x8x32xf32>
    %14 = vector.shape_cast %11 : vector<32x32xf32> to vector<4x8x32xf32>
    %15 = vector.extract_strided_slice %12 {offsets = [0, 0, 0], sizes = [4, 8, 8], strides = [1, 1, 1]} : vector<4x8x32xf32> to vector<4x8x8xf32>
    %16 = vector.extract_strided_slice %13 {offsets = [0, 0, 0], sizes = [4, 8, 8], strides = [1, 1, 1]} : vector<4x8x32xf32> to vector<4x8x8xf32>
    %17 = vector.extract_strided_slice %14 {offsets = [0, 0, 0], sizes = [4, 8, 8], strides = [1, 1, 1]} : vector<4x8x32xf32> to vector<4x8x8xf32>
    "tpu.trace_start"() <{level = 10 : i32, message = "bqd,bkd->bqk"}> : () -> ()
    %cst_16 = arith.constant dense<0.000000e+00> : vector<4x8x8xf32>
    %18 = tpu.matmul %15, %16, %cst_16 {dimension_numbers = #tpu.dot_dimension_numbers<[2], [2], [1], [1], [0, 0, 0, 1, 1, 1], [0], [0]>} : vector<4x8x8xf32>, vector<4x8x8xf32>, vector<4x8x8xf32> -> vector<4x8x8xf32>
    "tpu.trace_stop"() : () -> ()
    %cst_17 = arith.constant dense<0xFF800000> : vector<4x8xf32>
    %19 = vector.multi_reduction <maximumf>, %18, %cst_17 [2] : vector<4x8x8xf32> to vector<4x8xf32>
    %20 = vector.shape_cast %19 : vector<4x8xf32> to vector<4x8x1xf32>
    %21 = vector.broadcast %20 : vector<4x8x1xf32> to vector<4x8x8xf32>
    %22 = arith.subf %18, %21 : vector<4x8x8xf32>
    %23 = math.exp %22 : vector<4x8x8xf32>
    %cst_18 = arith.constant dense<0.000000e+00> : vector<4x8xf32>
    %24 = vector.multi_reduction <add>, %23, %cst_18 [2] : vector<4x8x8xf32> to vector<4x8xf32>
    %25 = vector.shape_cast %24 : vector<4x8xf32> to vector<4x8x1xf32>
    %26 = tpu.reciprocal %25 : vector<4x8x1xf32> -> vector<4x8x1xf32>
    %27 = vector.broadcast %26 : vector<4x8x1xf32> to vector<4x8x8xf32>
    %28 = arith.mulf %23, %27 : vector<4x8x8xf32>
    %c0_19 = arith.constant 0 : index
    %c0_20 = arith.constant 0 : index
    %c0_21 = arith.constant 0 : index
    %29 = vector.load %arg11[%c0_19, %c0_20, %c0_21] : memref<4x8x32xf32, #tpu.memory_space<vmem>>, vector<4x8x8xf32>
    tpu.vector_store %arg11[%c0_19, %c0_20, %c0_21], %28 {strides = array<i32>} : memref<4x8x32xf32, #tpu.memory_space<vmem>>, vector<4x8x8xf32>,
    "tpu.trace_start"() <{level = 10 : i32, message = "bqk,bkd->bqd"}> : () -> ()
    %cst_22 = arith.constant dense<0.000000e+00> : vector<4x8x8xf32>
    %30 = tpu.matmul %28, %17, %cst_22 {dimension_numbers = #tpu.dot_dimension_numbers<[2], [1], [1], [2], [0, 0, 0, 1, 1, 2], [0], [0]>} : vector<4x8x8xf32>, vector<4x8x8xf32>, vector<4x8x8xf32> -> vector<4x8x8xf32>
    "tpu.trace_stop"() : () -> ()
    %31 = vector.shape_cast %30 : vector<4x8x8xf32> to vector<32x8xf32>
    %c0_23 = arith.constant 0 : index
    %c0_24 = arith.constant 0 : index
    %32 = vector.load %arg12[%c0_23, %c0_24] : memref<32x32xf32, #tpu.memory_space<vmem>>, vector<32x8xf32>
    tpu.vector_store %arg12[%c0_23, %c0_24], %31 {strides = array<i32>} : memref<32x32xf32, #tpu.memory_space<vmem>>, vector<32x8xf32>,
    %33 = vector.extract_strided_slice %12 {offsets = [0, 0, 8], sizes = [4, 8, 8], strides = [1, 1, 1]} : vector<4x8x32xf32> to vector<4x8x8xf32>
    %34 = vector.extract_strided_slice %13 {offsets = [0, 0, 8], sizes = [4, 8, 8], strides = [1, 1, 1]} : vector<4x8x32xf32> to vector<4x8x8xf32>
    %35 = vector.extract_strided_slice %14 {offsets = [0, 0, 8], sizes = [4, 8, 8], strides = [1, 1, 1]} : vector<4x8x32xf32> to vector<4x8x8xf32>
    "tpu.trace_start"() <{level = 10 : i32, message = "bqd,bkd->bqk"}> : () -> ()
    %cst_25 = arith.constant dense<0.000000e+00> : vector<4x8x8xf32>
    %36 = tpu.matmul %33, %34, %cst_25 {dimension_numbers = #tpu.dot_dimension_numbers<[2], [2], [1], [1], [0, 0, 0, 1, 1, 1], [0], [0]>} : vector<4x8x8xf32>, vector<4x8x8xf32>, vector<4x8x8xf32> -> vector<4x8x8xf32>
    "tpu.trace_stop"() : () -> ()
    %cst_26 = arith.constant dense<0xFF800000> : vector<4x8xf32>
    %37 = vector.multi_reduction <maximumf>, %36, %cst_26 [2] : vector<4x8x8xf32> to vector<4x8xf32>
    %38 = vector.shape_cast %37 : vector<4x8xf32> to vector<4x8x1xf32>
    %39 = vector.broadcast %38 : vector<4x8x1xf32> to vector<4x8x8xf32>
    %40 = arith.subf %36, %39 : vector<4x8x8xf32>
    %41 = math.exp %40 : vector<4x8x8xf32>
    %cst_27 = arith.constant dense<0.000000e+00> : vector<4x8xf32>
    %42 = vector.multi_reduction <add>, %41, %cst_27 [2] : vector<4x8x8xf32> to vector<4x8xf32>
    %43 = vector.shape_cast %42 : vector<4x8xf32> to vector<4x8x1xf32>
    %44 = tpu.reciprocal %43 : vector<4x8x1xf32> -> vector<4x8x1xf32>
    %45 = vector.broadcast %44 : vector<4x8x1xf32> to vector<4x8x8xf32>
    %46 = arith.mulf %41, %45 : vector<4x8x8xf32>
    %c0_28 = arith.constant 0 : index
    %c0_29 = arith.constant 0 : index
    %c8 = arith.constant 8 : index
    %47 = vector.load %arg11[%c0_28, %c0_29, %c8] : memref<4x8x32xf32, #tpu.memory_space<vmem>>, vector<4x8x8xf32>
    tpu.vector_store %arg11[%c0_28, %c0_29, %c8], %46 {strides = array<i32>} : memref<4x8x32xf32, #tpu.memory_space<vmem>>, vector<4x8x8xf32>,
    "tpu.trace_start"() <{level = 10 : i32, message = "bqk,bkd->bqd"}> : () -> ()
    %cst_30 = arith.constant dense<0.000000e+00> : vector<4x8x8xf32>
    %48 = tpu.matmul %46, %35, %cst_30 {dimension_numbers = #tpu.dot_dimension_numbers<[2], [1], [1], [2], [0, 0, 0, 1, 1, 2], [0], [0]>} : vector<4x8x8xf32>, vector<4x8x8xf32>, vector<4x8x8xf32> -> vector<4x8x8xf32>
    "tpu.trace_stop"() : () -> ()
    %49 = vector.shape_cast %48 : vector<4x8x8xf32> to vector<32x8xf32>
    %c0_31 = arith.constant 0 : index
    %c8_32 = arith.constant 8 : index
    %50 = vector.load %arg12[%c0_31, %c8_32] : memref<32x32xf32, #tpu.memory_space<vmem>>, vector<32x8xf32>
    tpu.vector_store %arg12[%c0_31, %c8_32], %49 {strides = array<i32>} : memref<32x32xf32, #tpu.memory_space<vmem>>, vector<32x8xf32>,
    %51 = vector.extract_strided_slice %12 {offsets = [0, 0, 16], sizes = [4, 8, 8], strides = [1, 1, 1]} : vector<4x8x32xf32> to vector<4x8x8xf32>
    %52 = vector.extract_strided_slice %13 {offsets = [0, 0, 16], sizes = [4, 8, 8], strides = [1, 1, 1]} : vector<4x8x32xf32> to vector<4x8x8xf32>
    %53 = vector.extract_strided_slice %14 {offsets = [0, 0, 16], sizes = [4, 8, 8], strides = [1, 1, 1]} : vector<4x8x32xf32> to vector<4x8x8xf32>
    "tpu.trace_start"() <{level = 10 : i32, message = "bqd,bkd->bqk"}> : () -> ()
    %cst_33 = arith.constant dense<0.000000e+00> : vector<4x8x8xf32>
    %54 = tpu.matmul %51, %52, %cst_33 {dimension_numbers = #tpu.dot_dimension_numbers<[2], [2], [1], [1], [0, 0, 0, 1, 1, 1], [0], [0]>} : vector<4x8x8xf32>, vector<4x8x8xf32>, vector<4x8x8xf32> -> vector<4x8x8xf32>
    "tpu.trace_stop"() : () -> ()
    %cst_34 = arith.constant dense<0xFF800000> : vector<4x8xf32>
    %55 = vector.multi_reduction <maximumf>, %54, %cst_34 [2] : vector<4x8x8xf32> to vector<4x8xf32>
    %56 = vector.shape_cast %55 : vector<4x8xf32> to vector<4x8x1xf32>
    %57 = vector.broadcast %56 : vector<4x8x1xf32> to vector<4x8x8xf32>
    %58 = arith.subf %54, %57 : vector<4x8x8xf32>
    %59 = math.exp %58 : vector<4x8x8xf32>
    %cst_35 = arith.constant dense<0.000000e+00> : vector<4x8xf32>
    %60 = vector.multi_reduction <add>, %59, %cst_35 [2] : vector<4x8x8xf32> to vector<4x8xf32>
    %61 = vector.shape_cast %60 : vector<4x8xf32> to vector<4x8x1xf32>
    %62 = tpu.reciprocal %61 : vector<4x8x1xf32> -> vector<4x8x1xf32>
    %63 = vector.broadcast %62 : vector<4x8x1xf32> to vector<4x8x8xf32>
    %64 = arith.mulf %59, %63 : vector<4x8x8xf32>
    %c0_36 = arith.constant 0 : index
    %c0_37 = arith.constant 0 : index
    %c16 = arith.constant 16 : index
    %65 = vector.load %arg11[%c0_36, %c0_37, %c16] : memref<4x8x32xf32, #tpu.memory_space<vmem>>, vector<4x8x8xf32>
    tpu.vector_store %arg11[%c0_36, %c0_37, %c16], %64 {strides = array<i32>} : memref<4x8x32xf32, #tpu.memory_space<vmem>>, vector<4x8x8xf32>,
    "tpu.trace_start"() <{level = 10 : i32, message = "bqk,bkd->bqd"}> : () -> ()
    %cst_38 = arith.constant dense<0.000000e+00> : vector<4x8x8xf32>
    %66 = tpu.matmul %64, %53, %cst_38 {dimension_numbers = #tpu.dot_dimension_numbers<[2], [1], [1], [2], [0, 0, 0, 1, 1, 2], [0], [0]>} : vector<4x8x8xf32>, vector<4x8x8xf32>, vector<4x8x8xf32> -> vector<4x8x8xf32>
    "tpu.trace_stop"() : () -> ()
    %67 = vector.shape_cast %66 : vector<4x8x8xf32> to vector<32x8xf32>
    %c0_39 = arith.constant 0 : index
    %c16_40 = arith.constant 16 : index
    %68 = vector.load %arg12[%c0_39, %c16_40] : memref<32x32xf32, #tpu.memory_space<vmem>>, vector<32x8xf32>
    tpu.vector_store %arg12[%c0_39, %c16_40], %67 {strides = array<i32>} : memref<32x32xf32, #tpu.memory_space<vmem>>, vector<32x8xf32>,
    %69 = vector.extract_strided_slice %12 {offsets = [0, 0, 24], sizes = [4, 8, 8], strides = [1, 1, 1]} : vector<4x8x32xf32> to vector<4x8x8xf32>
    %70 = vector.extract_strided_slice %13 {offsets = [0, 0, 24], sizes = [4, 8, 8], strides = [1, 1, 1]} : vector<4x8x32xf32> to vector<4x8x8xf32>
    %71 = vector.extract_strided_slice %14 {offsets = [0, 0, 24], sizes = [4, 8, 8], strides = [1, 1, 1]} : vector<4x8x32xf32> to vector<4x8x8xf32>
    "tpu.trace_start"() <{level = 10 : i32, message = "bqd,bkd->bqk"}> : () -> ()
    %cst_41 = arith.constant dense<0.000000e+00> : vector<4x8x8xf32>
    %72 = tpu.matmul %69, %70, %cst_41 {dimension_numbers = #tpu.dot_dimension_numbers<[2], [2], [1], [1], [0, 0, 0, 1, 1, 1], [0], [0]>} : vector<4x8x8xf32>, vector<4x8x8xf32>, vector<4x8x8xf32> -> vector<4x8x8xf32>
    "tpu.trace_stop"() : () -> ()
    %cst_42 = arith.constant dense<0xFF800000> : vector<4x8xf32>
    %73 = vector.multi_reduction <maximumf>, %72, %cst_42 [2] : vector<4x8x8xf32> to vector<4x8xf32>
    %74 = vector.shape_cast %73 : vector<4x8xf32> to vector<4x8x1xf32>
    %75 = vector.broadcast %74 : vector<4x8x1xf32> to vector<4x8x8xf32>
    %76 = arith.subf %72, %75 : vector<4x8x8xf32>
    %77 = math.exp %76 : vector<4x8x8xf32>
    %cst_43 = arith.constant dense<0.000000e+00> : vector<4x8xf32>
    %78 = vector.multi_reduction <add>, %77, %cst_43 [2] : vector<4x8x8xf32> to vector<4x8xf32>
    %79 = vector.shape_cast %78 : vector<4x8xf32> to vector<4x8x1xf32>
    %80 = tpu.reciprocal %79 : vector<4x8x1xf32> -> vector<4x8x1xf32>
    %81 = vector.broadcast %80 : vector<4x8x1xf32> to vector<4x8x8xf32>
    %82 = arith.mulf %77, %81 : vector<4x8x8xf32>
    %c0_44 = arith.constant 0 : index
    %c0_45 = arith.constant 0 : index
    %c24 = arith.constant 24 : index
    %83 = vector.load %arg11[%c0_44, %c0_45, %c24] : memref<4x8x32xf32, #tpu.memory_space<vmem>>, vector<4x8x8xf32>
    tpu.vector_store %arg11[%c0_44, %c0_45, %c24], %82 {strides = array<i32>} : memref<4x8x32xf32, #tpu.memory_space<vmem>>, vector<4x8x8xf32>,
    "tpu.trace_start"() <{level = 10 : i32, message = "bqk,bkd->bqd"}> : () -> ()
    %cst_46 = arith.constant dense<0.000000e+00> : vector<4x8x8xf32>
    %84 = tpu.matmul %82, %71, %cst_46 {dimension_numbers = #tpu.dot_dimension_numbers<[2], [1], [1], [2], [0, 0, 0, 1, 1, 2], [0], [0]>} : vector<4x8x8xf32>, vector<4x8x8xf32>, vector<4x8x8xf32> -> vector<4x8x8xf32>
    "tpu.trace_stop"() : () -> ()
    %85 = vector.shape_cast %84 : vector<4x8x8xf32> to vector<32x8xf32>
    %c0_47 = arith.constant 0 : index
    %c24_48 = arith.constant 24 : index
    %86 = vector.load %arg12[%c0_47, %c24_48] : memref<32x32xf32, #tpu.memory_space<vmem>>, vector<32x8xf32>
    tpu.vector_store %arg12[%c0_47, %c24_48], %85 {strides = array<i32>} : memref<32x32xf32, #tpu.memory_space<vmem>>, vector<32x8xf32>,
    %c0_49 = arith.constant 0 : index
    %c0_50 = arith.constant 0 : index
    %87 = vector.load %arg12[%c0_49, %c0_50] : memref<32x32xf32, #tpu.memory_space<vmem>>, vector<32x32xf32>
    %c0_51 = arith.constant 0 : index
    %c0_52 = arith.constant 0 : index
    %88 = vector.load %arg7[%c0_51, %c0_52] : memref<32x32xf32, #tpu.memory_space<vmem>>, vector<32x32xf32>
    %cst_53 = arith.constant dense<0.000000e+00> : vector<32x32xf32>
    %89 = tpu.matmul %87, %88, %cst_53 {dimension_numbers = #tpu.dot_dimension_numbers<[1], [0], [0], [1], [0, 0, 1, 1], [], []>} : vector<32x32xf32>, vector<32x32xf32>, vector<32x32xf32> -> vector<32x32xf32>
    %90 = arith.addf %89, %1 : vector<32x32xf32>
    %cst_54 = arith.constant dense<0.000000e+00> : vector<32xf32>
    %91 = vector.multi_reduction <add>, %90, %cst_54 [1] : vector<32x32xf32> to vector<32xf32>
    %92 = vector.shape_cast %91 : vector<32xf32> to vector<32x1xf32>
    %cst_55 = arith.constant 3.200000e+01 : f32
    %93 = vector.broadcast %cst_55 : f32 to vector<32x1xf32>
    %94 = arith.divf %92, %93 : vector<32x1xf32>
    %95 = vector.broadcast %94 : vector<32x1xf32> to vector<32x32xf32>
    %96 = arith.subf %90, %95 : vector<32x32xf32>
    %97 = arith.mulf %96, %96 : vector<32x32xf32>
    %cst_56 = arith.constant dense<0.000000e+00> : vector<32xf32>
    %98 = vector.multi_reduction <add>, %97, %cst_56 [1] : vector<32x32xf32> to vector<32xf32>
    %99 = vector.shape_cast %98 : vector<32xf32> to vector<32x1xf32>
    %cst_57 = arith.constant 3.200000e+01 : f32
    %100 = vector.broadcast %cst_57 : f32 to vector<32x1xf32>
    %101 = arith.divf %99, %100 : vector<32x1xf32>
    %102 = vector.broadcast %94 : vector<32x1xf32> to vector<32x32xf32>
    %103 = arith.subf %90, %102 : vector<32x32xf32>
    %cst_58 = arith.constant 9.99999997E-7 : f32
    %104 = vector.broadcast %cst_58 : f32 to vector<32x1xf32>
    %105 = arith.addf %101, %104 : vector<32x1xf32>
    %106 = math.rsqrt %105 : vector<32x1xf32>
    %107 = vector.broadcast %106 : vector<32x1xf32> to vector<32x32xf32>
    %108 = arith.mulf %103, %107 : vector<32x32xf32>
    %c0_59 = arith.constant 0 : index
    %c0_60 = arith.constant 0 : index
    %109 = vector.load %arg8[%c0_59, %c0_60] : memref<1x32xf32, #tpu.memory_space<vmem>>, vector<1x32xf32>
    %110 = vector.broadcast %109 : vector<1x32xf32> to vector<32x32xf32>
    %111 = arith.mulf %108, %110 : vector<32x32xf32>
    %c0_61 = arith.constant 0 : index
    %c0_62 = arith.constant 0 : index
    %112 = vector.load %arg9[%c0_61, %c0_62] : memref<1x32xf32, #tpu.memory_space<vmem>>, vector<1x32xf32>
    %113 = vector.broadcast %112 : vector<1x32xf32> to vector<32x32xf32>
    %114 = arith.addf %111, %113 : vector<32x32xf32>
    %115 = vector.shape_cast %114 : vector<32x32xf32> to vector<4x8x32xf32>
    %c0_63 = arith.constant 0 : index
    %c0_64 = arith.constant 0 : index
    %c0_65 = arith.constant 0 : index
    %116 = vector.load %arg10[%c0_63, %c0_64, %c0_65] : memref<4x8x32xf32, #tpu.memory_space<vmem>>, vector<4x8x32xf32>
    tpu.vector_store %arg10[%c0_63, %c0_64, %c0_65], %115 {strides = array<i32>} : memref<4x8x32xf32, #tpu.memory_space<vmem>>, vector<4x8x32xf32>,
    return
  }
  func.func @transform_0(%arg0: i32) -> (i32, i32, i32) {
    %c0_i32 = arith.constant 0 : i32
    %c0_i32_0 = arith.constant 0 : i32
    %c0_i32_1 = arith.constant 0 : i32
    return %arg0, %c0_i32, %c0_i32_0 : i32, i32, i32
  }
  func.func @transform_1(%arg0: i32) -> (i32, i32, i32) {
    %c0_i32 = arith.constant 0 : i32
    %c0_i32_0 = arith.constant 0 : i32
    %c0_i32_1 = arith.constant 0 : i32
    return %arg0, %c0_i32, %c0_i32_0 : i32, i32, i32
  }
  func.func @transform_2(%arg0: i32) -> (i32, i32, i32) {
    %c0_i32 = arith.constant 0 : i32
    %c0_i32_0 = arith.constant 0 : i32
    %c0_i32_1 = arith.constant 0 : i32
    return %arg0, %c0_i32, %c0_i32_0 : i32, i32, i32
  }
  func.func @transform_3(%arg0: i32) -> (i32, i32) {
    %c0_i32 = arith.constant 0 : i32
    %c0_i32_0 = arith.constant 0 : i32
    %c0_i32_1 = arith.constant 0 : i32
    return %c0_i32, %c0_i32_0 : i32, i32
  }
  func.func @transform_4(%arg0: i32) -> (i32, i32) {
    %c0_i32 = arith.constant 0 : i32
    %c0_i32_0 = arith.constant 0 : i32
    %c0_i32_1 = arith.constant 0 : i32
    return %c0_i32, %c0_i32_0 : i32, i32
  }
  func.func @transform_5(%arg0: i32) -> (i32, i32) {
    %c0_i32 = arith.constant 0 : i32
    %c0_i32_0 = arith.constant 0 : i32
    %c0_i32_1 = arith.constant 0 : i32
    return %c0_i32, %c0_i32_0 : i32, i32
  }
  func.func @transform_6(%arg0: i32) -> (i32, i32) {
    %c0_i32 = arith.constant 0 : i32
    %c0_i32_0 = arith.constant 0 : i32
    %c0_i32_1 = arith.constant 0 : i32
    return %c0_i32, %c0_i32_0 : i32, i32
  }
  func.func @transform_7(%arg0: i32) -> (i32, i32) {
    %c0_i32 = arith.constant 0 : i32
    %c0_i32_0 = arith.constant 0 : i32
    %c0_i32_1 = arith.constant 0 : i32
    return %c0_i32, %c0_i32_0 : i32, i32
  }
  func.func @transform_8(%arg0: i32) -> (i32, i32) {
    %c0_i32 = arith.constant 0 : i32
    %c0_i32_0 = arith.constant 0 : i32
    %c0_i32_1 = arith.constant 0 : i32
    return %c0_i32, %c0_i32_0 : i32, i32
  }
  func.func @transform_9(%arg0: i32) -> (i32, i32, i32) {
    %c0_i32 = arith.constant 0 : i32
    %c0_i32_0 = arith.constant 0 : i32
    %c0_i32_1 = arith.constant 0 : i32
    return %arg0, %c0_i32, %c0_i32_0 : i32, i32, i32
  }
  func.func @transform_10(%arg0: i32) -> (i32, i32, i32) {
    %c0_i32 = arith.constant 0 : i32
    %c0_i32_0 = arith.constant 0 : i32
    %c0_i32_1 = arith.constant 0 : i32
    return %arg0, %c0_i32, %c0_i32_0 : i32, i32, i32
  }
}

</mosaic_0001>

<bundles_post_ra>
// kernel: tpu_custom_call.1
= control target key start
LH: loop header
LB: loop body
LE: loop exit
PB: predicated region body
PF: predicated region fallthrough
CT: control target
= control target key end

     0   :  { %16 = vsyncpa [#allocation4], 0  ;;  %s2836_s0 = inlined_call_operand.hbm [shape: f32[4,8,32], index: 0, kind: input, shape index: {}]   ;;  %s2837_s1 = inlined_call_operand.hbm [shape: f32[4,8,32], index: 1, kind: input, shape index: {}]   ;;  %s2838_s2 = inlined_call_operand.hbm [shape: f32[4,8,32], index: 2, kind: input, shape index: {}]   ;;  %s2839_s3 = inlined_call_operand.hbm [shape: f32[32,32], index: 3, kind: input, shape index: {}]   ;;  %s2840_s4 = inlined_call_operand.hbm [shape: f32[32,32], index: 4, kind: input, shape index: {}]   ;;  %s2841_s5 = inlined_call_operand.hbm [shape: f32[32,32], index: 5, kind: input, shape index: {}]   ;;  %s2842_s6 = inlined_call_operand.hbm [shape: f32[32,32], index: 6, kind: input, shape index: {}]   ;;  %s2843_s7 = inlined_call_operand.vmem [shape: f32[1,32], index: 7, kind: input, shape index: {}]   ;;  %s2844_s8 = inlined_call_operand.vmem [shape: f32[1,32], index: 8, kind: input, shape index: {}]   ;;  %s2845_s9 = inlined_call_operand.hbm [shape: f32[4,8,32], index: 9, kind: output, shape index: {0}]   ;;  %s2846_s10 = inlined_call_operand.hbm [shape: f32[4,8,32], index: 10, kind: output, shape index: {1}]  }
   0x1   :  { %17 = vsyncpa [#allocation7], 0 }
   0x2   :  { %18 = vsyncpa [#allocation10], 0 }
   0x3   :  { %19 = vsyncpa [#allocation13], 0 }
   0x4   :  { %20 = vsyncpa [#allocation5], 0 }
   0x5   :  { %21 = vsyncpa [#allocation17], 0  ;;  %s39_s15 = sshll.u32 %s2837_s1, 4  ;;  %s2261_s16 = smov [#allocation6]   ;;  %s40_s15 = int_to_ptr.hbm [resolvable:$true] %s39_s15 }
   0x6   :  { %s41_s17 = sshll.u32 %s2261_s16, 4  ;;  %s65_s20 = sshll.u32 %s2839_s3, 4  ;;  %s42_s17 = int_to_ptr.vmem [resolvable:$true] %s41_s17  ;;  %s66_s20 = int_to_ptr.hbm [resolvable:$true] %s65_s20 }
   0x7   :  { %s2262_s21 = smov 128   ;;  %s2263_s22 = smov 8  }
   0x8   :  { %47 = dma.hbm_to_vmem [thread:$0]  %s40_s15, 512, %s42_s17, [#allocation7], %s2262_s21, %s2262_s21, %s2263_s22  }
   0x9   :  { %s2264_s23 = smov [#allocation9]   ;;  %s91_s1 = sshll.u32 %s2841_s5, 4  ;;  %s92_s1 = int_to_ptr.hbm [resolvable:$true] %s91_s1 }
   0xa   :  { %s67_s24 = sshll.u32 %s2264_s23, 4  ;;  %s26_s28 = sshll.u32 %s2836_s0, 4  ;;  %s68_s24 = int_to_ptr.vmem [resolvable:$true] %s67_s24  ;;  %s27_s28 = int_to_ptr.hbm [resolvable:$true] %s26_s28 }
   0xb   :  { %73 = dma.hbm_to_vmem [thread:$0]  %s66_s20, 512, %s68_s24, [#allocation10], %s2262_s21, %s2262_s21, %s2263_s22  }
   0xc   :  { %s2265_s29 = smov [#allocation12]   ;;  %s2266_s11 = smov [#allocation3]  }
   0xd   :  { %s93_s30 = sshll.u32 %s2265_s29, 4  ;;  %s28_s5 = sshll.u32 %s2266_s11, 4  ;;  %s94_s30 = int_to_ptr.vmem [resolvable:$true] %s93_s30  ;;  %s29_s5 = int_to_ptr.vmem [resolvable:$true] %s28_s5 }
   0xe   :  { %99 = dma.hbm_to_vmem [thread:$0]  %s92_s1, 512, %s94_s30, [#allocation13], %s2262_s21, %s2262_s21, %s2263_s22  }
   0xf   :  { %s52_s14 = sshll.u32 %s2838_s2, 4  ;;  %s78_s16 = sshll.u32 %s2840_s4, 4  ;;  %s53_s14 = int_to_ptr.hbm [resolvable:$true] %s52_s14  ;;  %s79_s16 = int_to_ptr.hbm [resolvable:$true] %s78_s16 }
  0x10   :  { %34 = dma.hbm_to_vmem [thread:$0]  %s27_s28, 512, %s29_s5, [#allocation4], %s2262_s21, %s2262_s21, %s2263_s22  }
  0x11   :  { %s2267_s17 = smov [#allocation8]   ;;  %s2268_s19 = smov [#allocation11]  }
  0x12   :  { %s54_s18 = sshll.u32 %s2267_s17, 4  ;;  %s80_s2 = sshll.u32 %s2268_s19, 4  ;;  %s55_s18 = int_to_ptr.vmem [resolvable:$true] %s54_s18  ;;  %s81_s2 = int_to_ptr.vmem [resolvable:$true] %s80_s2 }
  0x13   :  { %60 = dma.hbm_to_vmem [thread:$0]  %s53_s14, 512, %s55_s18, [#allocation7], %s2262_s21, %s2262_s21, %s2263_s22  }
  0x14   :  { %s104_s24 = sshll.u32 %s2842_s6, 4  ;;  %s2269_s4 = smov [#allocation14]   ;;  %s105_s24 = int_to_ptr.hbm [resolvable:$true] %s104_s24 }
  0x15   :  { %86 = dma.hbm_to_vmem [thread:$0]  %s79_s16, 512, %s81_s2, [#allocation10], %s2262_s21, %s2262_s21, %s2263_s22  }
  0x16   :  { %s106_s25 = sshll.u32 %s2269_s4, 4  ;;  %s107_s25 = int_to_ptr.vmem [resolvable:$true] %s106_s25 }
  0x17   :  { %112 = dma.hbm_to_vmem [thread:$0]  %s105_s24, 512, %s107_s25, [#allocation13], %s2262_s21, %s2262_s21, %s2263_s22  }
  0x18   :  { %2249 = dma.done.wait [#allocation4], 512  }
  0x19   :  { %2250 = vsyncadd [#allocation4], 4294966784 }
  0x1a   :  { %2251 = dma.done.wait [#allocation7], 1024  }
  0x1b   :  { %2252 = vsyncadd [#allocation7], 4294966272 }
  0x1c   :  { %2253 = dma.done.wait [#allocation10], 1024  }
  0x1d   :  { %2254 = vsyncadd [#allocation10], 4294966272 }
  0x1e   :  { %2255 = dma.done.wait [#allocation13], 1024  }
  0x1f   :  { %2256 = vsyncadd [#allocation13], 4294966272  ;;  %v160_v0 = vld [vmem:[#allocation9 + $0x18] sm:$0xff]  ;;  %v159_v1 = vld [vmem:[#allocation9 + $0x10] sm:$0xff]  ;;  %vm161_vm0 = vcmask 261120   ;;  %vm293_vm1 = vcmask 64512  }
  0x20   :  { %1913 = vmatpush.msra.mxu1 %v160_v0  ;;  %186 = vmatpush.msra.mxu0 %v160_v0  ;;  %v158_v2 = vld [vmem:[#allocation9 + $0x8] sm:$0xff]  ;;  %v157_v3 = vld [vmem:[#allocation9] sm:$0xff]  ;;  %v148_v4 = vld [vmem:[#allocation3 + $0x18] sm:$0xff]  ;;  %s2270_s6 = smov 120   ;;  %s2271_s26 = smov 112  }
  0x21   :  { %v145_v5 = vld [vmem:[#allocation3] sm:$0xff]  ;;  %v206_v6 = vld [vmem:[#allocation11 + $0x18] sm:$0xff]  ;;  %v205_v7 = vld [vmem:[#allocation11 + $0x10] sm:$0xff]  ;;  %s2272_s1 = smov 104   ;;  %s2273_s3 = smov 16  }
  0x22   :  { %1914 = vmatpush.msra.mxu1 %v159_v1  ;;  %187 = vmatpush.msra.mxu0 %v159_v1  ;;  %v251_v8 = vld [vmem:[#allocation12 + $0x18] sm:$0xff]  ;;  %v250_v9 = vld [vmem:[#allocation12 + $0x10] sm:$0xff]  ;;  %v204_v10 = vld [vmem:[#allocation11 + $0x8] sm:$0xff]  ;;  %s2274_s27 = smov 24   ;;  %s1828_s13 = sshll.u32 %s2846_s10, 4  ;;  %s1829_s13 = int_to_ptr.hbm [resolvable:$true] %s1828_s13 }
  0x23   :  { %276 = vmatpush.msra.mxu2 %v251_v8  ;;  %v249_v11 = vld [vmem:[#allocation12 + $0x8] sm:$0xff]  ;;  %v203_v12 = vld [vmem:[#allocation11] sm:$0xff]  ;;  %v147_v18 = vld [vmem:[#allocation3 + $0x10] sm:$0xff]  ;;  %s2277_s14 = smov [#allocation15]   ;;  %s1815_s17 = sshll.u32 %s2845_s9, 4  ;;  %s1816_s17 = int_to_ptr.hbm [resolvable:$true] %s1815_s17 }
  0x24   :  { %1915 = vmatpush.msra.mxu1 %v158_v2  ;;  %188 = vmatpush.msra.mxu0 %v158_v2  ;;  %v248_v13 = vld [vmem:[#allocation12] sm:$0xff]  ;;  %v146_v15 = vld [vmem:[#allocation3 + $0x8] sm:$0xff]  ;;  %v151_v20 = vld [vmem:[#allocation6 + $0x10] sm:$0xff]  ;;  %s1813_s0 = sshll.u32 %s2277_s14, 4  ;;  %s1814_s0 = int_to_ptr.vmem [resolvable:$true] %s1813_s0 }
  0x25   :  { %277 = vmatpush.msra.mxu2 %v250_v9  ;;  %v149_v14 = vld [vmem:[#allocation6] sm:$0xff]  ;;  %v150_v17 = vld [vmem:[#allocation6 + $0x8] sm:$0xff]  ;;  %v155_v21 = vld [vmem:[#allocation8 + $0x10] sm:$0xff] }
  0x26   :  { %1916 = vmatpush.msra.mxu1 %v157_v3  ;;  %189 = vmatpush.msra.mxu0 %v157_v3  ;;  %v153_v16 = vld [vmem:[#allocation8] sm:$0xff]  ;;  %v154_v19 = vld [vmem:[#allocation8 + $0x8] sm:$0xff]  ;;  %v152_v22 = vld [vmem:[#allocation6 + $0x18] sm:$0xff] }
  0x27   :  { %1852 = vmatmul.msk.f32.vlgmr.msra.gmra.mxu1 %vm161_vm0, %v148_v4  ;;  %1849 = vmatmul.msk.f32.vlgmr.msra.gmra.mxu0 %vm161_vm0, %v145_v5  ;;  %v156_v23 = vld [vmem:[#allocation8 + $0x18] sm:$0xff] }
  0x28   :  { %231 = vmatpush.msrb.mxu1 %v206_v6  ;;  %278 = vmatpush.msra.mxu2 %v249_v11 }
  0x2a   :  { %232 = vmatpush.msrb.mxu1 %v205_v7  ;;  %279 = vmatpush.msra.mxu2 %v248_v13 }
  0x2b   :  { %1857 = vmatmul.msk.f32.vlgmr.msra.gmra.mxu2 %vm161_vm0, %v153_v16 }
  0x2c   :  { %233 = vmatpush.msrb.mxu1 %v204_v10 }
  0x2e   :  { %234 = vmatpush.msrb.mxu1 %v203_v12 }
  0x2f   :  { %1853 = vmatmul.msk.f32.vlgmr.msrb.gmra.mxu1 %vm161_vm0, %v149_v14  ;;  %1850 = vmatmul.msk.f32.gmra.mxu0 %vm161_vm0, %v146_v15 }
  0x33   :  { %1858 = vmatmul.msk.f32.gmra.mxu2 %vm161_vm0, %v154_v19 }
  0x37   :  { %1854 = vmatmul.msk.f32.gmra.mxu1 %vm161_vm0, %v150_v17  ;;  %1851 = vmatmul.msk.f32.gmra.mxu0 %vm161_vm0, %v147_v18 }
  0x3b   :  { %1859 = vmatmul.msk.f32.gmra.mxu2 %vm161_vm0, %v155_v21 }
  0x3f   :  { %1855 = vmatmul.msk.f32.gmra.mxu1 %vm161_vm0, %v151_v20 }
  0x43   :  { %1860 = vmatmul.msk.f32.gmra.mxu2 %vm161_vm0, %v156_v23 }
  0x47   :  { %1856 = vmatmul.msk.f32.gmra.mxu1 %vm161_vm0, %v152_v22 }
  0xa4   :  { %v2387_v24 = vpop.f32.mrf.mxu1  ;;  %v2389_v25 = vpop.f32.mrf.mxu0 }
  0xac   :  { %v2391_v26 = vpop.f32.mrf.mxu1  ;;  %v2397_v27 = vpop.f32.mrf.mxu0 }
  0xad   :  { %1861 = vmatpush.xpose.msk.msrb.mxu2 %vm293_vm1, %v2391_v26 }
  0xae   :  { %v2399_v28 = vpop.f32.mrf.mxu2 }
  0xb0   :  { %1862 = vmatmul.msk.f32.vlgmr.msrb.gmra.mxu2 %vm293_vm1, %v2389_v25 }
  0xb4   :  { %v2401_v29 = vpop.f32.mrf.mxu1  ;;  %v2414_v32 = vpop.f32.mrf.mxu0 }
  0xb5   :  { %1863 = vmatpush.xpose.msk.msra.mxu3 %vm293_vm1, %v2401_v29 }
  0xb6   :  { %v2407_v30 = vpop.f32.mrf.mxu2 }
  0xb7   :  { %539 = vmatpush.msrb.mxu0 %v2407_v30 }
  0xb8   :  { %1864 = vmatmul.msk.f32.vlgmr.msra.gmra.mxu3 %vm293_vm1, %v2397_v27 }
  0xbc   :  { %v2409_v31 = vpop.f32.mrf.mxu1 }
  0xbd   :  { %1865 = vmatpush.xpose.msk.msrb.mxu3 %vm293_vm1, %v2409_v31 }
  0xbe   :  { %v2418_v33 = vpop.f32.mrf.mxu2 }
  0xbf   :  { %562 = vmatpush.msra.mxu1 %v2418_v33 }
  0xc0   :  { %1866 = vmatmul.msk.f32.vlgmr.msrb.gmra.mxu3 %vm293_vm1, %v2414_v32 }
  0xc4   :  { %v2420_v34 = vpop.f32.mrf.mxu1 }
  0xc5   :  { %1867 = vmatpush.xpose.msk.msra.mxu3 %vm293_vm1, %v2420_v34  ;;  %680 = vrot.lane.b32.xlu2 %v2420_v34, %s2270_s6 }
  0xc6   :  { %v2430_v35 = vpop.f32.mrf.mxu2 }
  0xc7   :  { %585 = vmatpush.msra.mxu2 %v2430_v35  ;;  %v2458_v2 = vpack.i.bf16 %v2430_v35, %v2399_v28 }
  0xc8   :  { %1868 = vmatmul.msk.f32.vlgmr.msra.gmra.mxu3 %vm293_vm1, %v2387_v24 }
  0xc9   :  { %516 = vmatpush.msrb.mxu3 %v2399_v28 }
 0x11f   :  { %v681_v36 = vpop.permute.xlu2 %680 }
 0x120   :  { %1879 = vmatpush.xpose.msk.msrb.mxu2 %vm293_vm1, %v681_v36 }
 0x133   :  { %v317_v37 = vpop.f32.mrf.mxu2 }
 0x134   :  { %v398_v38 = vsel %vm293_vm1, %v317_v37, -inf }
 0x135   :  { %399 = vmax.xlane.f32.xlu0 %v398_v38 }
 0x13b   :  { %v343_v39 = vpop.f32.mrf.mxu3 }
 0x13c   :  { %v401_v40 = vsel %vm293_vm1, %v343_v39, -inf }
 0x13d   :  { %402 = vmax.xlane.f32.xlu1 %v401_v40 }
 0x143   :  { %v369_v41 = vpop.f32.mrf.mxu3 }
 0x144   :  { %v404_v42 = vsel %vm293_vm1, %v369_v41, -inf }
 0x145   :  { %405 = vmax.xlane.f32.xlu1 %v404_v42 }
 0x14b   :  { %v395_v43 = vpop.f32.mrf.mxu3 }
 0x14c   :  { %v407_v44 = vsel %vm293_vm1, %v395_v43, -inf }
 0x14d   :  { %408 = vmax.xlane.f32.xlu0 %v407_v44 }
 0x15e   :  { %596 = vrot.lane.b32.xlu1 %v2391_v26, %s2270_s6 }
 0x161   :  { %594 = vrot.lane.b32.xlu0 %v2389_v25, %s2270_s6 }
 0x1a8   :  { %v400_v45 = vpop.xlane.xlu0 %399 }
 0x1a9   :  { %v410_v46 = vsub.f32 %v317_v37, %v400_v45 }
 0x1ab   :  { %v414_v47 = vmul.f32 1.442695, %v410_v46 }
 0x1ad   :  { %1955 = vpow2.f32 %v414_v47 }
 0x1b0   :  { %v403_v48 = vpop.xlane.xlu1 %402 }
 0x1b1   :  { %v411_v49 = vsub.f32 %v343_v39, %v403_v48 }
 0x1b3   :  { %v1956_v50 = vpop.eup %1955  ;;  %v416_v51 = vmul.f32 1.442695, %v411_v49 }
 0x1b4   :  { %v422_v52 = vsel %vm293_vm1, %v1956_v50, 0.0 }
 0x1b5   :  { %1957 = vpow2.f32 %v416_v51  ;;  %423 = vadd.xlane.f32.xlu2 %v422_v52 }
 0x1b8   :  { %v406_v53 = vpop.xlane.xlu1 %405 }
 0x1b9   :  { %v412_v54 = vsub.f32 %v369_v41, %v406_v53 }
 0x1bb   :  { %v2443_v55 = vpop.eup %1957  ;;  %v418_v56 = vmul.f32 1.442695, %v412_v54 }
 0x1bc   :  { %v425_v57 = vsel %vm293_vm1, %v2443_v55, 0.0 }
 0x1bd   :  { %1959 = vpow2.f32 %v418_v56  ;;  %426 = vadd.xlane.f32.xlu1 %v425_v57 }
 0x1c0   :  { %v409_v58 = vpop.xlane.xlu0 %408 }
 0x1c1   :  { %v413_v59 = vsub.f32 %v395_v43, %v409_v58 }
 0x1c3   :  { %v2447_v60 = vpop.eup %1959  ;;  %v420_v61 = vmul.f32 1.442695, %v413_v59 }
 0x1c4   :  { %v428_v62 = vsel %vm293_vm1, %v2447_v60, 0.0 }
 0x1c5   :  { %1961 = vpow2.f32 %v420_v61  ;;  %429 = vadd.xlane.f32.xlu0 %v428_v62 }
 0x1cb   :  { %v2451_v63 = vpop.eup %1961 }
 0x1cc   :  { %v431_v0 = vsel %vm293_vm1, %v2451_v63, 0.0 }
 0x1cd   :  { %432 = vadd.xlane.f32.xlu2 %v431_v0 }
 0x1d0   :  { %v597_v1 = vpop.permute.xlu1 %596 }
 0x1d1   :  { %1873 = vmatpush.xpose.msk.msra.mxu3 %vm293_vm1, %v597_v1 }
 0x1d3   :  { %v595_v5 = vpop.permute.xlu0 %594 }
 0x1d6   :  { %1939 = vrot.lane.b32.xlu1 %v2458_v2, %s2270_s6 }
 0x1d9   :  { %652 = vrot.lane.b32.xlu0 %v2409_v31, %s2270_s6 }
 0x1e1   :  { %624 = vrot.lane.b32.xlu0 %v2401_v29, %s2270_s6 }
 0x1e5   :  { %678 = vrot.lane.b32.xlu2 %v2387_v24, %s2270_s6 }
 0x1e9   :  { %949 = vrot.lane.b32.xlu0 %v2391_v26, %s2271_s26 }
 0x1ed   :  { %650 = vrot.lane.b32.xlu2 %v2414_v32, %s2270_s6 }
 0x1f5   :  { %622 = vrot.lane.b32.xlu2 %v2397_v27, %s2270_s6 }
 0x228   :  { %v424_v3 = vpop.xlane.xlu2 %423 }
 0x229   :  { %1963 = vrcp.f32 %v424_v3  ;;  %v445_v9 = vand.u32 2147483648, %v424_v3  ;;  %v443_v11 = vand.u32 2147483647, %v424_v3  ;;  %vm439_vm3 = vweird.f32 %v424_v3 }
 0x22b   :  { %v446_v14 = vor.u32 1.1754944e-38, %v445_v9  ;;  %vm444_vm5 = vcmp.eq.f32.partialorder %v443_v11, 8.507059e+37 }
 0x22f   :  { %v1964_v4 = vpop.eup %1963 }
 0x230   :  { %v435_v6 = vmul.f32 %v1964_v4, %v424_v3  ;;  %v427_v7 = vpop.xlane.xlu1 %426  ;;  %vm440_vm2 = vweird.f32 %v1964_v4 }
 0x231   :  { %1965 = vrcp.f32 %v427_v7  ;;  %vm441_vm4 = vmor %vm439_vm3, %vm440_vm2  ;;  %v459_v22 = vand.u32 2147483648, %v427_v7  ;;  %v457_v23 = vand.u32 2147483647, %v427_v7  ;;  %vm453_vm7 = vweird.f32 %v427_v7 }
 0x232   :  { %v436_v8 = vsub.f32 1.0, %v435_v6 }
 0x233   :  { %v460_v38 = vor.u32 1.1754944e-38, %v459_v22  ;;  %vm458_vm9 = vcmp.eq.f32.partialorder %v457_v23, 8.507059e+37 }
 0x234   :  { %v437_v10 = vmul.f32 %v1964_v4, %v436_v8 }
 0x236   :  { %v438_v12 = vadd.f32 %v1964_v4, %v437_v10 }
 0x237   :  { %v1966_v13 = vpop.eup %1965 }
 0x238   :  { %v442_v15 = vsel %vm441_vm4, %v1964_v4, %v438_v12  ;;  %v449_v16 = vmul.f32 %v1966_v13, %v427_v7  ;;  %v430_v17 = vpop.xlane.xlu0 %429  ;;  %vm454_vm6 = vweird.f32 %v1966_v13 }
 0x239   :  { %v447_v18 = vsel %vm444_vm5, %v446_v14, %v442_v15  ;;  %1967 = vrcp.f32 %v430_v17  ;;  %vm455_vm8 = vmor %vm453_vm7, %vm454_vm6  ;;  %v473_v44 = vand.u32 2147483648, %v430_v17  ;;  %v471_v47 = vand.u32 2147483647, %v430_v17 }
 0x23a   :  { %v450_v19 = vsub.f32 1.0, %v449_v16  ;;  %v490_v20 = vmul.f32 %v1956_v50, %v447_v18  ;;  %vm467_vm11 = vweird.f32 %v430_v17 }
 0x23b   :  { %v474_v50 = vor.u32 1.1754944e-38, %v473_v44  ;;  %vm472_vm13 = vcmp.eq.f32.partialorder %v471_v47, 8.507059e+37 }
 0x23c   :  { %v451_v21 = vmul.f32 %v1966_v13, %v450_v19  ;;  %1869 = vmatmul.msk.f32.vlgmr.msrb.gmra.mxu3 %vm293_vm1, %v490_v20  ;;  %494 = vst.msk [vmem:[#allocation16] sm:$0xff] %vm293_vm1, %v490_v20 }
 0x23e   :  { %v452_v36 = vadd.f32 %v1966_v13, %v451_v21 }
 0x23f   :  { %v1968_v37 = vpop.eup %1967 }
 0x240   :  { %v463_v39 = vmul.f32 %v1968_v37, %v430_v17  ;;  %v433_v40 = vpop.xlane.xlu2 %432  ;;  %v456_v41 = vsel %vm455_vm8, %v1966_v13, %v452_v36  ;;  %vm468_vm10 = vweird.f32 %v1968_v37 }
 0x241   :  { %1969 = vrcp.f32 %v433_v40  ;;  %v461_v43 = vsel %vm458_vm9, %v460_v38, %v456_v41  ;;  %vm469_vm12 = vmor %vm467_vm11, %vm468_vm10  ;;  %v487_v59 = vand.u32 2147483648, %v433_v40  ;;  %v485_v0 = vand.u32 2147483647, %v433_v40 }
 0x242   :  { %v464_v42 = vsub.f32 1.0, %v463_v39  ;;  %v491_v45 = vmul.f32 %v2443_v55, %v461_v43  ;;  %vm481_vm15 = vweird.f32 %v433_v40 }
 0x243   :  { %v488_v3 = vor.u32 1.1754944e-38, %v487_v59  ;;  %vm486_vm3 = vcmp.eq.f32.partialorder %v485_v0, 8.507059e+37 }
 0x244   :  { %v465_v46 = vmul.f32 %v1968_v37, %v464_v42  ;;  %1874 = vmatmul.msk.f32.vlgmr.msra.gmra.mxu3 %vm293_vm1, %v595_v5  ;;  %1870 = vmatmul.msk.f32.vlgmr.msrb.gmra.mxu0 %vm293_vm1, %v491_v45  ;;  %495 = vst.msk [vmem:[#allocation16 + $0x8] sm:$0xff] %vm293_vm1, %v491_v45 }
 0x246   :  { %v466_v48 = vadd.f32 %v1968_v37, %v465_v46 }
 0x247   :  { %v1970_v49 = vpop.eup %1969 }
 0x248   :  { %v470_v51 = vsel %vm469_vm12, %v1968_v37, %v466_v48  ;;  %v477_v52 = vmul.f32 %v1970_v49, %v433_v40  ;;  %v1940_v53 = vpop.permute.xlu1 %1939  ;;  %v679_v54 = vpop.permute.xlu2 %678  ;;  %vm482_vm14 = vweird.f32 %v1970_v49 }
 0x249   :  { %v475_v55 = vsel %vm472_vm13, %v474_v50, %v470_v51  ;;  %v1941_v56 = vunpack.i.l.bf16 %v1940_v53  ;;  %vm483_vm2 = vmor %vm481_vm15, %vm482_vm14  ;;  %v1942_v7 = vunpack.i.h.bf16 %v1940_v53 }
 0x24a   :  { %v478_v57 = vsub.f32 1.0, %v477_v52  ;;  %v492_v58 = vmul.f32 %v2447_v60, %v475_v55 }
 0x24b   :  { %844 = vmatpush.msrb.mxu3 %v1941_v56  ;;  %v653_v61 = vpop.permute.xlu0 %652 }
 0x24c   :  { %v479_v62 = vmul.f32 %v1970_v49, %v478_v57  ;;  %1871 = vmatmul.msk.f32.vlgmr.msra.gmra.mxu1 %vm293_vm1, %v492_v58  ;;  %496 = vst.msk [vmem:[#allocation16 + $0x10] sm:$0xff] %vm293_vm1, %v492_v58 }
 0x24d   :  { %1877 = vmatpush.xpose.msk.msrb.mxu1 %vm293_vm1, %v653_v61 }
 0x24e   :  { %v480_v1 = vadd.f32 %v1970_v49, %v479_v62 }
 0x250   :  { %v484_v4 = vsel %vm483_vm2, %v1970_v49, %v480_v1  ;;  %v651_v5 = vpop.permute.xlu2 %650 }
 0x251   :  { %v489_v60 = vsel %vm486_vm3, %v488_v3, %v484_v4 }
 0x252   :  { %v493_v6 = vmul.f32 %v2451_v63, %v489_v60 }
 0x253   :  { %v625_v8 = vpop.permute.xlu0 %624 }
 0x254   :  { %1872 = vmatmul.msk.f32.vlgmr.msra.gmra.mxu2 %vm293_vm1, %v493_v6  ;;  %497 = vst.msk [vmem:[#allocation16 + $0x18] sm:$0xff] %vm293_vm1, %v493_v6  ;;  %1875 = vmatpush.xpose.msk.msra.mxu0 %vm293_vm1, %v625_v8 }
 0x255   :  { %1878 = vmatmul.msk.f32.vlgmr.msrb.gmra.mxu1 %vm293_vm1, %v651_v5  ;;  %922 = vmatpush.msra.mxu2 %v1942_v7 }
 0x258   :  { %v623_v9 = vpop.permute.xlu2 %622 }
 0x259   :  { %1876 = vmatmul.msk.f32.vlgmr.msra.gmra.mxu0 %vm293_vm1, %v623_v9 }
 0x25b   :  { %v950_v10 = vpop.permute.xlu0 %949 }
 0x25c   :  { %1880 = vmatmul.msk.f32.vlgmr.msrb.gmra.mxu2 %vm293_vm1, %v679_v54  ;;  %1885 = vmatpush.xpose.msk.msra.mxu3 %vm293_vm1, %v950_v10 }
 0x2bf   :  { %v518_v63 = vpop.f32.mrf.mxu3 }
 0x2c0   :  { %590 = vst.msk [vmem:[#allocation2] sm:$0xff] %vm293_vm1, %v518_v63 }
 0x2c1   :  { %v541_v11 = vpop.f32.mrf.mxu0 }
 0x2c2   :  { %591 = vst.msk [vmem:[#allocation2 + $0x8] sm:$0xff] %vm293_vm1, %v541_v11 }
 0x2c7   :  { %v619_v12 = vpop.f32.mrf.mxu3 }
 0x2c8   :  { %v706_v13 = vsel %vm293_vm1, %v619_v12, -inf }
 0x2c9   :  { %707 = vmax.xlane.f32.xlu0 %v706_v13  ;;  %v564_v14 = vpop.f32.mrf.mxu1 }
 0x2ca   :  { %592 = vst.msk [vmem:[#allocation2 + $0x10] sm:$0xff] %vm293_vm1, %v564_v14 }
 0x2d2   :  { %v675_v18 = vpop.f32.mrf.mxu1 }
 0x2d3   :  { %v712_v20 = vsel %vm293_vm1, %v675_v18, -inf }
 0x2d6   :  { %v647_v15 = vpop.f32.mrf.mxu0 }
 0x2d7   :  { %v587_v16 = vpop.f32.mrf.mxu2  ;;  %v709_v17 = vsel %vm293_vm1, %v647_v15, -inf }
 0x2d8   :  { %593 = vst.msk [vmem:[#allocation2 + $0x18] sm:$0xff] %vm293_vm1, %v587_v16  ;;  %710 = vmax.xlane.f32.xlu1 %v709_v17 }
 0x2dd   :  { %947 = vrot.lane.b32.xlu0 %v2389_v25, %s2271_s26 }
 0x2df   :  { %v703_v19 = vpop.f32.mrf.mxu2 }
 0x2e0   :  { %713 = vmax.xlane.f32.xlu1 %v712_v20  ;;  %v715_v21 = vsel %vm293_vm1, %v703_v19, -inf }
 0x2e1   :  { %716 = vmax.xlane.f32.xlu2 %v715_v21 }
 0x2f9   :  { %1033 = vrot.lane.b32.xlu2 %v2420_v34, %s2271_s26  ;;  %1031 = vrot.lane.b32.xlu1 %v2387_v24, %s2271_s26 }
 0x33c   :  { %v708_v22 = vpop.xlane.xlu0 %707 }
 0x33d   :  { %v718_v23 = vsub.f32 %v619_v12, %v708_v22 }
 0x33f   :  { %v722_v36 = vmul.f32 1.442695, %v718_v23 }
 0x341   :  { %1971 = vpow2.f32 %v722_v36 }
 0x347   :  { %v1972_v37 = vpop.eup %1971 }
 0x348   :  { %v730_v38 = vsel %vm293_vm1, %v1972_v37, 0.0 }
 0x349   :  { %731 = vadd.xlane.f32.xlu1 %v730_v38 }
 0x34b   :  { %v711_v39 = vpop.xlane.xlu1 %710 }
 0x34c   :  { %v719_v40 = vsub.f32 %v647_v15, %v711_v39 }
 0x34e   :  { %v724_v41 = vmul.f32 1.442695, %v719_v40 }
 0x34f   :  { %v948_v3 = vpop.permute.xlu0 %947 }
 0x350   :  { %1973 = vpow2.f32 %v724_v41 }
 0x353   :  { %v714_v42 = vpop.xlane.xlu1 %713 }
 0x354   :  { %v720_v43 = vsub.f32 %v675_v18, %v714_v42  ;;  %v717_v44 = vpop.xlane.xlu2 %716 }
 0x355   :  { %v721_v45 = vsub.f32 %v703_v19, %v717_v44 }
 0x356   :  { %v2507_v46 = vpop.eup %1973  ;;  %v726_v47 = vmul.f32 1.442695, %v720_v43 }
 0x357   :  { %v728_v48 = vmul.f32 1.442695, %v721_v45  ;;  %v733_v49 = vsel %vm293_vm1, %v2507_v46, 0.0 }
 0x358   :  { %1975 = vpow2.f32 %v726_v47  ;;  %734 = vadd.xlane.f32.xlu2 %v733_v49 }
 0x359   :  { %1977 = vpow2.f32 %v728_v48 }
 0x35c   :  { %v1034_v50 = vpop.permute.xlu2 %1033 }
 0x35d   :  { %1891 = vmatpush.xpose.msk.msrb.mxu2 %vm293_vm1, %v1034_v50 }
 0x35e   :  { %v2512_v51 = vpop.eup %1975 }
 0x35f   :  { %v2514_v52 = vpop.eup %1977  ;;  %v736_v53 = vsel %vm293_vm1, %v2512_v51, 0.0 }
 0x360   :  { %737 = vadd.xlane.f32.xlu2 %v736_v53  ;;  %v739_v54 = vsel %vm293_vm1, %v2514_v52, 0.0 }
 0x361   :  { %740 = vadd.xlane.f32.xlu0 %v739_v54 }
 0x362   :  { %1005 = vrot.lane.b32.xlu1 %v2409_v31, %s2271_s26 }
 0x36a   :  { %977 = vrot.lane.b32.xlu1 %v2401_v29, %s2271_s26 }
 0x372   :  { %1944 = vrot.lane.b32.xlu1 %v2458_v2, %s2271_s26  ;;  %v2538_v2 = vpop.permute.xlu1 %1031 }
 0x375   :  { %876 = vrot.lane.b32.xlu0 %v2418_v33, %s2270_s6 }
 0x378   :  { %1003 = vrot.lane.b32.xlu2 %v2414_v32, %s2271_s26 }
 0x37a   :  { %1382 = vrot.lane.b32.xlu1 %v2420_v34, %s2272_s1 }
 0x37d   :  { %850 = vrot.lane.b32.xlu0 %v2407_v30, %s2270_s6 }
 0x380   :  { %975 = vrot.lane.b32.xlu2 %v2397_v27, %s2271_s26 }
 0x385   :  { %1226 = vrot.lane.b32.xlu0 %v2418_v33, %s2271_s26 }
 0x3bc   :  { %v732_v55 = vpop.xlane.xlu1 %731 }
 0x3bd   :  { %1979 = vrcp.f32 %v732_v55  ;;  %v753_v59 = vand.u32 2147483648, %v732_v55  ;;  %v751_v34 = vand.u32 2147483647, %v732_v55  ;;  %vm747_vm5 = vweird.f32 %v732_v55 }
 0x3bf   :  { %v754_v0 = vor.u32 1.1754944e-38, %v753_v59  ;;  %vm752_vm7 = vcmp.eq.f32.partialorder %v751_v34, 8.507059e+37 }
 0x3c3   :  { %v1980_v56 = vpop.eup %1979 }
 0x3c4   :  { %v743_v57 = vmul.f32 %v1980_v56, %v732_v55  ;;  %vm748_vm4 = vweird.f32 %v1980_v56 }
 0x3c5   :  { %vm749_vm6 = vmor %vm747_vm5, %vm748_vm4 }
 0x3c6   :  { %v744_v58 = vsub.f32 1.0, %v743_v57 }
 0x3c8   :  { %v745_v61 = vmul.f32 %v1980_v56, %v744_v58 }
 0x3ca   :  { %v746_v62 = vadd.f32 %v1980_v56, %v745_v61 }
 0x3cb   :  { %v2540_v1 = vpop.xlane.xlu2 %734 }
 0x3cc   :  { %v750_v4 = vsel %vm749_vm6, %v1980_v56, %v746_v62  ;;  %1981 = vrcp.f32 %v2540_v1  ;;  %v767_v50 = vand.u32 2147483648, %v2540_v1  ;;  %vm761_vm3 = vweird.f32 %v2540_v1 }
 0x3cd   :  { %v755_v5 = vsel %vm752_vm7, %v754_v0, %v750_v4  ;;  %v765_v54 = vand.u32 2147483647, %v2540_v1 }
 0x3ce   :  { %v2542_v60 = vmul.f32 %v1972_v37, %v755_v5 }
 0x3cf   :  { %vm766_vm5 = vcmp.eq.f32.partialorder %v765_v54, 8.507059e+37 }
 0x3d0   :  { %1881 = vmatmul.msk.f32.vlgmr.msrb.gmra.mxu3 %vm293_vm1, %v2542_v60 }
 0x3d2   :  { %v1982_v9 = vpop.eup %1981 }
 0x3d3   :  { %v738_v6 = vpop.xlane.xlu2 %737  ;;  %v757_v10 = vmul.f32 %v1982_v9, %v2540_v1  ;;  %vm762_vm15 = vweird.f32 %v1982_v9 }
 0x3d4   :  { %1983 = vrcp.f32 %v738_v6  ;;  %v1006_v7 = vpop.permute.xlu1 %1005  ;;  %v741_v8 = vpop.xlane.xlu0 %740  ;;  %v781_v17 = vand.u32 2147483648, %v738_v6  ;;  %v779_v20 = vand.u32 2147483647, %v738_v6  ;;  %vm775_vm10 = vweird.f32 %v738_v6  ;;  %vm763_vm4 = vmor %vm761_vm3, %vm762_vm15 }
 0x3d5   :  { %1985 = vrcp.f32 %v741_v8  ;;  %v758_v15 = vsub.f32 1.0, %v757_v10  ;;  %v795_v21 = vand.u32 2147483648, %v741_v8  ;;  %v793_v23 = vand.u32 2147483647, %v741_v8 }
 0x3d6   :  { %v782_v38 = vor.u32 1.1754944e-38, %v781_v17  ;;  %vm789_vm12 = vweird.f32 %v741_v8  ;;  %vm780_vm13 = vcmp.eq.f32.partialorder %v779_v20, 8.507059e+37 }
 0x3d7   :  { %v759_v36 = vmul.f32 %v1982_v9, %v758_v15  ;;  %v796_v41 = vor.u32 1.1754944e-38, %v795_v21  ;;  %vm794_vm2 = vcmp.eq.f32.partialorder %v793_v23, 8.507059e+37 }
 0x3d8   :  { %1886 = vmatmul.msk.f32.vlgmr.msra.gmra.mxu3 %vm293_vm1, %v948_v3 }
 0x3d9   :  { %v760_v45 = vadd.f32 %v1982_v9, %v759_v36 }
 0x3da   :  { %v1984_v63 = vpop.eup %1983 }
 0x3db   :  { %v1986_v11 = vpop.eup %1985  ;;  %v771_v12 = vmul.f32 %v1984_v63, %v738_v6  ;;  %vm776_vm8 = vweird.f32 %v1984_v63  ;;  %v764_v57 = vsel %vm763_vm4, %v1982_v9, %v760_v45  ;;  %v1004_v59 = vpop.permute.xlu2 %1003 }
 0x3dc   :  { %v785_v13 = vmul.f32 %v1986_v11, %v741_v8  ;;  %v978_v14 = vpop.permute.xlu1 %977  ;;  %vm790_vm9 = vweird.f32 %v1986_v11  ;;  %vm777_vm11 = vmor %vm775_vm10, %vm776_vm8 }
 0x3dd   :  { %v772_v16 = vsub.f32 1.0, %v771_v12  ;;  %vm791_vm14 = vmor %vm789_vm12, %vm790_vm9 }
 0x3de   :  { %v786_v18 = vsub.f32 1.0, %v785_v13 }
 0x3df   :  { %v773_v19 = vmul.f32 %v1984_v63, %v772_v16 }
 0x3e0   :  { %v787_v22 = vmul.f32 %v1986_v11, %v786_v18 }
 0x3e1   :  { %v774_v37 = vadd.f32 %v1984_v63, %v773_v19 }
 0x3e2   :  { %v788_v39 = vadd.f32 %v1986_v11, %v787_v22 }
 0x3e3   :  { %v778_v40 = vsel %vm777_vm11, %v1984_v63, %v774_v37  ;;  %v976_v0 = vpop.permute.xlu2 %975 }
 0x3e4   :  { %v783_v42 = vsel %vm780_vm13, %v782_v38, %v778_v40  ;;  %v792_v43 = vsel %vm791_vm14, %v1986_v11, %v788_v39  ;;  %v1945_v44 = vpop.permute.xlu1 %1944 }
 0x3e5   :  { %v797_v47 = vsel %vm794_vm2, %v796_v41, %v792_v43  ;;  %v1947_v48 = vunpack.i.h.bf16 %v1945_v44  ;;  %v1946_v49 = vunpack.i.l.bf16 %v1945_v44  ;;  %v2556_v56 = vmul.f32 %v2512_v51, %v783_v42 }
 0x3e6   :  { %v2551_v53 = vmul.f32 %v2514_v52, %v797_v47  ;;  %v768_v52 = vor.u32 1.1754944e-38, %v767_v50 }
 0x3e7   :  { %1196 = vmatpush.msrb.mxu3 %v1946_v49  ;;  %v877_v55 = vpop.permute.xlu0 %876 }
 0x3e8   :  { %896 = vmatpush.msra.mxu1 %v877_v55  ;;  %1884 = vmatmul.msk.f32.vlgmr.msra.gmra.mxu2 %vm293_vm1, %v2551_v53  ;;  %v769_v58 = vsel %vm766_vm5, %v768_v52, %v764_v57 }
 0x3e9   :  { %1271 = vmatpush.msra.mxu2 %v1947_v48  ;;  %1883 = vmatmul.msk.f32.vlgmr.msra.gmra.mxu1 %vm293_vm1, %v2556_v56  ;;  %v2565_v51 = vmul.f32 %v2507_v46, %v769_v58 }
 0x3ea   :  { %1889 = vmatpush.xpose.msk.msrb.mxu1 %vm293_vm1, %v1006_v7 }
 0x3ec   :  { %v1383_v34 = vpop.permute.xlu1 %1382 }
 0x3ef   :  { %v851_v61 = vpop.permute.xlu0 %850 }
 0x3f0   :  { %870 = vmatpush.msrb.mxu0 %v851_v61  ;;  %1892 = vmatmul.msk.f32.vlgmr.msrb.gmra.mxu2 %vm293_vm1, %v2538_v2 }
 0x3f1   :  { %1903 = vmatpush.xpose.msk.msrb.mxu2 %vm293_vm1, %v1383_v34  ;;  %1882 = vmatmul.msk.f32.vlgmr.msrb.gmra.mxu0 %vm293_vm1, %v2565_v51 }
 0x3f2   :  { %1887 = vmatpush.xpose.msk.msra.mxu0 %vm293_vm1, %v978_v14  ;;  %1890 = vmatmul.msk.f32.vlgmr.msrb.gmra.mxu1 %vm293_vm1, %v1004_v59 }
 0x3f7   :  { %v1227_v62 = vpop.permute.xlu0 %1226 }
 0x3f8   :  { %1246 = vmatpush.msra.mxu1 %v1227_v62 }
 0x3f9   :  { %1888 = vmatmul.msk.f32.vlgmr.msra.gmra.mxu0 %vm293_vm1, %v976_v0 }
 0x453   :  { %v2582_v5 = vpop.f32.mrf.mxu3 }
 0x45b   :  { %v972_v10 = vpop.f32.mrf.mxu3 }
 0x45c   :  { %v1059_v63 = vsel %vm293_vm1, %v972_v10, -inf }
 0x466   :  { %v2575_v46 = vpop.f32.mrf.mxu1 }
 0x46b   :  { %v2577_v1 = vpop.f32.mrf.mxu2 }
 0x46e   :  { %v2579_v3 = vpop.f32.mrf.mxu0 }
 0x46f   :  { %v1028_v2 = vpop.f32.mrf.mxu1 }
 0x470   :  { %v1065_v4 = vsel %vm293_vm1, %v1028_v2, -inf }
 0x471   :  { %1066 = vmax.xlane.f32.xlu2 %v1065_v4 }
 0x473   :  { %v1056_v6 = vpop.f32.mrf.mxu2 }
 0x474   :  { %v1068_v7 = vsel %vm293_vm1, %v1056_v6, -inf }
 0x475   :  { %1069 = vmax.xlane.f32.xlu1 %v1068_v7 }
 0x476   :  { %v1000_v8 = vpop.f32.mrf.mxu0 }
 0x477   :  { %v1062_v9 = vsel %vm293_vm1, %v1000_v8, -inf }
 0x478   :  { %1063 = vmax.xlane.f32.xlu0 %v1062_v9 }
 0x480   :  { %1060 = vmax.xlane.f32.xlu0 %v1059_v63 }
 0x489   :  { %1298 = vrot.lane.b32.xlu2 %v2391_v26, %s2272_s1 }
 0x48e   :  { %1380 = vrot.lane.b32.xlu1 %v2387_v24, %s2272_s1 }
 0x494   :  { %1296 = vrot.lane.b32.xlu0 %v2389_v25, %s2272_s1 }
 0x49c   :  { %1354 = vrot.lane.b32.xlu0 %v2409_v31, %s2272_s1 }
 0x4e4   :  { %v1067_v11 = vpop.xlane.xlu2 %1066 }
 0x4e5   :  { %v1073_v12 = vsub.f32 %v1028_v2, %v1067_v11 }
 0x4e7   :  { %v1079_v13 = vmul.f32 1.442695, %v1073_v12 }
 0x4e8   :  { %v1070_v14 = vpop.xlane.xlu1 %1069 }
 0x4e9   :  { %1987 = vpow2.f32 %v1079_v13  ;;  %v1074_v26 = vsub.f32 %v1056_v6, %v1070_v14 }
 0x4eb   :  { %v1064_v15 = vpop.xlane.xlu0 %1063  ;;  %v1081_v25 = vmul.f32 1.442695, %v1074_v26 }
 0x4ec   :  { %v1299_v16 = vpop.permute.xlu2 %1298  ;;  %v1072_v17 = vsub.f32 %v1000_v8, %v1064_v15 }
 0x4ed   :  { %1897 = vmatpush.xpose.msk.msra.mxu3 %vm293_vm1, %v1299_v16 }
 0x4ee   :  { %v1077_v18 = vmul.f32 1.442695, %v1072_v17 }
 0x4ef   :  { %v1988_v19 = vpop.eup %1987 }
 0x4f0   :  { %1989 = vpow2.f32 %v1077_v18  ;;  %v1089_v24 = vsel %vm293_vm1, %v1988_v19, 0.0 }
 0x4f1   :  { %1090 = vadd.xlane.f32.xlu0 %v1089_v24  ;;  %1991 = vpow2.f32 %v1081_v25 }
 0x4f3   :  { %v1061_v20 = vpop.xlane.xlu0 %1060 }
 0x4f4   :  { %v1071_v31 = vsub.f32 %v972_v10, %v1061_v20 }
 0x4f6   :  { %v2597_v21 = vpop.eup %1989  ;;  %v1075_v22 = vmul.f32 1.442695, %v1071_v31 }
 0x4f7   :  { %v1086_v23 = vsel %vm293_vm1, %v2597_v21, 0.0  ;;  %v2601_v36 = vpop.eup %1991 }
 0x4f8   :  { %1993 = vpow2.f32 %v1075_v22  ;;  %1087 = vadd.xlane.f32.xlu2 %v1086_v23  ;;  %v1092_v38 = vsel %vm293_vm1, %v2601_v36, 0.0 }
 0x4fe   :  { %v2603_v37 = vpop.eup %1993 }
 0x4ff   :  { %v1083_v39 = vsel %vm293_vm1, %v2603_v37, 0.0 }
 0x500   :  { %1093 = vadd.xlane.f32.xlu2 %v1092_v38  ;;  %1084 = vadd.xlane.f32.xlu1 %v1083_v39  ;;  %v2620_v44 = vpop.permute.xlu1 %1380 }
 0x505   :  { %1326 = vrot.lane.b32.xlu0 %v2401_v29, %s2272_s1 }
 0x506   :  { %v2611_v40 = vpop.permute.xlu0 %1296 }
 0x50e   :  { %v1355_v41 = vpop.permute.xlu0 %1354 }
 0x50f   :  { %1901 = vmatpush.xpose.msk.msrb.mxu1 %vm293_vm1, %v1355_v41 }
 0x518   :  { %1352 = vrot.lane.b32.xlu2 %v2414_v32, %s2272_s1 }
 0x519   :  { %1201 = vrot.lane.b32.xlu1 %v2407_v30, %s2271_s26 }
 0x520   :  { %1324 = vrot.lane.b32.xlu2 %v2397_v27, %s2272_s1 }
 0x564   :  { %v1091_v42 = vpop.xlane.xlu0 %1090 }
 0x565   :  { %1995 = vrcp.f32 %v1091_v42  ;;  %v1134_v48 = vand.u32 2147483648, %v1091_v42  ;;  %v1132_v32 = vand.u32 2147483647, %v1091_v42  ;;  %vm1128_vm7 = vweird.f32 %v1091_v42 }
 0x567   :  { %v1135_v27 = vor.u32 1.1754944e-38, %v1134_v48  ;;  %vm1133_vm9 = vcmp.eq.f32.partialorder %v1132_v32, 8.507059e+37 }
 0x56b   :  { %v1996_v43 = vpop.eup %1995  ;;  %v2622_v29 = vpop.xlane.xlu2 %1087 }
 0x56c   :  { %v1124_v45 = vmul.f32 %v1996_v43, %v1091_v42  ;;  %1997 = vrcp.f32 %v2622_v29  ;;  %vm1129_vm6 = vweird.f32 %v1996_v43  ;;  %vm1114_vm11 = vweird.f32 %v2622_v29 }
 0x56d   :  { %vm1130_vm8 = vmor %vm1128_vm7, %vm1129_vm6  ;;  %v1120_v17 = vand.u32 2147483648, %v2622_v29 }
 0x56e   :  { %v1125_v47 = vsub.f32 1.0, %v1124_v45 }
 0x56f   :  { %v1121_v39 = vor.u32 1.1754944e-38, %v1120_v17 }
 0x570   :  { %v1126_v49 = vmul.f32 %v1996_v43, %v1125_v47 }
 0x572   :  { %v1998_v50 = vpop.eup %1997  ;;  %v1127_v54 = vadd.f32 %v1996_v43, %v1126_v49 }
 0x573   :  { %v1094_v55 = vpop.xlane.xlu2 %1093  ;;  %v1085_v57 = vpop.xlane.xlu1 %1084  ;;  %v1110_v59 = vmul.f32 %v1998_v50, %v2622_v29  ;;  %vm1115_vm13 = vweird.f32 %v1998_v50 }
 0x574   :  { %v1131_v52 = vsel %vm1130_vm8, %v1996_v43, %v1127_v54  ;;  %1999 = vrcp.f32 %v1094_v55  ;;  %v1148_v8 = vand.u32 2147483648, %v1094_v55  ;;  %v1146_v63 = vand.u32 2147483647, %v1094_v55  ;;  %vm1116_vm5 = vmor %vm1114_vm11, %vm1115_vm13 }
 0x575   :  { %v1136_v58 = vsel %vm1133_vm9, %v1135_v27, %v1131_v52  ;;  %2001 = vrcp.f32 %v1085_v57  ;;  %v1111_v34 = vsub.f32 1.0, %v1110_v59  ;;  %v1106_v11 = vand.u32 2147483648, %v1085_v57 }
 0x576   :  { %v2626_v61 = vmul.f32 %v1988_v19, %v1136_v58  ;;  %v1104_v13 = vand.u32 2147483647, %v1085_v57  ;;  %vm1142_vm14 = vweird.f32 %v1094_v55  ;;  %v1149_v26 = vor.u32 1.1754944e-38, %v1148_v8 }
 0x577   :  { %v1112_v6 = vmul.f32 %v1998_v50, %v1111_v34  ;;  %vm1100_vm2 = vweird.f32 %v1085_v57  ;;  %v1118_v19 = vand.u32 2147483647, %v2622_v29  ;;  %vm1147_vm3 = vcmp.eq.f32.partialorder %v1146_v63, 8.507059e+37  ;;  %v1327_v45 = vpop.permute.xlu0 %1326 }
 0x578   :  { %1895 = vmatmul.msk.f32.vlgmr.msra.gmra.mxu1 %vm293_vm1, %v2626_v61  ;;  %v1107_v25 = vor.u32 1.1754944e-38, %v1106_v11  ;;  %vm1105_vm6 = vcmp.eq.f32.partialorder %v1104_v13, 8.507059e+37  ;;  %v1948_v11 = vpack.i.bf16 %v2418_v33, %v2399_v28 }
 0x579   :  { %v1113_v15 = vadd.f32 %v1998_v50, %v1112_v6  ;;  %vm1119_vm7 = vcmp.eq.f32.partialorder %v1118_v19, 8.507059e+37 }
 0x57a   :  { %v2000_v62 = vpop.eup %1999 }
 0x57b   :  { %v2002_v0 = vpop.eup %2001  ;;  %v1138_v2 = vmul.f32 %v2000_v62, %v1094_v55  ;;  %vm1143_vm10 = vweird.f32 %v2000_v62  ;;  %v1353_v14 = vpop.permute.xlu2 %1352  ;;  %v1117_v22 = vsel %vm1116_vm5, %v1998_v50, %v1113_v15 }
 0x57c   :  { %v1096_v4 = vmul.f32 %v2002_v0, %v1085_v57  ;;  %vm1101_vm12 = vweird.f32 %v2002_v0  ;;  %vm1144_vm15 = vmor %vm1142_vm14, %vm1143_vm10  ;;  %v1122_v42 = vsel %vm1119_vm7, %v1121_v39, %v1117_v22  ;;  %vm818_vm10 = vcmask 130112  }
 0x57d   :  { %v1139_v7 = vsub.f32 1.0, %v1138_v2  ;;  %vm1102_vm4 = vmor %vm1100_vm2, %vm1101_vm12  ;;  %v2648_v29 = vmul.f32 %v2597_v21, %v1122_v42 }
 0x57e   :  { %v1097_v9 = vsub.f32 1.0, %v1096_v4 }
 0x57f   :  { %v1140_v10 = vmul.f32 %v2000_v62, %v1139_v7 }
 0x580   :  { %v1098_v12 = vmul.f32 %v2002_v0, %v1097_v9  ;;  %1902 = vmatmul.msk.f32.vlgmr.msrb.gmra.mxu1 %vm293_vm1, %v1353_v14 }
 0x581   :  { %v1141_v16 = vadd.f32 %v2000_v62, %v1140_v10 }
 0x582   :  { %v1099_v18 = vadd.f32 %v2002_v0, %v1098_v12 }
 0x583   :  { %v1145_v24 = vsel %vm1144_vm15, %v2000_v62, %v1141_v16 }
 0x584   :  { %v1150_v20 = vsel %vm1147_vm3, %v1149_v26, %v1145_v24  ;;  %v1103_v31 = vsel %vm1102_vm4, %v2002_v0, %v1099_v18 }
 0x585   :  { %v1108_v23 = vsel %vm1105_vm6, %v1107_v25, %v1103_v31  ;;  %v2638_v38 = vmul.f32 %v2601_v36, %v1150_v20  ;;  %v1325_v36 = vpop.permute.xlu2 %1324 }
 0x586   :  { %v2641_v41 = vmul.f32 %v2603_v37, %v1108_v23 }
 0x587   :  { %1896 = vmatmul.msk.f32.vlgmr.msra.gmra.mxu2 %vm293_vm1, %v2638_v38 }
 0x588   :  { %1893 = vmatmul.msk.f32.vlgmr.msrb.gmra.mxu3 %vm293_vm1, %v2641_v41 }
 0x58b   :  { %v1202_v43 = vpop.permute.xlu1 %1201 }
 0x58c   :  { %1221 = vmatpush.msrb.mxu0 %v1202_v43 }
 0x58d   :  { %1894 = vmatmul.msk.f32.vlgmr.msrb.gmra.mxu0 %vm293_vm1, %v2648_v29 }
 0x58e   :  { %1899 = vmatpush.xpose.msk.msra.mxu0 %vm293_vm1, %v1327_v45 }
 0x58f   :  { %1904 = vmatmul.msk.f32.vlgmr.msrb.gmra.mxu2 %vm293_vm1, %v2620_v44 }
 0x590   :  { %1898 = vmatmul.msk.f32.vlgmr.msra.gmra.mxu3 %vm293_vm1, %v2611_v40 }
 0x595   :  { %1900 = vmatmul.msk.f32.vlgmr.msra.gmra.mxu0 %vm293_vm1, %v1325_v36 }
 0x5f5   :  { %v1248_v37 = vpop.f32.mrf.mxu1 }
 0x5fd   :  { %v1377_v47 = vpop.f32.mrf.mxu1 }
 0x5fe   :  { %v1414_v21 = vsel %vm293_vm1, %v1377_v47, -inf }
 0x5ff   :  { %1415 = vmax.xlane.f32.xlu0 %v1414_v21 }
 0x60a   :  { %v1273_v48 = vpop.f32.mrf.mxu2  ;;  %v1223_v32 = vpop.f32.mrf.mxu0 }
 0x60b   :  { %v1198_v49 = vpop.f32.mrf.mxu3 }
 0x612   :  { %v1405_v50 = vpop.f32.mrf.mxu2  ;;  %v1349_v40 = vpop.f32.mrf.mxu0 }
 0x613   :  { %v1321_v54 = vpop.f32.mrf.mxu3  ;;  %v1417_v27 = vsel %vm293_vm1, %v1405_v50, -inf  ;;  %v1411_v55 = vsel %vm293_vm1, %v1349_v40, -inf }
 0x614   :  { %1418 = vmax.xlane.f32.xlu2 %v1417_v27  ;;  %v1408_v44 = vsel %vm293_vm1, %v1321_v54, -inf }
 0x615   :  { %1409 = vmax.xlane.f32.xlu1 %v1408_v44 }
 0x61d   :  { %1412 = vmax.xlane.f32.xlu1 %v1411_v55 }
 0x672   :  { %v1416_v57 = vpop.xlane.xlu0 %1415 }
 0x673   :  { %v1422_v52 = vsub.f32 %v1377_v47, %v1416_v57 }
 0x675   :  { %v1428_v58 = vmul.f32 1.442695, %v1422_v52 }
 0x677   :  { %2003 = vpow2.f32 %v1428_v58 }
 0x67d   :  { %v2004_v59 = vpop.eup %2003 }
 0x67e   :  { %v1438_v34 = vsel %vm293_vm1, %v2004_v59, 0.0 }
 0x67f   :  { %1439 = vadd.xlane.f32.xlu2 %v1438_v34 }
 0x687   :  { %v1419_v62 = vpop.xlane.xlu2 %1418 }
 0x688   :  { %v1423_v0 = vsub.f32 %v1405_v50, %v1419_v62  ;;  %v1410_v2 = vpop.xlane.xlu1 %1409 }
 0x689   :  { %v1420_v9 = vsub.f32 %v1321_v54, %v1410_v2 }
 0x68a   :  { %v1430_v4 = vmul.f32 1.442695, %v1423_v0 }
 0x68b   :  { %v1424_v12 = vmul.f32 1.442695, %v1420_v9 }
 0x68c   :  { %2005 = vpow2.f32 %v1430_v4 }
 0x690   :  { %v1413_v6 = vpop.xlane.xlu1 %1412 }
 0x691   :  { %v1421_v7 = vsub.f32 %v1349_v40, %v1413_v6 }
 0x692   :  { %v2663_v8 = vpop.eup %2005 }
 0x693   :  { %v1426_v10 = vmul.f32 1.442695, %v1421_v7  ;;  %v1441_v63 = vsel %vm293_vm1, %v2663_v8, 0.0 }
 0x694   :  { %1442 = vadd.xlane.f32.xlu1 %v1441_v63 }
 0x695   :  { %2007 = vpow2.f32 %v1426_v10 }
 0x696   :  { %2009 = vpow2.f32 %v1424_v12 }
 0x697   :  { %1949 = vrot.lane.b32.xlu2 %v1948_v11, %s2272_s1 }
 0x69b   :  { %v2670_v13 = vpop.eup %2007 }
 0x69c   :  { %v1435_v14 = vsel %vm293_vm1, %v2670_v13, 0.0  ;;  %v2676_v15 = vpop.eup %2009 }
 0x69d   :  { %1436 = vadd.xlane.f32.xlu0 %v1435_v14  ;;  %v1432_v16 = vsel %vm293_vm1, %v2676_v15, 0.0 }
 0x69f   :  { %935 = vrot.lane.b32.xlu2 %v2575_v46, %s2263_s22 }
 0x6a5   :  { %1433 = vadd.xlane.f32.xlu0 %v1432_v16 }
 0x6a7   :  { %931 = vrot.lane.b32.xlu2 %v2582_v5, %s2263_s22 }
 0x6ad   :  { %1600 = vrot.lane.b32.xlu1 %v2430_v35, %s2272_s1 }
 0x6b5   :  { %937 = vrot.lane.b32.xlu1 %v2577_v1, %s2263_s22 }
 0x6b9   :  { %1550 = vrot.lane.b32.xlu0 %v2407_v30, %s2272_s1 }
 0x6c1   :  { %1284 = vrot.lane.b32.xlu0 %v1248_v37, %s2273_s3 }
 0x6c9   :  { %1280 = vrot.lane.b32.xlu0 %v1198_v49, %s2273_s3 }
 0x6d1   :  { %1286 = vrot.lane.b32.xlu0 %v1273_v48, %s2273_s3 }
 0x6d9   :  { %1282 = vrot.lane.b32.xlu0 %v1223_v32, %s2273_s3 }
 0x6e1   :  { %810 = vrot.lane.b32.xlu0 %v2556_v56, %s2263_s22 }
 0x6e9   :  { %812 = vrot.lane.b32.xlu0 %v2551_v53, %s2263_s22 }
 0x6f2   :  { %v1440_v28 = vpop.xlane.xlu2 %1439 }
 0x6f3   :  { %2011 = vrcp.f32 %v1440_v28  ;;  %v1483_v17 = vand.u32 2147483648, %v1440_v28  ;;  %v1481_v18 = vand.u32 2147483647, %v1440_v28  ;;  %vm1477_vm9 = vweird.f32 %v1440_v28 }
 0x6f5   :  { %v1484_v56 = vor.u32 1.1754944e-38, %v1483_v17  ;;  %vm1482_vm12 = vcmp.eq.f32.partialorder %v1481_v18, 8.507059e+37  ;;  %v1652_v18 = vld [vmem:[#allocation14 + $0x18] sm:$0xff] }
 0x6f9   :  { %v2012_v33 = vpop.eup %2011 }
 0x6fa   :  { %v1473_v35 = vmul.f32 %v2012_v33, %v1440_v28  ;;  %v1950_v30 = vpop.permute.xlu2 %1949  ;;  %vm1478_vm8 = vweird.f32 %v2012_v33 }
 0x6fb   :  { %v1952_v46 = vunpack.i.h.bf16 %v1950_v30  ;;  %v1951_v1 = vunpack.i.l.bf16 %v1950_v30  ;;  %vm1479_vm11 = vmor %vm1477_vm9, %vm1478_vm8 }
 0x6fc   :  { %v1474_v5 = vsub.f32 1.0, %v1473_v35 }
 0x6fd   :  { %1545 = vmatpush.msrb.mxu3 %v1951_v1  ;;  %1595 = vmatpush.msra.mxu1 %v1952_v46 }
 0x6fe   :  { %v1475_v26 = vmul.f32 %v2012_v33, %v1474_v5 }
 0x6ff   :  { %1917 = vmatpush.msra.mxu3 %v1652_v18 }
 0x700   :  { %v1476_v19 = vadd.f32 %v2012_v33, %v1475_v26 }
 0x702   :  { %v1480_v53 = vsel %vm1479_vm11, %v2012_v33, %v1476_v19  ;;  %v936_v24 = vpop.permute.xlu2 %935  ;;  %v1651_v19 = vld [vmem:[#allocation14 + $0x10] sm:$0xff] }
 0x703   :  { %v1485_v25 = vsel %vm1482_vm12, %v1484_v56, %v1480_v53  ;;  %945 = vst.msk [vmem:[#allocation2 + $0x10] sm:$0xff] %vm818_vm10, %v936_v24  ;;  %vm1171_vm12 = vcmask 195712   ;;  %v1650_v56 = vld [vmem:[#allocation14 + $0x8] sm:$0xff]  ;;  %1918 = vmatpush.msra.mxu3 %v1651_v19 }
 0x704   :  { %v2697_v20 = vmul.f32 %v2004_v59, %v1485_v25 }
 0x705   :  { %1919 = vmatpush.msra.mxu3 %v1650_v56 }
 0x706   :  { %1907 = vmatmul.msk.f32.vlgmr.msra.gmra.mxu1 %vm293_vm1, %v2697_v20 }
 0x707   :  { %v1443_v31 = vpop.xlane.xlu1 %1442 }
 0x708   :  { %2013 = vrcp.f32 %v1443_v31  ;;  %v1497_v37 = vand.u32 2147483648, %v1443_v31  ;;  %vm1491_vm14 = vweird.f32 %v1443_v31  ;;  %v1495_v21 = vand.u32 2147483647, %v1443_v31 }
 0x70a   :  { %v932_v22 = vpop.permute.xlu2 %931  ;;  %v1498_v50 = vor.u32 1.1754944e-38, %v1497_v37  ;;  %vm1496_vm2 = vcmp.eq.f32.partialorder %v1495_v21, 8.507059e+37 }
 0x70b   :  { %943 = vst.msk [vmem:[#allocation2] sm:$0xff] %vm818_vm10, %v932_v22 }
 0x70e   :  { %v2014_v23 = vpop.eup %2013 }
 0x70f   :  { %v1487_v39 = vmul.f32 %v2014_v23, %v1443_v31  ;;  %vm1492_vm13 = vweird.f32 %v2014_v23 }
 0x710   :  { %v1437_v42 = vpop.xlane.xlu0 %1436  ;;  %vm1493_vm15 = vmor %vm1491_vm14, %vm1492_vm13 }
 0x711   :  { %v1488_v43 = vsub.f32 1.0, %v1487_v39  ;;  %2015 = vrcp.f32 %v1437_v42  ;;  %v1469_v59 = vand.u32 2147483648, %v1437_v42  ;;  %vm1463_vm4 = vweird.f32 %v1437_v42 }
 0x712   :  { %v1467_v62 = vand.u32 2147483647, %v1437_v42 }
 0x713   :  { %v1489_v45 = vmul.f32 %v2014_v23, %v1488_v43  ;;  %v1470_v7 = vor.u32 1.1754944e-38, %v1469_v59  ;;  %v2275_v59 = vmov 32.0  }
 0x714   :  { %vm1468_vm8 = vcmp.eq.f32.partialorder %v1467_v62, 8.507059e+37 }
 0x715   :  { %v1490_v36 = vadd.f32 %v2014_v23, %v1489_v45 }
 0x717   :  { %v2016_v47 = vpop.eup %2015  ;;  %v1494_v32 = vsel %vm1493_vm15, %v2014_v23, %v1490_v36  ;;  %v2029_v36 = vld [vmem:[#allocation3 + $0x10] sm:$0xff] }
 0x718   :  { %v1459_v48 = vmul.f32 %v2016_v47, %v1437_v42  ;;  %v1434_v49 = vpop.xlane.xlu0 %1433  ;;  %v1499_v27 = vsel %vm1496_vm2, %v1498_v50, %v1494_v32  ;;  %vm1464_vm3 = vweird.f32 %v2016_v47 }
 0x719   :  { %2017 = vrcp.f32 %v1434_v49  ;;  %v2703_v57 = vmul.f32 %v2663_v8, %v1499_v27  ;;  %v1455_v0 = vand.u32 2147483648, %v1434_v49  ;;  %vm1465_vm5 = vmor %vm1463_vm4, %vm1464_vm3  ;;  %v1453_v4 = vand.u32 2147483647, %v1434_v49 }
 0x71a   :  { %v1460_v54 = vsub.f32 1.0, %v1459_v48  ;;  %vm1449_vm7 = vweird.f32 %v1434_v49  ;;  %v2030_v48 = vld [vmem:[#allocation3] sm:$0xff]  ;;  %2019 = vrcp.f32 %v2275_v59 }
 0x71b   :  { %v1456_v9 = vor.u32 1.1754944e-38, %v1455_v0  ;;  %vm1454_vm11 = vcmp.eq.f32.partialorder %v1453_v4, 8.507059e+37 }
 0x71c   :  { %v1461_v44 = vmul.f32 %v2016_v47, %v1460_v54  ;;  %v2031_v54 = vld [vmem:[#allocation3 + $0x18] sm:$0xff] }
 0x71e   :  { %v1462_v58 = vadd.f32 %v2016_v47, %v1461_v44 }
 0x71f   :  { %v2018_v40 = vpop.eup %2017  ;;  %v1601_v55 = vpop.permute.xlu1 %1600 }
 0x720   :  { %v1445_v52 = vmul.f32 %v2018_v40, %v1434_v49  ;;  %1620 = vmatpush.msra.mxu2 %v1601_v55  ;;  %vm1450_vm6 = vweird.f32 %v2018_v40  ;;  %v1466_v6 = vsel %vm1465_vm5, %v2016_v47, %v1462_v58 }
 0x721   :  { %1908 = vmatmul.msk.f32.vlgmr.msra.gmra.mxu2 %vm293_vm1, %v2703_v57  ;;  %vm1451_vm9 = vmor %vm1449_vm7, %vm1450_vm6  ;;  %v1471_v63 = vsel %vm1468_vm8, %v1470_v7, %v1466_v6 }
 0x722   :  { %v1446_v34 = vsub.f32 1.0, %v1445_v52  ;;  %v2712_v28 = vmul.f32 %v2670_v13, %v1471_v63 }
 0x724   :  { %v1447_v2 = vmul.f32 %v2018_v40, %v1446_v34  ;;  %v2020_v34 = vpop.eup %2019 }
 0x725   :  { %v1707_v62 = vmul.f32 32.0, %v2020_v34 }
 0x726   :  { %v1448_v8 = vadd.f32 %v2018_v40, %v1447_v2 }
 0x727   :  { %v938_v10 = vpop.permute.xlu1 %937  ;;  %v1708_v0 = vsub.f32 1.0, %v1707_v62 }
 0x728   :  { %v1452_v11 = vsel %vm1451_vm9, %v2018_v40, %v1448_v8  ;;  %946 = vst.msk [vmem:[#allocation2 + $0x18] sm:$0xff] %vm818_vm10, %v938_v10  ;;  %v2032_v40 = vld [vmem:[#allocation3 + $0x8] sm:$0xff] }
 0x729   :  { %v1457_v12 = vsel %vm1454_vm11, %v1456_v9, %v1452_v11  ;;  %v1709_v2 = vmul.f32 %v2020_v34, %v1708_v0 }
 0x72a   :  { %v2709_v14 = vmul.f32 %v2676_v15, %v1457_v12 }
 0x72b   :  { %v1551_v16 = vpop.permute.xlu0 %1550  ;;  %v1710_v4 = vadd.f32 %v2020_v34, %v1709_v2 }
 0x72c   :  { %1905 = vmatmul.msk.f32.vlgmr.msrb.gmra.mxu3 %vm293_vm1, %v2709_v14  ;;  %1570 = vmatpush.msrb.mxu0 %v1551_v16 }
 0x72d   :  { %1906 = vmatmul.msk.f32.vlgmr.msrb.gmra.mxu0 %vm293_vm1, %v2712_v28  ;;  %vm1520_vm1 = vcmask 261312  }
 0x72e   :  { %1677 = vmatpush.msra.mxu0 %v1652_v18 }
 0x730   :  { %1678 = vmatpush.msra.mxu0 %v1651_v19 }
 0x732   :  { %1679 = vmatpush.msra.mxu0 %v1650_v56 }
 0x733   :  { %v1285_v33 = vpop.permute.xlu0 %1284 }
 0x734   :  { %1294 = vst.msk [vmem:[#allocation2 + $0x10] sm:$0xff] %vm1171_vm12, %v1285_v33 }
 0x73b   :  { %v1281_v35 = vpop.permute.xlu0 %1280 }
 0x73c   :  { %1292 = vst.msk [vmem:[#allocation2] sm:$0xff] %vm1171_vm12, %v1281_v35 }
 0x743   :  { %v1287_v15 = vpop.permute.xlu0 %1286 }
 0x744   :  { %1295 = vst.msk [vmem:[#allocation2 + $0x18] sm:$0xff] %vm1171_vm12, %v1287_v15 }
 0x74b   :  { %v1283_v30 = vpop.permute.xlu0 %1282 }
 0x753   :  { %v811_v13 = vpop.permute.xlu0 %810 }
 0x754   :  { %821 = vst.msk [vmem:[#allocation16 + $0x10] sm:$0xff] %vm818_vm10, %v811_v13 }
 0x75b   :  { %v813_v46 = vpop.permute.xlu0 %812 }
 0x75c   :  { %822 = vst.msk [vmem:[#allocation16 + $0x18] sm:$0xff] %vm818_vm10, %v813_v46 }
 0x783   :  { %v1597_v1 = vpop.f32.mrf.mxu1 }
 0x784   :  { %1633 = vrot.lane.b32.xlu1 %v1597_v1, %s2274_s27 }
 0x7a4   :  { %v1622_v5 = vpop.f32.mrf.mxu2 }
 0x7a5   :  { %1635 = vrot.lane.b32.xlu1 %v1622_v5, %s2274_s27 }
 0x7aa   :  { %v1572_v17 = vpop.f32.mrf.mxu0 }
 0x7ad   :  { %1631 = vrot.lane.b32.xlu1 %v1572_v17, %s2274_s27 }
 0x7af   :  { %v1547_v26 = vpop.f32.mrf.mxu3 }
 0x7b0   :  { %1629 = vrot.lane.b32.xlu2 %v1547_v26, %s2274_s27 }
 0x7b5   :  { %806 = vrot.lane.b32.xlu1 %v2542_v60, %s2263_s22  ;;  %v1649_v60 = vld [vmem:[#allocation14] sm:$0xff] }
 0x7b6   :  { %1920 = vmatpush.msra.mxu3 %v1649_v60  ;;  %1680 = vmatpush.msra.mxu0 %v1649_v60 }
 0x7b8   :  { %933 = vrot.lane.b32.xlu2 %v2579_v3, %s2263_s22 }
 0x7bd   :  { %1161 = vrot.lane.b32.xlu1 %v2648_v29, %s2273_s3 }
 0x7c0   :  { %808 = vrot.lane.b32.xlu2 %v2565_v51, %s2263_s22 }
 0x7c8   :  { %1159 = vrot.lane.b32.xlu2 %v2641_v41, %s2273_s3 }
 0x7f6   :  { %v1634_v3 = vpop.permute.xlu1 %1633 }
 0x7f7   :  { %1643 = vst.msk [vmem:[#allocation2 + $0x10] sm:$0xff] %vm1520_vm1, %v1634_v3 }
 0x7fe   :  { %v1647_v51 = vld [vmem:[#allocation2 + $0x10] sm:$0xff] }
 0x7ff   :  { %1911 = vmatmul.msk.f32.vlgmr.msra.gmra.mxu3 %vm161_vm0, %v1647_v51 }
 0x80a   :  { %v1630_v41 = vpop.permute.xlu2 %1629 }
 0x80b   :  { %1641 = vst.msk [vmem:[#allocation2] sm:$0xff] %vm1520_vm1, %v1630_v41 }
 0x812   :  { %v934_v29 = vpop.permute.xlu2 %933  ;;  %v1645_v53 = vld [vmem:[#allocation2] sm:$0xff] }
 0x813   :  { %944 = vst.msk [vmem:[#allocation2 + $0x8] sm:$0xff] %vm818_vm10, %v934_v29  ;;  %1909 = vmatmul.msk.f32.vlgmr.msra.gmra.mxu0 %vm161_vm0, %v1645_v53 }
 0x814   :  { %1293 = vst.msk [vmem:[#allocation2 + $0x8] sm:$0xff] %vm1171_vm12, %v1283_v30 }
 0x817   :  { %v1636_v24 = vpop.permute.xlu1 %1635 }
 0x818   :  { %1644 = vst.msk [vmem:[#allocation2 + $0x18] sm:$0xff] %vm1520_vm1, %v1636_v24 }
 0x81a   :  { %v809_v25 = vpop.permute.xlu2 %808 }
 0x81b   :  { %820 = vst.msk [vmem:[#allocation16 + $0x8] sm:$0xff] %vm818_vm10, %v809_v25 }
 0x81f   :  { %v1632_v31 = vpop.permute.xlu1 %1631  ;;  %v1648_v22 = vld [vmem:[#allocation2 + $0x18] sm:$0xff] }
 0x820   :  { %1642 = vst.msk [vmem:[#allocation2 + $0x8] sm:$0xff] %vm1520_vm1, %v1632_v31  ;;  %1912 = vmatmul.msk.f32.gmra.mxu3 %vm161_vm0, %v1648_v22  ;;  %v2798_v22 = vld [vmem:[%s2843_s7] ss:$0 sm:$0xff]  ;;  %s2276_s7 = smov [#allocation16]  }
 0x822   :  { %v1160_v42 = vpop.permute.xlu2 %1159 }
 0x827   :  { %v807_v23 = vpop.permute.xlu1 %806  ;;  %v1646_v39 = vld [vmem:[#allocation2 + $0x8] sm:$0xff] }
 0x828   :  { %819 = vst.msk [vmem:[#allocation16] sm:$0xff] %vm818_vm10, %v807_v23  ;;  %1910 = vmatmul.msk.f32.gmra.mxu0 %vm161_vm0, %v1646_v39  ;;  %vm1711_vm10 = vweird.f32 %v2020_v34  ;;  %v2803_v39 = vld [vmem:[%s2844_s8] ss:$0 sm:$0xff]  ;;  %s1826_s8 = sshll.u32 %s2276_s7, 4  ;;  %s1827_s8 = int_to_ptr.vmem [resolvable:$true] %s1826_s8 }
 0x829   :  { %1172 = vst.msk [vmem:[#allocation16] sm:$0xff] %vm1171_vm12, %v1160_v42  ;;  %v2761_v6 = vsel %vm1711_vm10, %v2020_v34, %v1710_v4 }
 0x82f   :  { %v1162_v43 = vpop.permute.xlu1 %1161 }
 0x830   :  { %1173 = vst.msk [vmem:[#allocation16 + $0x8] sm:$0xff] %vm1171_vm12, %v1162_v43 }
 0x882   :  { %v1688_v45 = vpop.f32.mrf.mxu3 }
 0x883   :  { %v1689_v37 = vadd.f32 %v2029_v36, %v1688_v45 }
 0x885   :  { %v1700_v47 = vsel %vm161_vm0, %v1689_v37, 0.0 }
 0x886   :  { %1701 = vadd.xlane.f32.xlu1 %v1700_v47 }
 0x890   :  { %v1682_v21 = vpop.f32.mrf.mxu0 }
 0x891   :  { %v1683_v49 = vadd.f32 %v2030_v48, %v1682_v21 }
 0x893   :  { %v1694_v32 = vsel %vm161_vm0, %v1683_v49, 0.0 }
 0x894   :  { %1695 = vadd.xlane.f32.xlu2 %v1694_v32 }
 0x89f   :  { %1508 = vrot.lane.b32.xlu1 %v2709_v14, %s2274_s27 }
 0x8a3   :  { %v1691_v50 = vpop.f32.mrf.mxu3 }
 0x8a4   :  { %v1692_v27 = vadd.f32 %v2031_v54, %v1691_v50 }
 0x8a5   :  { %v1685_v44 = vpop.f32.mrf.mxu0 }
 0x8a6   :  { %v1686_v55 = vadd.f32 %v2032_v40, %v1685_v44  ;;  %v1703_v52 = vsel %vm161_vm0, %v1692_v27, 0.0 }
 0x8a7   :  { %1704 = vadd.xlane.f32.xlu2 %v1703_v52 }
 0x8a8   :  { %v1697_v58 = vsel %vm161_vm0, %v1686_v55, 0.0 }
 0x8a9   :  { %1698 = vadd.xlane.f32.xlu0 %v1697_v58 }
 0x8bd   :  { %1163 = vrot.lane.b32.xlu0 %v2626_v61, %s2273_s3 }
 0x8bf   :  { %1165 = vrot.lane.b32.xlu2 %v2638_v38, %s2273_s3 }
 0x8f9   :  { %v1702_v7 = vpop.xlane.xlu1 %1701 }
 0x8fa   :  { %v1715_v8 = vmul.f32 %v2761_v6, %v1702_v7 }
 0x8fc   :  { %v1719_v9 = vsub.f32 %v1689_v37, %v1715_v8 }
 0x8fe   :  { %v1723_v10 = vmul.f32 %v1719_v9, %v1719_v9 }
 0x900   :  { %v1731_v61 = vsel %vm161_vm0, %v1723_v10, 0.0 }
 0x901   :  { %1732 = vadd.xlane.f32.xlu2 %v1731_v61 }
 0x907   :  { %v1696_v63 = vpop.xlane.xlu2 %1695 }
 0x908   :  { %v1713_v38 = vmul.f32 %v2761_v6, %v1696_v63 }
 0x90a   :  { %v2766_v11 = vsub.f32 %v1683_v49, %v1713_v38 }
 0x90c   :  { %v1721_v12 = vmul.f32 %v2766_v11, %v2766_v11 }
 0x90e   :  { %v1725_v14 = vsel %vm161_vm0, %v1721_v12, 0.0 }
 0x90f   :  { %1726 = vadd.xlane.f32.xlu0 %v1725_v14 }
 0x911   :  { %v1509_v16 = vpop.permute.xlu1 %1508 }
 0x912   :  { %1521 = vst.msk [vmem:[#allocation16] sm:$0xff] %vm1520_vm1, %v1509_v16 }
 0x919   :  { %1512 = vrot.lane.b32.xlu2 %v2697_v20, %s2274_s27 }
 0x91a   :  { %v1705_v33 = vpop.xlane.xlu2 %1704 }
 0x91b   :  { %v1716_v35 = vmul.f32 %v2761_v6, %v1705_v33 }
 0x91c   :  { %v1699_v15 = vpop.xlane.xlu0 %1698 }
 0x91d   :  { %v2775_v30 = vsub.f32 %v1692_v27, %v1716_v35  ;;  %v1714_v13 = vmul.f32 %v2761_v6, %v1699_v15 }
 0x91f   :  { %v2778_v46 = vsub.f32 %v1686_v55, %v1714_v13  ;;  %v1724_v1 = vmul.f32 %v2775_v30, %v2775_v30 }
 0x921   :  { %v1734_v5 = vsel %vm161_vm0, %v1724_v1, 0.0  ;;  %v1722_v17 = vmul.f32 %v2778_v46, %v2778_v46 }
 0x922   :  { %v1166_v26 = vpop.permute.xlu2 %1165  ;;  %1735 = vadd.xlane.f32.xlu0 %v1734_v5 }
 0x923   :  { %1175 = vst.msk [vmem:[#allocation16 + $0x18] sm:$0xff] %vm1171_vm12, %v1166_v26  ;;  %v1728_v20 = vsel %vm161_vm0, %v1722_v17, 0.0 }
 0x924   :  { %1729 = vadd.xlane.f32.xlu1 %v1728_v20 }
 0x92f   :  { %v1164_v18 = vpop.permute.xlu0 %1163 }
 0x930   :  { %1174 = vst.msk [vmem:[#allocation16 + $0x10] sm:$0xff] %vm1171_vm12, %v1164_v18 }
 0x936   :  { %1510 = vrot.lane.b32.xlu0 %v2712_v28, %s2274_s27 }
 0x93d   :  { %1514 = vrot.lane.b32.xlu1 %v2703_v57, %s2274_s27 }
 0x974   :  { %v1733_v19 = vpop.xlane.xlu2 %1732 }
 0x975   :  { %v1739_v56 = vmul.f32 %v1733_v19, %v2761_v6 }
 0x977   :  { %v1743_v60 = vadd.f32 1e-06, %v1739_v56 }
 0x979   :  { %2021 = vrsqrt.f32 %v1743_v60  ;;  %vm1771_vm14 = vweird.f32 %v1743_v60 }
 0x97c   :  { %v1513_v3 = vpop.permute.xlu2 %1512 }
 0x97d   :  { %1523 = vst.msk [vmem:[#allocation16 + $0x10] sm:$0xff] %vm1520_vm1, %v1513_v3 }
 0x97f   :  { %v2022_v51 = vpop.eup %2021 }
 0x980   :  { %v1766_v41 = vmul.f32 %v2022_v51, %v1743_v60  ;;  %vm1772_vm13 = vweird.f32 %v2022_v51 }
 0x981   :  { %vm1773_vm15 = vmor %vm1771_vm14, %vm1772_vm13 }
 0x982   :  { %v1727_v29 = vpop.xlane.xlu0 %1726  ;;  %v1767_v53 = vmul.f32 %v2022_v51, %v1766_v41 }
 0x983   :  { %v1737_v24 = vmul.f32 %v1727_v29, %v2761_v6 }
 0x984   :  { %v1768_v25 = vmul.f32 0.5, %v1767_v53 }
 0x985   :  { %v1741_v31 = vadd.f32 1e-06, %v1737_v24 }
 0x986   :  { %v1769_v28 = vsub.f32 1.5, %v1768_v25 }
 0x987   :  { %2023 = vrsqrt.f32 %v1741_v31  ;;  %vm1751_vm3 = vweird.f32 %v1741_v31 }
 0x988   :  { %v1770_v57 = vmul.f32 %v2022_v51, %v1769_v28 }
 0x98a   :  { %v1774_v23 = vsel %vm1773_vm15, %v2022_v51, %v1770_v57 }
 0x98b   :  { %v1787_v42 = vmul.f32 %v1774_v23, %v1719_v9 }
 0x98d   :  { %v2024_v43 = vpop.eup %2023  ;;  %v1795_v45 = vmul.f32 %v2798_v22, %v1787_v42 }
 0x98e   :  { %v1746_v36 = vmul.f32 %v2024_v43, %v1741_v31  ;;  %vm1752_vm2 = vweird.f32 %v2024_v43 }
 0x98f   :  { %v1803_v37 = vadd.f32 %v2803_v39, %v1795_v45  ;;  %vm1753_vm4 = vmor %vm1751_vm3, %vm1752_vm2 }
 0x990   :  { %v1747_v47 = vmul.f32 %v2024_v43, %v1746_v36 }
 0x991   :  { %1807 = vst.msk [vmem:[#allocation15 + $0x10] sm:$0xff] %vm161_vm0, %v1803_v37 }
 0x992   :  { %v1748_v21 = vmul.f32 0.5, %v1747_v47 }
 0x994   :  { %v1749_v48 = vsub.f32 1.5, %v1748_v21 }
 0x995   :  { %v1736_v49 = vpop.xlane.xlu0 %1735 }
 0x996   :  { %v1750_v32 = vmul.f32 %v2024_v43, %v1749_v48  ;;  %v1740_v50 = vmul.f32 %v1736_v49, %v2761_v6 }
 0x997   :  { %v1730_v54 = vpop.xlane.xlu1 %1729 }
 0x998   :  { %v1754_v27 = vsel %vm1753_vm4, %v2024_v43, %v1750_v32  ;;  %v1744_v44 = vadd.f32 1e-06, %v1740_v50  ;;  %v1738_v40 = vmul.f32 %v1730_v54, %v2761_v6 }
 0x999   :  { %v1785_v55 = vmul.f32 %v1754_v27, %v2766_v11 }
 0x99a   :  { %2025 = vrsqrt.f32 %v1744_v44  ;;  %v1742_v52 = vadd.f32 1e-06, %v1738_v40  ;;  %vm1781_vm6 = vweird.f32 %v1744_v44 }
 0x99b   :  { %v1793_v58 = vmul.f32 %v2798_v22, %v1785_v55 }
 0x99c   :  { %2027 = vrsqrt.f32 %v1742_v52  ;;  %vm1761_vm9 = vweird.f32 %v1742_v52 }
 0x99d   :  { %v1801_v59 = vadd.f32 %v2803_v39, %v1793_v58 }
 0x99f   :  { %1805 = vst.msk [vmem:[#allocation15] sm:$0xff] %vm161_vm0, %v1801_v59 }
 0x9a0   :  { %v2026_v34 = vpop.eup %2025 }
 0x9a1   :  { %v1776_v62 = vmul.f32 %v2026_v34, %v1744_v44  ;;  %vm1782_vm5 = vweird.f32 %v2026_v34 }
 0x9a2   :  { %v2028_v0 = vpop.eup %2027  ;;  %vm1783_vm8 = vmor %vm1781_vm6, %vm1782_vm5 }
 0x9a3   :  { %v1777_v2 = vmul.f32 %v2026_v34, %v1776_v62  ;;  %v1756_v4 = vmul.f32 %v2028_v0, %v1742_v52  ;;  %vm1762_vm7 = vweird.f32 %v2028_v0 }
 0x9a4   :  { %vm1763_vm11 = vmor %vm1761_vm9, %vm1762_vm7 }
 0x9a5   :  { %v1778_v7 = vmul.f32 0.5, %v1777_v2  ;;  %v1757_v8 = vmul.f32 %v2028_v0, %v1756_v4 }
 0x9a7   :  { %v1779_v9 = vsub.f32 1.5, %v1778_v7  ;;  %v1758_v6 = vmul.f32 0.5, %v1757_v8 }
 0x9a8   :  { %v1511_v10 = vpop.permute.xlu0 %1510 }
 0x9a9   :  { %v1780_v61 = vmul.f32 %v2026_v34, %v1779_v9  ;;  %v1759_v63 = vsub.f32 1.5, %v1758_v6  ;;  %1522 = vst.msk [vmem:[#allocation16 + $0x8] sm:$0xff] %vm1520_vm1, %v1511_v10 }
 0x9ab   :  { %v1784_v38 = vsel %vm1783_vm8, %v2026_v34, %v1780_v61  ;;  %v1760_v11 = vmul.f32 %v2028_v0, %v1759_v63 }
 0x9ac   :  { %v1788_v12 = vmul.f32 %v1784_v38, %v2775_v30 }
 0x9ad   :  { %v1764_v14 = vsel %vm1763_vm11, %v2028_v0, %v1760_v11 }
 0x9ae   :  { %v1796_v16 = vmul.f32 %v2798_v22, %v1788_v12  ;;  %v1786_v33 = vmul.f32 %v1764_v14, %v2778_v46 }
 0x9af   :  { %v1515_v35 = vpop.permute.xlu1 %1514 }
 0x9b0   :  { %v1804_v15 = vadd.f32 %v2803_v39, %v1796_v16  ;;  %v1794_v13 = vmul.f32 %v2798_v22, %v1786_v33  ;;  %1524 = vst.msk [vmem:[#allocation16 + $0x18] sm:$0xff] %vm1520_vm1, %v1515_v35 }
 0x9b1   :  { %1834 = dma.vmem_to_hbm [thread:$0]  %s1827_s8, 512, %s1829_s13, [#allocation17], %s2262_s21, %s2262_s21, %s2263_s22  }
 0x9b2   :  { %1808 = vst.msk [vmem:[#allocation15 + $0x18] sm:$0xff] %vm161_vm0, %v1804_v15  ;;  %v1802_v30 = vadd.f32 %v2803_v39, %v1794_v13 }
 0x9b4   :  { %1806 = vst.msk [vmem:[#allocation15 + $0x8] sm:$0xff] %vm161_vm0, %v1802_v30 }
 0x9b5   :  { %1821 = dma.vmem_to_hbm [thread:$0]  %s1814_s0, 512, %s1816_s17, [#allocation5], %s2262_s21, %s2262_s21, %s2263_s22  }
 0x9b6   :  { %2257 = dma.done.wait [#allocation5], 512  }
 0x9b7   :  { %2258 = vsyncadd [#allocation5], 4294966784 }
 0x9b8   :  { %2259 = dma.done.wait [#allocation17], 512  }
 0x9b9   :  { %2260 = vsyncadd [#allocation17], 4294966784 }
 0x9ba   :  { %1843 = vsyncpa [#allocation4], 1 }
 0x9bb   :  { %1844 = vsyncpa [#allocation7], 1 }
 0x9bc   :  { %1845 = vsyncpa [#allocation10], 1 }
 0x9bd   :  { %1846 = vsyncpa [#allocation13], 1 }
 0x9be   :  { %1847 = vsyncpa [#allocation5], 1 }
 0x9bf   :  { %1848 = vsyncpa [#allocation17], 1 }

// kernel: tpu_custom_call.1
= control target key start
LH: loop header
LB: loop body
LE: loop exit
PB: predicated region body
PF: predicated region fallthrough
CT: control target
= control target key end

     0   :  { %16 = vsyncpa [#allocation4], 0  ;;  %s2836_s0 = inlined_call_operand.hbm [shape: f32[4,8,32], index: 0, kind: input, shape index: {}]   ;;  %s2837_s1 = inlined_call_operand.hbm [shape: f32[4,8,32], index: 1, kind: input, shape index: {}]   ;;  %s2838_s2 = inlined_call_operand.hbm [shape: f32[4,8,32], index: 2, kind: input, shape index: {}]   ;;  %s2839_s3 = inlined_call_operand.hbm [shape: f32[32,32], index: 3, kind: input, shape index: {}]   ;;  %s2840_s4 = inlined_call_operand.hbm [shape: f32[32,32], index: 4, kind: input, shape index: {}]   ;;  %s2841_s5 = inlined_call_operand.hbm [shape: f32[32,32], index: 5, kind: input, shape index: {}]   ;;  %s2842_s6 = inlined_call_operand.hbm [shape: f32[32,32], index: 6, kind: input, shape index: {}]   ;;  %s2843_s7 = inlined_call_operand.vmem [shape: f32[1,32], index: 7, kind: input, shape index: {}]   ;;  %s2844_s8 = inlined_call_operand.vmem [shape: f32[1,32], index: 8, kind: input, shape index: {}]   ;;  %s2845_s9 = inlined_call_operand.hbm [shape: f32[4,8,32], index: 9, kind: output, shape index: {0}]   ;;  %s2846_s10 = inlined_call_operand.hbm [shape: f32[4,8,32], index: 10, kind: output, shape index: {1}]  }
   0x1   :  { %17 = vsyncpa [#allocation7], 0 }
   0x2   :  { %18 = vsyncpa [#allocation10], 0 }
   0x3   :  { %19 = vsyncpa [#allocation13], 0 }
   0x4   :  { %20 = vsyncpa [#allocation5], 0 }
   0x5   :  { %21 = vsyncpa [#allocation17], 0  ;;  %s39_s15 = sshll.u32 %s2837_s1, 4  ;;  %s2261_s16 = smov [#allocation6]   ;;  %s40_s15 = int_to_ptr.hbm [resolvable:$true] %s39_s15 }
   0x6   :  { %s41_s17 = sshll.u32 %s2261_s16, 4  ;;  %s65_s20 = sshll.u32 %s2839_s3, 4  ;;  %s42_s17 = int_to_ptr.vmem [resolvable:$true] %s41_s17  ;;  %s66_s20 = int_to_ptr.hbm [resolvable:$true] %s65_s20 }
   0x7   :  { %s2262_s21 = smov 128   ;;  %s2263_s22 = smov 8  }
   0x8   :  { %47 = dma.hbm_to_vmem [thread:$0]  %s40_s15, 512, %s42_s17, [#allocation7], %s2262_s21, %s2262_s21, %s2263_s22  }
   0x9   :  { %s2264_s23 = smov [#allocation9]   ;;  %s91_s1 = sshll.u32 %s2841_s5, 4  ;;  %s92_s1 = int_to_ptr.hbm [resolvable:$true] %s91_s1 }
   0xa   :  { %s67_s24 = sshll.u32 %s2264_s23, 4  ;;  %s26_s28 = sshll.u32 %s2836_s0, 4  ;;  %s68_s24 = int_to_ptr.vmem [resolvable:$true] %s67_s24  ;;  %s27_s28 = int_to_ptr.hbm [resolvable:$true] %s26_s28 }
   0xb   :  { %73 = dma.hbm_to_vmem [thread:$0]  %s66_s20, 512, %s68_s24, [#allocation10], %s2262_s21, %s2262_s21, %s2263_s22  }
   0xc   :  { %s2265_s29 = smov [#allocation12]   ;;  %s2266_s11 = smov [#allocation3]  }
   0xd   :  { %s93_s30 = sshll.u32 %s2265_s29, 4  ;;  %s28_s5 = sshll.u32 %s2266_s11, 4  ;;  %s94_s30 = int_to_ptr.vmem [resolvable:$true] %s93_s30  ;;  %s29_s5 = int_to_ptr.vmem [resolvable:$true] %s28_s5 }
   0xe   :  { %99 = dma.hbm_to_vmem [thread:$0]  %s92_s1, 512, %s94_s30, [#allocation13], %s2262_s21, %s2262_s21, %s2263_s22  }
   0xf   :  { %s52_s14 = sshll.u32 %s2838_s2, 4  ;;  %s78_s16 = sshll.u32 %s2840_s4, 4  ;;  %s53_s14 = int_to_ptr.hbm [resolvable:$true] %s52_s14  ;;  %s79_s16 = int_to_ptr.hbm [resolvable:$true] %s78_s16 }
  0x10   :  { %34 = dma.hbm_to_vmem [thread:$0]  %s27_s28, 512, %s29_s5, [#allocation4], %s2262_s21, %s2262_s21, %s2263_s22  }
  0x11   :  { %s2267_s17 = smov [#allocation8]   ;;  %s2268_s19 = smov [#allocation11]  }
  0x12   :  { %s54_s18 = sshll.u32 %s2267_s17, 4  ;;  %s80_s2 = sshll.u32 %s2268_s19, 4  ;;  %s55_s18 = int_to_ptr.vmem [resolvable:$true] %s54_s18  ;;  %s81_s2 = int_to_ptr.vmem [resolvable:$true] %s80_s2 }
  0x13   :  { %60 = dma.hbm_to_vmem [thread:$0]  %s53_s14, 512, %s55_s18, [#allocation7], %s2262_s21, %s2262_s21, %s2263_s22  }
  0x14   :  { %s104_s24 = sshll.u32 %s2842_s6, 4  ;;  %s2269_s4 = smov [#allocation14]   ;;  %s105_s24 = int_to_ptr.hbm [resolvable:$true] %s104_s24 }
  0x15   :  { %86 = dma.hbm_to_vmem [thread:$0]  %s79_s16, 512, %s81_s2, [#allocation10], %s2262_s21, %s2262_s21, %s2263_s22  }
  0x16   :  { %s106_s25 = sshll.u32 %s2269_s4, 4  ;;  %s107_s25 = int_to_ptr.vmem [resolvable:$true] %s106_s25 }
  0x17   :  { %112 = dma.hbm_to_vmem [thread:$0]  %s105_s24, 512, %s107_s25, [#allocation13], %s2262_s21, %s2262_s21, %s2263_s22  }
  0x18   :  { %2249 = dma.done.wait [#allocation4], 512  }
  0x19   :  { %2250 = vsyncadd [#allocation4], 4294966784 }
  0x1a   :  { %2251 = dma.done.wait [#allocation7], 1024  }
  0x1b   :  { %2252 = vsyncadd [#allocation7], 4294966272 }
  0x1c   :  { %2253 = dma.done.wait [#allocation10], 1024  }
  0x1d   :  { %2254 = vsyncadd [#allocation10], 4294966272 }
  0x1e   :  { %2255 = dma.done.wait [#allocation13], 1024  }
  0x1f   :  { %2256 = vsyncadd [#allocation13], 4294966272  ;;  %v160_v0 = vld [vmem:[#allocation9 + $0x18] sm:$0xff]  ;;  %v159_v1 = vld [vmem:[#allocation9 + $0x10] sm:$0xff]  ;;  %vm161_vm0 = vcmask 261120   ;;  %vm293_vm1 = vcmask 64512  }
  0x20   :  { %1913 = vmatpush.msra.mxu1 %v160_v0  ;;  %186 = vmatpush.msra.mxu0 %v160_v0  ;;  %v158_v2 = vld [vmem:[#allocation9 + $0x8] sm:$0xff]  ;;  %v157_v3 = vld [vmem:[#allocation9] sm:$0xff]  ;;  %v148_v4 = vld [vmem:[#allocation3 + $0x18] sm:$0xff]  ;;  %s2270_s6 = smov 120   ;;  %s2271_s26 = smov 112  }
  0x21   :  { %v145_v5 = vld [vmem:[#allocation3] sm:$0xff]  ;;  %v206_v6 = vld [vmem:[#allocation11 + $0x18] sm:$0xff]  ;;  %v205_v7 = vld [vmem:[#allocation11 + $0x10] sm:$0xff]  ;;  %s2272_s1 = smov 104   ;;  %s2273_s3 = smov 16  }
  0x22   :  { %1914 = vmatpush.msra.mxu1 %v159_v1  ;;  %187 = vmatpush.msra.mxu0 %v159_v1  ;;  %v251_v8 = vld [vmem:[#allocation12 + $0x18] sm:$0xff]  ;;  %v250_v9 = vld [vmem:[#allocation12 + $0x10] sm:$0xff]  ;;  %v204_v10 = vld [vmem:[#allocation11 + $0x8] sm:$0xff]  ;;  %s2274_s27 = smov 24   ;;  %s1828_s13 = sshll.u32 %s2846_s10, 4  ;;  %s1829_s13 = int_to_ptr.hbm [resolvable:$true] %s1828_s13 }
  0x23   :  { %276 = vmatpush.msra.mxu2 %v251_v8  ;;  %v249_v11 = vld [vmem:[#allocation12 + $0x8] sm:$0xff]  ;;  %v203_v12 = vld [vmem:[#allocation11] sm:$0xff]  ;;  %v147_v18 = vld [vmem:[#allocation3 + $0x10] sm:$0xff]  ;;  %s2277_s14 = smov [#allocation15]   ;;  %s1815_s17 = sshll.u32 %s2845_s9, 4  ;;  %s1816_s17 = int_to_ptr.hbm [resolvable:$true] %s1815_s17 }
  0x24   :  { %1915 = vmatpush.msra.mxu1 %v158_v2  ;;  %188 = vmatpush.msra.mxu0 %v158_v2  ;;  %v248_v13 = vld [vmem:[#allocation12] sm:$0xff]  ;;  %v146_v15 = vld [vmem:[#allocation3 + $0x8] sm:$0xff]  ;;  %v151_v20 = vld [vmem:[#allocation6 + $0x10] sm:$0xff]  ;;  %s1813_s0 = sshll.u32 %s2277_s14, 4  ;;  %s1814_s0 = int_to_ptr.vmem [resolvable:$true] %s1813_s0 }
  0x25   :  { %277 = vmatpush.msra.mxu2 %v250_v9  ;;  %v149_v14 = vld [vmem:[#allocation6] sm:$0xff]  ;;  %v150_v17 = vld [vmem:[#allocation6 + $0x8] sm:$0xff]  ;;  %v155_v21 = vld [vmem:[#allocation8 + $0x10] sm:$0xff] }
  0x26   :  { %1916 = vmatpush.msra.mxu1 %v157_v3  ;;  %189 = vmatpush.msra.mxu0 %v157_v3  ;;  %v153_v16 = vld [vmem:[#allocation8] sm:$0xff]  ;;  %v154_v19 = vld [vmem:[#allocation8 + $0x8] sm:$0xff]  ;;  %v152_v22 = vld [vmem:[#allocation6 + $0x18] sm:$0xff] }
  0x27   :  { %1852 = vmatmul.msk.f32.vlgmr.msra.gmra.mxu1 %vm161_vm0, %v148_v4  ;;  %1849 = vmatmul.msk.f32.vlgmr.msra.gmra.mxu0 %vm161_vm0, %v145_v5  ;;  %v156_v23 = vld [vmem:[#allocation8 + $0x18] sm:$0xff] }
  0x28   :  { %231 = vmatpush.msrb.mxu1 %v206_v6  ;;  %278 = vmatpush.msra.mxu2 %v249_v11 }
  0x2a   :  { %232 = vmatpush.msrb.mxu1 %v205_v7  ;;  %279 = vmatpush.msra.mxu2 %v248_v13 }
  0x2b   :  { %1857 = vmatmul.msk.f32.vlgmr.msra.gmra.mxu2 %vm161_vm0, %v153_v16 }
  0x2c   :  { %233 = vmatpush.msrb.mxu1 %v204_v10 }
  0x2e   :  { %234 = vmatpush.msrb.mxu1 %v203_v12 }
  0x2f   :  { %1853 = vmatmul.msk.f32.vlgmr.msrb.gmra.mxu1 %vm161_vm0, %v149_v14  ;;  %1850 = vmatmul.msk.f32.gmra.mxu0 %vm161_vm0, %v146_v15 }
  0x33   :  { %1858 = vmatmul.msk.f32.gmra.mxu2 %vm161_vm0, %v154_v19 }
  0x37   :  { %1854 = vmatmul.msk.f32.gmra.mxu1 %vm161_vm0, %v150_v17  ;;  %1851 = vmatmul.msk.f32.gmra.mxu0 %vm161_vm0, %v147_v18 }
  0x3b   :  { %1859 = vmatmul.msk.f32.gmra.mxu2 %vm161_vm0, %v155_v21 }
  0x3f   :  { %1855 = vmatmul.msk.f32.gmra.mxu1 %vm161_vm0, %v151_v20 }
  0x43   :  { %1860 = vmatmul.msk.f32.gmra.mxu2 %vm161_vm0, %v156_v23 }
  0x47   :  { %1856 = vmatmul.msk.f32.gmra.mxu1 %vm161_vm0, %v152_v22 }
  0xa4   :  { %v2387_v24 = vpop.f32.mrf.mxu1  ;;  %v2389_v25 = vpop.f32.mrf.mxu0 }
  0xac   :  { %v2391_v26 = vpop.f32.mrf.mxu1  ;;  %v2397_v27 = vpop.f32.mrf.mxu0 }
  0xad   :  { %1861 = vmatpush.xpose.msk.msrb.mxu2 %vm293_vm1, %v2391_v26 }
  0xae   :  { %v2399_v28 = vpop.f32.mrf.mxu2 }
  0xb0   :  { %1862 = vmatmul.msk.f32.vlgmr.msrb.gmra.mxu2 %vm293_vm1, %v2389_v25 }
  0xb4   :  { %v2401_v29 = vpop.f32.mrf.mxu1  ;;  %v2414_v32 = vpop.f32.mrf.mxu0 }
  0xb5   :  { %1863 = vmatpush.xpose.msk.msra.mxu3 %vm293_vm1, %v2401_v29 }
  0xb6   :  { %v2407_v30 = vpop.f32.mrf.mxu2 }
  0xb7   :  { %539 = vmatpush.msrb.mxu0 %v2407_v30 }
  0xb8   :  { %1864 = vmatmul.msk.f32.vlgmr.msra.gmra.mxu3 %vm293_vm1, %v2397_v27 }
  0xbc   :  { %v2409_v31 = vpop.f32.mrf.mxu1 }
  0xbd   :  { %1865 = vmatpush.xpose.msk.msrb.mxu3 %vm293_vm1, %v2409_v31 }
  0xbe   :  { %v2418_v33 = vpop.f32.mrf.mxu2 }
  0xbf   :  { %562 = vmatpush.msra.mxu1 %v2418_v33 }
  0xc0   :  { %1866 = vmatmul.msk.f32.vlgmr.msrb.gmra.mxu3 %vm293_vm1, %v2414_v32 }
  0xc4   :  { %v2420_v34 = vpop.f32.mrf.mxu1 }
  0xc5   :  { %1867 = vmatpush.xpose.msk.msra.mxu3 %vm293_vm1, %v2420_v34  ;;  %680 = vrot.lane.b32.xlu2 %v2420_v34, %s2270_s6 }
  0xc6   :  { %v2430_v35 = vpop.f32.mrf.mxu2 }
  0xc7   :  { %585 = vmatpush.msra.mxu2 %v2430_v35  ;;  %v2458_v2 = vpack.i.bf16 %v2430_v35, %v2399_v28 }
  0xc8   :  { %1868 = vmatmul.msk.f32.vlgmr.msra.gmra.mxu3 %vm293_vm1, %v2387_v24 }
  0xc9   :  { %516 = vmatpush.msrb.mxu3 %v2399_v28 }
 0x11f   :  { %v681_v36 = vpop.permute.xlu2 %680 }
 0x120   :  { %1879 = vmatpush.xpose.msk.msrb.mxu2 %vm293_vm1, %v681_v36 }
 0x133   :  { %v317_v37 = vpop.f32.mrf.mxu2 }
 0x134   :  { %v398_v38 = vsel %vm293_vm1, %v317_v37, -inf }
 0x135   :  { %399 = vmax.xlane.f32.xlu0 %v398_v38 }
 0x13b   :  { %v343_v39 = vpop.f32.mrf.mxu3 }
 0x13c   :  { %v401_v40 = vsel %vm293_vm1, %v343_v39, -inf }
 0x13d   :  { %402 = vmax.xlane.f32.xlu1 %v401_v40 }
 0x143   :  { %v369_v41 = vpop.f32.mrf.mxu3 }
 0x144   :  { %v404_v42 = vsel %vm293_vm1, %v369_v41, -inf }
 0x145   :  { %405 = vmax.xlane.f32.xlu1 %v404_v42 }
 0x14b   :  { %v395_v43 = vpop.f32.mrf.mxu3 }
 0x14c   :  { %v407_v44 = vsel %vm293_vm1, %v395_v43, -inf }
 0x14d   :  { %408 = vmax.xlane.f32.xlu0 %v407_v44 }
 0x15e   :  { %596 = vrot.lane.b32.xlu1 %v2391_v26, %s2270_s6 }
 0x161   :  { %594 = vrot.lane.b32.xlu0 %v2389_v25, %s2270_s6 }
 0x1a8   :  { %v400_v45 = vpop.xlane.xlu0 %399 }
 0x1a9   :  { %v410_v46 = vsub.f32 %v317_v37, %v400_v45 }
 0x1ab   :  { %v414_v47 = vmul.f32 1.442695, %v410_v46 }
 0x1ad   :  { %1955 = vpow2.f32 %v414_v47 }
 0x1b0   :  { %v403_v48 = vpop.xlane.xlu1 %402 }
 0x1b1   :  { %v411_v49 = vsub.f32 %v343_v39, %v403_v48 }
 0x1b3   :  { %v1956_v50 = vpop.eup %1955  ;;  %v416_v51 = vmul.f32 1.442695, %v411_v49 }
 0x1b4   :  { %v422_v52 = vsel %vm293_vm1, %v1956_v50, 0.0 }
 0x1b5   :  { %1957 = vpow2.f32 %v416_v51  ;;  %423 = vadd.xlane.f32.xlu2 %v422_v52 }
 0x1b8   :  { %v406_v53 = vpop.xlane.xlu1 %405 }
 0x1b9   :  { %v412_v54 = vsub.f32 %v369_v41, %v406_v53 }
 0x1bb   :  { %v2443_v55 = vpop.eup %1957  ;;  %v418_v56 = vmul.f32 1.442695, %v412_v54 }
 0x1bc   :  { %v425_v57 = vsel %vm293_vm1, %v2443_v55, 0.0 }
 0x1bd   :  { %1959 = vpow2.f32 %v418_v56  ;;  %426 = vadd.xlane.f32.xlu1 %v425_v57 }
 0x1c0   :  { %v409_v58 = vpop.xlane.xlu0 %408 }
 0x1c1   :  { %v413_v59 = vsub.f32 %v395_v43, %v409_v58 }
 0x1c3   :  { %v2447_v60 = vpop.eup %1959  ;;  %v420_v61 = vmul.f32 1.442695, %v413_v59 }
 0x1c4   :  { %v428_v62 = vsel %vm293_vm1, %v2447_v60, 0.0 }
 0x1c5   :  { %1961 = vpow2.f32 %v420_v61  ;;  %429 = vadd.xlane.f32.xlu0 %v428_v62 }
 0x1cb   :  { %v2451_v63 = vpop.eup %1961 }
 0x1cc   :  { %v431_v0 = vsel %vm293_vm1, %v2451_v63, 0.0 }
 0x1cd   :  { %432 = vadd.xlane.f32.xlu2 %v431_v0 }
 0x1d0   :  { %v597_v1 = vpop.permute.xlu1 %596 }
 0x1d1   :  { %1873 = vmatpush.xpose.msk.msra.mxu3 %vm293_vm1, %v597_v1 }
 0x1d3   :  { %v595_v5 = vpop.permute.xlu0 %594 }
 0x1d6   :  { %1939 = vrot.lane.b32.xlu1 %v2458_v2, %s2270_s6 }
 0x1d9   :  { %652 = vrot.lane.b32.xlu0 %v2409_v31, %s2270_s6 }
 0x1e1   :  { %624 = vrot.lane.b32.xlu0 %v2401_v29, %s2270_s6 }
 0x1e5   :  { %678 = vrot.lane.b32.xlu2 %v2387_v24, %s2270_s6 }
 0x1e9   :  { %949 = vrot.lane.b32.xlu0 %v2391_v26, %s2271_s26 }
 0x1ed   :  { %650 = vrot.lane.b32.xlu2 %v2414_v32, %s2270_s6 }
 0x1f5   :  { %622 = vrot.lane.b32.xlu2 %v2397_v27, %s2270_s6 }
 0x228   :  { %v424_v3 = vpop.xlane.xlu2 %423 }
 0x229   :  { %1963 = vrcp.f32 %v424_v3  ;;  %v445_v9 = vand.u32 2147483648, %v424_v3  ;;  %v443_v11 = vand.u32 2147483647, %v424_v3  ;;  %vm439_vm3 = vweird.f32 %v424_v3 }
 0x22b   :  { %v446_v14 = vor.u32 1.1754944e-38, %v445_v9  ;;  %vm444_vm5 = vcmp.eq.f32.partialorder %v443_v11, 8.507059e+37 }
 0x22f   :  { %v1964_v4 = vpop.eup %1963 }
 0x230   :  { %v435_v6 = vmul.f32 %v1964_v4, %v424_v3  ;;  %v427_v7 = vpop.xlane.xlu1 %426  ;;  %vm440_vm2 = vweird.f32 %v1964_v4 }
 0x231   :  { %1965 = vrcp.f32 %v427_v7  ;;  %vm441_vm4 = vmor %vm439_vm3, %vm440_vm2  ;;  %v459_v22 = vand.u32 2147483648, %v427_v7  ;;  %v457_v23 = vand.u32 2147483647, %v427_v7  ;;  %vm453_vm7 = vweird.f32 %v427_v7 }
 0x232   :  { %v436_v8 = vsub.f32 1.0, %v435_v6 }
 0x233   :  { %v460_v38 = vor.u32 1.1754944e-38, %v459_v22  ;;  %vm458_vm9 = vcmp.eq.f32.partialorder %v457_v23, 8.507059e+37 }
 0x234   :  { %v437_v10 = vmul.f32 %v1964_v4, %v436_v8 }
 0x236   :  { %v438_v12 = vadd.f32 %v1964_v4, %v437_v10 }
 0x237   :  { %v1966_v13 = vpop.eup %1965 }
 0x238   :  { %v442_v15 = vsel %vm441_vm4, %v1964_v4, %v438_v12  ;;  %v449_v16 = vmul.f32 %v1966_v13, %v427_v7  ;;  %v430_v17 = vpop.xlane.xlu0 %429  ;;  %vm454_vm6 = vweird.f32 %v1966_v13 }
 0x239   :  { %v447_v18 = vsel %vm444_vm5, %v446_v14, %v442_v15  ;;  %1967 = vrcp.f32 %v430_v17  ;;  %vm455_vm8 = vmor %vm453_vm7, %vm454_vm6  ;;  %v473_v44 = vand.u32 2147483648, %v430_v17  ;;  %v471_v47 = vand.u32 2147483647, %v430_v17 }
 0x23a   :  { %v450_v19 = vsub.f32 1.0, %v449_v16  ;;  %v490_v20 = vmul.f32 %v1956_v50, %v447_v18  ;;  %vm467_vm11 = vweird.f32 %v430_v17 }
 0x23b   :  { %v474_v50 = vor.u32 1.1754944e-38, %v473_v44  ;;  %vm472_vm13 = vcmp.eq.f32.partialorder %v471_v47, 8.507059e+37 }
 0x23c   :  { %v451_v21 = vmul.f32 %v1966_v13, %v450_v19  ;;  %1869 = vmatmul.msk.f32.vlgmr.msrb.gmra.mxu3 %vm293_vm1, %v490_v20  ;;  %494 = vst.msk [vmem:[#allocation16] sm:$0xff] %vm293_vm1, %v490_v20 }
 0x23e   :  { %v452_v36 = vadd.f32 %v1966_v13, %v451_v21 }
 0x23f   :  { %v1968_v37 = vpop.eup %1967 }
 0x240   :  { %v463_v39 = vmul.f32 %v1968_v37, %v430_v17  ;;  %v433_v40 = vpop.xlane.xlu2 %432  ;;  %v456_v41 = vsel %vm455_vm8, %v1966_v13, %v452_v36  ;;  %vm468_vm10 = vweird.f32 %v1968_v37 }
 0x241   :  { %1969 = vrcp.f32 %v433_v40  ;;  %v461_v43 = vsel %vm458_vm9, %v460_v38, %v456_v41  ;;  %vm469_vm12 = vmor %vm467_vm11, %vm468_vm10  ;;  %v487_v59 = vand.u32 2147483648, %v433_v40  ;;  %v485_v0 = vand.u32 2147483647, %v433_v40 }
 0x242   :  { %v464_v42 = vsub.f32 1.0, %v463_v39  ;;  %v491_v45 = vmul.f32 %v2443_v55, %v461_v43  ;;  %vm481_vm15 = vweird.f32 %v433_v40 }
 0x243   :  { %v488_v3 = vor.u32 1.1754944e-38, %v487_v59  ;;  %vm486_vm3 = vcmp.eq.f32.partialorder %v485_v0, 8.507059e+37 }
 0x244   :  { %v465_v46 = vmul.f32 %v1968_v37, %v464_v42  ;;  %1874 = vmatmul.msk.f32.vlgmr.msra.gmra.mxu3 %vm293_vm1, %v595_v5  ;;  %1870 = vmatmul.msk.f32.vlgmr.msrb.gmra.mxu0 %vm293_vm1, %v491_v45  ;;  %495 = vst.msk [vmem:[#allocation16 + $0x8] sm:$0xff] %vm293_vm1, %v491_v45 }
 0x246   :  { %v466_v48 = vadd.f32 %v1968_v37, %v465_v46 }
 0x247   :  { %v1970_v49 = vpop.eup %1969 }
 0x248   :  { %v470_v51 = vsel %vm469_vm12, %v1968_v37, %v466_v48  ;;  %v477_v52 = vmul.f32 %v1970_v49, %v433_v40  ;;  %v1940_v53 = vpop.permute.xlu1 %1939  ;;  %v679_v54 = vpop.permute.xlu2 %678  ;;  %vm482_vm14 = vweird.f32 %v1970_v49 }
 0x249   :  { %v475_v55 = vsel %vm472_vm13, %v474_v50, %v470_v51  ;;  %v1941_v56 = vunpack.i.l.bf16 %v1940_v53  ;;  %vm483_vm2 = vmor %vm481_vm15, %vm482_vm14  ;;  %v1942_v7 = vunpack.i.h.bf16 %v1940_v53 }
 0x24a   :  { %v478_v57 = vsub.f32 1.0, %v477_v52  ;;  %v492_v58 = vmul.f32 %v2447_v60, %v475_v55 }
 0x24b   :  { %844 = vmatpush.msrb.mxu3 %v1941_v56  ;;  %v653_v61 = vpop.permute.xlu0 %652 }
 0x24c   :  { %v479_v62 = vmul.f32 %v1970_v49, %v478_v57  ;;  %1871 = vmatmul.msk.f32.vlgmr.msra.gmra.mxu1 %vm293_vm1, %v492_v58  ;;  %496 = vst.msk [vmem:[#allocation16 + $0x10] sm:$0xff] %vm293_vm1, %v492_v58 }
 0x24d   :  { %1877 = vmatpush.xpose.msk.msrb.mxu1 %vm293_vm1, %v653_v61 }
 0x24e   :  { %v480_v1 = vadd.f32 %v1970_v49, %v479_v62 }
 0x250   :  { %v484_v4 = vsel %vm483_vm2, %v1970_v49, %v480_v1  ;;  %v651_v5 = vpop.permute.xlu2 %650 }
 0x251   :  { %v489_v60 = vsel %vm486_vm3, %v488_v3, %v484_v4 }
 0x252   :  { %v493_v6 = vmul.f32 %v2451_v63, %v489_v60 }
 0x253   :  { %v625_v8 = vpop.permute.xlu0 %624 }
 0x254   :  { %1872 = vmatmul.msk.f32.vlgmr.msra.gmra.mxu2 %vm293_vm1, %v493_v6  ;;  %497 = vst.msk [vmem:[#allocation16 + $0x18] sm:$0xff] %vm293_vm1, %v493_v6  ;;  %1875 = vmatpush.xpose.msk.msra.mxu0 %vm293_vm1, %v625_v8 }
 0x255   :  { %1878 = vmatmul.msk.f32.vlgmr.msrb.gmra.mxu1 %vm293_vm1, %v651_v5  ;;  %922 = vmatpush.msra.mxu2 %v1942_v7 }
 0x258   :  { %v623_v9 = vpop.permute.xlu2 %622 }
 0x259   :  { %1876 = vmatmul.msk.f32.vlgmr.msra.gmra.mxu0 %vm293_vm1, %v623_v9 }
 0x25b   :  { %v950_v10 = vpop.permute.xlu0 %949 }
 0x25c   :  { %1880 = vmatmul.msk.f32.vlgmr.msrb.gmra.mxu2 %vm293_vm1, %v679_v54  ;;  %1885 = vmatpush.xpose.msk.msra.mxu3 %vm293_vm1, %v950_v10 }
 0x2bf   :  { %v518_v63 = vpop.f32.mrf.mxu3 }
 0x2c0   :  { %590 = vst.msk [vmem:[#allocation2] sm:$0xff] %vm293_vm1, %v518_v63 }
 0x2c1   :  { %v541_v11 = vpop.f32.mrf.mxu0 }
 0x2c2   :  { %591 = vst.msk [vmem:[#allocation2 + $0x8] sm:$0xff] %vm293_vm1, %v541_v11 }
 0x2c7   :  { %v619_v12 = vpop.f32.mrf.mxu3 }
 0x2c8   :  { %v706_v13 = vsel %vm293_vm1, %v619_v12, -inf }
 0x2c9   :  { %707 = vmax.xlane.f32.xlu0 %v706_v13  ;;  %v564_v14 = vpop.f32.mrf.mxu1 }
 0x2ca   :  { %592 = vst.msk [vmem:[#allocation2 + $0x10] sm:$0xff] %vm293_vm1, %v564_v14 }
 0x2d2   :  { %v675_v18 = vpop.f32.mrf.mxu1 }
 0x2d3   :  { %v712_v20 = vsel %vm293_vm1, %v675_v18, -inf }
 0x2d6   :  { %v647_v15 = vpop.f32.mrf.mxu0 }
 0x2d7   :  { %v587_v16 = vpop.f32.mrf.mxu2  ;;  %v709_v17 = vsel %vm293_vm1, %v647_v15, -inf }
 0x2d8   :  { %593 = vst.msk [vmem:[#allocation2 + $0x18] sm:$0xff] %vm293_vm1, %v587_v16  ;;  %710 = vmax.xlane.f32.xlu1 %v709_v17 }
 0x2dd   :  { %947 = vrot.lane.b32.xlu0 %v2389_v25, %s2271_s26 }
 0x2df   :  { %v703_v19 = vpop.f32.mrf.mxu2 }
 0x2e0   :  { %713 = vmax.xlane.f32.xlu1 %v712_v20  ;;  %v715_v21 = vsel %vm293_vm1, %v703_v19, -inf }
 0x2e1   :  { %716 = vmax.xlane.f32.xlu2 %v715_v21 }
 0x2f9   :  { %1033 = vrot.lane.b32.xlu2 %v2420_v34, %s2271_s26  ;;  %1031 = vrot.lane.b32.xlu1 %v2387_v24, %s2271_s26 }
 0x33c   :  { %v708_v22 = vpop.xlane.xlu0 %707 }
 0x33d   :  { %v718_v23 = vsub.f32 %v619_v12, %v708_v22 }
 0x33f   :  { %v722_v36 = vmul.f32 1.442695, %v718_v23 }
 0x341   :  { %1971 = vpow2.f32 %v722_v36 }
 0x347   :  { %v1972_v37 = vpop.eup %1971 }
 0x348   :  { %v730_v38 = vsel %vm293_vm1, %v1972_v37, 0.0 }
 0x349   :  { %731 = vadd.xlane.f32.xlu1 %v730_v38 }
 0x34b   :  { %v711_v39 = vpop.xlane.xlu1 %710 }
 0x34c   :  { %v719_v40 = vsub.f32 %v647_v15, %v711_v39 }
 0x34e   :  { %v724_v41 = vmul.f32 1.442695, %v719_v40 }
 0x34f   :  { %v948_v3 = vpop.permute.xlu0 %947 }
 0x350   :  { %1973 = vpow2.f32 %v724_v41 }
 0x353   :  { %v714_v42 = vpop.xlane.xlu1 %713 }
 0x354   :  { %v720_v43 = vsub.f32 %v675_v18, %v714_v42  ;;  %v717_v44 = vpop.xlane.xlu2 %716 }
 0x355   :  { %v721_v45 = vsub.f32 %v703_v19, %v717_v44 }
 0x356   :  { %v2507_v46 = vpop.eup %1973  ;;  %v726_v47 = vmul.f32 1.442695, %v720_v43 }
 0x357   :  { %v728_v48 = vmul.f32 1.442695, %v721_v45  ;;  %v733_v49 = vsel %vm293_vm1, %v2507_v46, 0.0 }
 0x358   :  { %1975 = vpow2.f32 %v726_v47  ;;  %734 = vadd.xlane.f32.xlu2 %v733_v49 }
 0x359   :  { %1977 = vpow2.f32 %v728_v48 }
 0x35c   :  { %v1034_v50 = vpop.permute.xlu2 %1033 }
 0x35d   :  { %1891 = vmatpush.xpose.msk.msrb.mxu2 %vm293_vm1, %v1034_v50 }
 0x35e   :  { %v2512_v51 = vpop.eup %1975 }
 0x35f   :  { %v2514_v52 = vpop.eup %1977  ;;  %v736_v53 = vsel %vm293_vm1, %v2512_v51, 0.0 }
 0x360   :  { %737 = vadd.xlane.f32.xlu2 %v736_v53  ;;  %v739_v54 = vsel %vm293_vm1, %v2514_v52, 0.0 }
 0x361   :  { %740 = vadd.xlane.f32.xlu0 %v739_v54 }
 0x362   :  { %1005 = vrot.lane.b32.xlu1 %v2409_v31, %s2271_s26 }
 0x36a   :  { %977 = vrot.lane.b32.xlu1 %v2401_v29, %s2271_s26 }
 0x372   :  { %1944 = vrot.lane.b32.xlu1 %v2458_v2, %s2271_s26  ;;  %v2538_v2 = vpop.permute.xlu1 %1031 }
 0x375   :  { %876 = vrot.lane.b32.xlu0 %v2418_v33, %s2270_s6 }
 0x378   :  { %1003 = vrot.lane.b32.xlu2 %v2414_v32, %s2271_s26 }
 0x37a   :  { %1382 = vrot.lane.b32.xlu1 %v2420_v34, %s2272_s1 }
 0x37d   :  { %850 = vrot.lane.b32.xlu0 %v2407_v30, %s2270_s6 }
 0x380   :  { %975 = vrot.lane.b32.xlu2 %v2397_v27, %s2271_s26 }
 0x385   :  { %1226 = vrot.lane.b32.xlu0 %v2418_v33, %s2271_s26 }
 0x3bc   :  { %v732_v55 = vpop.xlane.xlu1 %731 }
 0x3bd   :  { %1979 = vrcp.f32 %v732_v55  ;;  %v753_v59 = vand.u32 2147483648, %v732_v55  ;;  %v751_v34 = vand.u32 2147483647, %v732_v55  ;;  %vm747_vm5 = vweird.f32 %v732_v55 }
 0x3bf   :  { %v754_v0 = vor.u32 1.1754944e-38, %v753_v59  ;;  %vm752_vm7 = vcmp.eq.f32.partialorder %v751_v34, 8.507059e+37 }
 0x3c3   :  { %v1980_v56 = vpop.eup %1979 }
 0x3c4   :  { %v743_v57 = vmul.f32 %v1980_v56, %v732_v55  ;;  %vm748_vm4 = vweird.f32 %v1980_v56 }
 0x3c5   :  { %vm749_vm6 = vmor %vm747_vm5, %vm748_vm4 }
 0x3c6   :  { %v744_v58 = vsub.f32 1.0, %v743_v57 }
 0x3c8   :  { %v745_v61 = vmul.f32 %v1980_v56, %v744_v58 }
 0x3ca   :  { %v746_v62 = vadd.f32 %v1980_v56, %v745_v61 }
 0x3cb   :  { %v2540_v1 = vpop.xlane.xlu2 %734 }
 0x3cc   :  { %v750_v4 = vsel %vm749_vm6, %v1980_v56, %v746_v62  ;;  %1981 = vrcp.f32 %v2540_v1  ;;  %v767_v50 = vand.u32 2147483648, %v2540_v1  ;;  %vm761_vm3 = vweird.f32 %v2540_v1 }
 0x3cd   :  { %v755_v5 = vsel %vm752_vm7, %v754_v0, %v750_v4  ;;  %v765_v54 = vand.u32 2147483647, %v2540_v1 }
 0x3ce   :  { %v2542_v60 = vmul.f32 %v1972_v37, %v755_v5 }
 0x3cf   :  { %vm766_vm5 = vcmp.eq.f32.partialorder %v765_v54, 8.507059e+37 }
 0x3d0   :  { %1881 = vmatmul.msk.f32.vlgmr.msrb.gmra.mxu3 %vm293_vm1, %v2542_v60 }
 0x3d2   :  { %v1982_v9 = vpop.eup %1981 }
 0x3d3   :  { %v738_v6 = vpop.xlane.xlu2 %737  ;;  %v757_v10 = vmul.f32 %v1982_v9, %v2540_v1  ;;  %vm762_vm15 = vweird.f32 %v1982_v9 }
 0x3d4   :  { %1983 = vrcp.f32 %v738_v6  ;;  %v1006_v7 = vpop.permute.xlu1 %1005  ;;  %v741_v8 = vpop.xlane.xlu0 %740  ;;  %v781_v17 = vand.u32 2147483648, %v738_v6  ;;  %v779_v20 = vand.u32 2147483647, %v738_v6  ;;  %vm775_vm10 = vweird.f32 %v738_v6  ;;  %vm763_vm4 = vmor %vm761_vm3, %vm762_vm15 }
 0x3d5   :  { %1985 = vrcp.f32 %v741_v8  ;;  %v758_v15 = vsub.f32 1.0, %v757_v10  ;;  %v795_v21 = vand.u32 2147483648, %v741_v8  ;;  %v793_v23 = vand.u32 2147483647, %v741_v8 }
 0x3d6   :  { %v782_v38 = vor.u32 1.1754944e-38, %v781_v17  ;;  %vm789_vm12 = vweird.f32 %v741_v8  ;;  %vm780_vm13 = vcmp.eq.f32.partialorder %v779_v20, 8.507059e+37 }
 0x3d7   :  { %v759_v36 = vmul.f32 %v1982_v9, %v758_v15  ;;  %v796_v41 = vor.u32 1.1754944e-38, %v795_v21  ;;  %vm794_vm2 = vcmp.eq.f32.partialorder %v793_v23, 8.507059e+37 }
 0x3d8   :  { %1886 = vmatmul.msk.f32.vlgmr.msra.gmra.mxu3 %vm293_vm1, %v948_v3 }
 0x3d9   :  { %v760_v45 = vadd.f32 %v1982_v9, %v759_v36 }
 0x3da   :  { %v1984_v63 = vpop.eup %1983 }
 0x3db   :  { %v1986_v11 = vpop.eup %1985  ;;  %v771_v12 = vmul.f32 %v1984_v63, %v738_v6  ;;  %vm776_vm8 = vweird.f32 %v1984_v63  ;;  %v764_v57 = vsel %vm763_vm4, %v1982_v9, %v760_v45  ;;  %v1004_v59 = vpop.permute.xlu2 %1003 }
 0x3dc   :  { %v785_v13 = vmul.f32 %v1986_v11, %v741_v8  ;;  %v978_v14 = vpop.permute.xlu1 %977  ;;  %vm790_vm9 = vweird.f32 %v1986_v11  ;;  %vm777_vm11 = vmor %vm775_vm10, %vm776_vm8 }
 0x3dd   :  { %v772_v16 = vsub.f32 1.0, %v771_v12  ;;  %vm791_vm14 = vmor %vm789_vm12, %vm790_vm9 }
 0x3de   :  { %v786_v18 = vsub.f32 1.0, %v785_v13 }
 0x3df   :  { %v773_v19 = vmul.f32 %v1984_v63, %v772_v16 }
 0x3e0   :  { %v787_v22 = vmul.f32 %v1986_v11, %v786_v18 }
 0x3e1   :  { %v774_v37 = vadd.f32 %v1984_v63, %v773_v19 }
 0x3e2   :  { %v788_v39 = vadd.f32 %v1986_v11, %v787_v22 }
 0x3e3   :  { %v778_v40 = vsel %vm777_vm11, %v1984_v63, %v774_v37  ;;  %v976_v0 = vpop.permute.xlu2 %975 }
 0x3e4   :  { %v783_v42 = vsel %vm780_vm13, %v782_v38, %v778_v40  ;;  %v792_v43 = vsel %vm791_vm14, %v1986_v11, %v788_v39  ;;  %v1945_v44 = vpop.permute.xlu1 %1944 }
 0x3e5   :  { %v797_v47 = vsel %vm794_vm2, %v796_v41, %v792_v43  ;;  %v1947_v48 = vunpack.i.h.bf16 %v1945_v44  ;;  %v1946_v49 = vunpack.i.l.bf16 %v1945_v44  ;;  %v2556_v56 = vmul.f32 %v2512_v51, %v783_v42 }
 0x3e6   :  { %v2551_v53 = vmul.f32 %v2514_v52, %v797_v47  ;;  %v768_v52 = vor.u32 1.1754944e-38, %v767_v50 }
 0x3e7   :  { %1196 = vmatpush.msrb.mxu3 %v1946_v49  ;;  %v877_v55 = vpop.permute.xlu0 %876 }
 0x3e8   :  { %896 = vmatpush.msra.mxu1 %v877_v55  ;;  %1884 = vmatmul.msk.f32.vlgmr.msra.gmra.mxu2 %vm293_vm1, %v2551_v53  ;;  %v769_v58 = vsel %vm766_vm5, %v768_v52, %v764_v57 }
 0x3e9   :  { %1271 = vmatpush.msra.mxu2 %v1947_v48  ;;  %1883 = vmatmul.msk.f32.vlgmr.msra.gmra.mxu1 %vm293_vm1, %v2556_v56  ;;  %v2565_v51 = vmul.f32 %v2507_v46, %v769_v58 }
 0x3ea   :  { %1889 = vmatpush.xpose.msk.msrb.mxu1 %vm293_vm1, %v1006_v7 }
 0x3ec   :  { %v1383_v34 = vpop.permute.xlu1 %1382 }
 0x3ef   :  { %v851_v61 = vpop.permute.xlu0 %850 }
 0x3f0   :  { %870 = vmatpush.msrb.mxu0 %v851_v61  ;;  %1892 = vmatmul.msk.f32.vlgmr.msrb.gmra.mxu2 %vm293_vm1, %v2538_v2 }
 0x3f1   :  { %1903 = vmatpush.xpose.msk.msrb.mxu2 %vm293_vm1, %v1383_v34  ;;  %1882 = vmatmul.msk.f32.vlgmr.msrb.gmra.mxu0 %vm293_vm1, %v2565_v51 }
 0x3f2   :  { %1887 = vmatpush.xpose.msk.msra.mxu0 %vm293_vm1, %v978_v14  ;;  %1890 = vmatmul.msk.f32.vlgmr.msrb.gmra.mxu1 %vm293_vm1, %v1004_v59 }
 0x3f7   :  { %v1227_v62 = vpop.permute.xlu0 %1226 }
 0x3f8   :  { %1246 = vmatpush.msra.mxu1 %v1227_v62 }
 0x3f9   :  { %1888 = vmatmul.msk.f32.vlgmr.msra.gmra.mxu0 %vm293_vm1, %v976_v0 }
 0x453   :  { %v2582_v5 = vpop.f32.mrf.mxu3 }
 0x45b   :  { %v972_v10 = vpop.f32.mrf.mxu3 }
 0x45c   :  { %v1059_v63 = vsel %vm293_vm1, %v972_v10, -inf }
 0x466   :  { %v2575_v46 = vpop.f32.mrf.mxu1 }
 0x46b   :  { %v2577_v1 = vpop.f32.mrf.mxu2 }
 0x46e   :  { %v2579_v3 = vpop.f32.mrf.mxu0 }
 0x46f   :  { %v1028_v2 = vpop.f32.mrf.mxu1 }
 0x470   :  { %v1065_v4 = vsel %vm293_vm1, %v1028_v2, -inf }
 0x471   :  { %1066 = vmax.xlane.f32.xlu2 %v1065_v4 }
 0x473   :  { %v1056_v6 = vpop.f32.mrf.mxu2 }
 0x474   :  { %v1068_v7 = vsel %vm293_vm1, %v1056_v6, -inf }
 0x475   :  { %1069 = vmax.xlane.f32.xlu1 %v1068_v7 }
 0x476   :  { %v1000_v8 = vpop.f32.mrf.mxu0 }
 0x477   :  { %v1062_v9 = vsel %vm293_vm1, %v1000_v8, -inf }
 0x478   :  { %1063 = vmax.xlane.f32.xlu0 %v1062_v9 }
 0x480   :  { %1060 = vmax.xlane.f32.xlu0 %v1059_v63 }
 0x489   :  { %1298 = vrot.lane.b32.xlu2 %v2391_v26, %s2272_s1 }
 0x48e   :  { %1380 = vrot.lane.b32.xlu1 %v2387_v24, %s2272_s1 }
 0x494   :  { %1296 = vrot.lane.b32.xlu0 %v2389_v25, %s2272_s1 }
 0x49c   :  { %1354 = vrot.lane.b32.xlu0 %v2409_v31, %s2272_s1 }
 0x4e4   :  { %v1067_v11 = vpop.xlane.xlu2 %1066 }
 0x4e5   :  { %v1073_v12 = vsub.f32 %v1028_v2, %v1067_v11 }
 0x4e7   :  { %v1079_v13 = vmul.f32 1.442695, %v1073_v12 }
 0x4e8   :  { %v1070_v14 = vpop.xlane.xlu1 %1069 }
 0x4e9   :  { %1987 = vpow2.f32 %v1079_v13  ;;  %v1074_v26 = vsub.f32 %v1056_v6, %v1070_v14 }
 0x4eb   :  { %v1064_v15 = vpop.xlane.xlu0 %1063  ;;  %v1081_v25 = vmul.f32 1.442695, %v1074_v26 }
 0x4ec   :  { %v1299_v16 = vpop.permute.xlu2 %1298  ;;  %v1072_v17 = vsub.f32 %v1000_v8, %v1064_v15 }
 0x4ed   :  { %1897 = vmatpush.xpose.msk.msra.mxu3 %vm293_vm1, %v1299_v16 }
 0x4ee   :  { %v1077_v18 = vmul.f32 1.442695, %v1072_v17 }
 0x4ef   :  { %v1988_v19 = vpop.eup %1987 }
 0x4f0   :  { %1989 = vpow2.f32 %v1077_v18  ;;  %v1089_v24 = vsel %vm293_vm1, %v1988_v19, 0.0 }
 0x4f1   :  { %1090 = vadd.xlane.f32.xlu0 %v1089_v24  ;;  %1991 = vpow2.f32 %v1081_v25 }
 0x4f3   :  { %v1061_v20 = vpop.xlane.xlu0 %1060 }
 0x4f4   :  { %v1071_v31 = vsub.f32 %v972_v10, %v1061_v20 }
 0x4f6   :  { %v2597_v21 = vpop.eup %1989  ;;  %v1075_v22 = vmul.f32 1.442695, %v1071_v31 }
 0x4f7   :  { %v1086_v23 = vsel %vm293_vm1, %v2597_v21, 0.0  ;;  %v2601_v36 = vpop.eup %1991 }
 0x4f8   :  { %1993 = vpow2.f32 %v1075_v22  ;;  %1087 = vadd.xlane.f32.xlu2 %v1086_v23  ;;  %v1092_v38 = vsel %vm293_vm1, %v2601_v36, 0.0 }
 0x4fe   :  { %v2603_v37 = vpop.eup %1993 }
 0x4ff   :  { %v1083_v39 = vsel %vm293_vm1, %v2603_v37, 0.0 }
 0x500   :  { %1093 = vadd.xlane.f32.xlu2 %v1092_v38  ;;  %1084 = vadd.xlane.f32.xlu1 %v1083_v39  ;;  %v2620_v44 = vpop.permute.xlu1 %1380 }
 0x505   :  { %1326 = vrot.lane.b32.xlu0 %v2401_v29, %s2272_s1 }
 0x506   :  { %v2611_v40 = vpop.permute.xlu0 %1296 }
 0x50e   :  { %v1355_v41 = vpop.permute.xlu0 %1354 }
 0x50f   :  { %1901 = vmatpush.xpose.msk.msrb.mxu1 %vm293_vm1, %v1355_v41 }
 0x518   :  { %1352 = vrot.lane.b32.xlu2 %v2414_v32, %s2272_s1 }
 0x519   :  { %1201 = vrot.lane.b32.xlu1 %v2407_v30, %s2271_s26 }
 0x520   :  { %1324 = vrot.lane.b32.xlu2 %v2397_v27, %s2272_s1 }
 0x564   :  { %v1091_v42 = vpop.xlane.xlu0 %1090 }
 0x565   :  { %1995 = vrcp.f32 %v1091_v42  ;;  %v1134_v48 = vand.u32 2147483648, %v1091_v42  ;;  %v1132_v32 = vand.u32 2147483647, %v1091_v42  ;;  %vm1128_vm7 = vweird.f32 %v1091_v42 }
 0x567   :  { %v1135_v27 = vor.u32 1.1754944e-38, %v1134_v48  ;;  %vm1133_vm9 = vcmp.eq.f32.partialorder %v1132_v32, 8.507059e+37 }
 0x56b   :  { %v1996_v43 = vpop.eup %1995  ;;  %v2622_v29 = vpop.xlane.xlu2 %1087 }
 0x56c   :  { %v1124_v45 = vmul.f32 %v1996_v43, %v1091_v42  ;;  %1997 = vrcp.f32 %v2622_v29  ;;  %vm1129_vm6 = vweird.f32 %v1996_v43  ;;  %vm1114_vm11 = vweird.f32 %v2622_v29 }
 0x56d   :  { %vm1130_vm8 = vmor %vm1128_vm7, %vm1129_vm6  ;;  %v1120_v17 = vand.u32 2147483648, %v2622_v29 }
 0x56e   :  { %v1125_v47 = vsub.f32 1.0, %v1124_v45 }
 0x56f   :  { %v1121_v39 = vor.u32 1.1754944e-38, %v1120_v17 }
 0x570   :  { %v1126_v49 = vmul.f32 %v1996_v43, %v1125_v47 }
 0x572   :  { %v1998_v50 = vpop.eup %1997  ;;  %v1127_v54 = vadd.f32 %v1996_v43, %v1126_v49 }
 0x573   :  { %v1094_v55 = vpop.xlane.xlu2 %1093  ;;  %v1085_v57 = vpop.xlane.xlu1 %1084  ;;  %v1110_v59 = vmul.f32 %v1998_v50, %v2622_v29  ;;  %vm1115_vm13 = vweird.f32 %v1998_v50 }
 0x574   :  { %v1131_v52 = vsel %vm1130_vm8, %v1996_v43, %v1127_v54  ;;  %1999 = vrcp.f32 %v1094_v55  ;;  %v1148_v8 = vand.u32 2147483648, %v1094_v55  ;;  %v1146_v63 = vand.u32 2147483647, %v1094_v55  ;;  %vm1116_vm5 = vmor %vm1114_vm11, %vm1115_vm13 }
 0x575   :  { %v1136_v58 = vsel %vm1133_vm9, %v1135_v27, %v1131_v52  ;;  %2001 = vrcp.f32 %v1085_v57  ;;  %v1111_v34 = vsub.f32 1.0, %v1110_v59  ;;  %v1106_v11 = vand.u32 2147483648, %v1085_v57 }
 0x576   :  { %v2626_v61 = vmul.f32 %v1988_v19, %v1136_v58  ;;  %v1104_v13 = vand.u32 2147483647, %v1085_v57  ;;  %vm1142_vm14 = vweird.f32 %v1094_v55  ;;  %v1149_v26 = vor.u32 1.1754944e-38, %v1148_v8 }
 0x577   :  { %v1112_v6 = vmul.f32 %v1998_v50, %v1111_v34  ;;  %vm1100_vm2 = vweird.f32 %v1085_v57  ;;  %v1118_v19 = vand.u32 2147483647, %v2622_v29  ;;  %vm1147_vm3 = vcmp.eq.f32.partialorder %v1146_v63, 8.507059e+37  ;;  %v1327_v45 = vpop.permute.xlu0 %1326 }
 0x578   :  { %1895 = vmatmul.msk.f32.vlgmr.msra.gmra.mxu1 %vm293_vm1, %v2626_v61  ;;  %v1107_v25 = vor.u32 1.1754944e-38, %v1106_v11  ;;  %vm1105_vm6 = vcmp.eq.f32.partialorder %v1104_v13, 8.507059e+37  ;;  %v1948_v11 = vpack.i.bf16 %v2418_v33, %v2399_v28 }
 0x579   :  { %v1113_v15 = vadd.f32 %v1998_v50, %v1112_v6  ;;  %vm1119_vm7 = vcmp.eq.f32.partialorder %v1118_v19, 8.507059e+37 }
 0x57a   :  { %v2000_v62 = vpop.eup %1999 }
 0x57b   :  { %v2002_v0 = vpop.eup %2001  ;;  %v1138_v2 = vmul.f32 %v2000_v62, %v1094_v55  ;;  %vm1143_vm10 = vweird.f32 %v2000_v62  ;;  %v1353_v14 = vpop.permute.xlu2 %1352  ;;  %v1117_v22 = vsel %vm1116_vm5, %v1998_v50, %v1113_v15 }
 0x57c   :  { %v1096_v4 = vmul.f32 %v2002_v0, %v1085_v57  ;;  %vm1101_vm12 = vweird.f32 %v2002_v0  ;;  %vm1144_vm15 = vmor %vm1142_vm14, %vm1143_vm10  ;;  %v1122_v42 = vsel %vm1119_vm7, %v1121_v39, %v1117_v22  ;;  %vm818_vm10 = vcmask 130112  }
 0x57d   :  { %v1139_v7 = vsub.f32 1.0, %v1138_v2  ;;  %vm1102_vm4 = vmor %vm1100_vm2, %vm1101_vm12  ;;  %v2648_v29 = vmul.f32 %v2597_v21, %v1122_v42 }
 0x57e   :  { %v1097_v9 = vsub.f32 1.0, %v1096_v4 }
 0x57f   :  { %v1140_v10 = vmul.f32 %v2000_v62, %v1139_v7 }
 0x580   :  { %v1098_v12 = vmul.f32 %v2002_v0, %v1097_v9  ;;  %1902 = vmatmul.msk.f32.vlgmr.msrb.gmra.mxu1 %vm293_vm1, %v1353_v14 }
 0x581   :  { %v1141_v16 = vadd.f32 %v2000_v62, %v1140_v10 }
 0x582   :  { %v1099_v18 = vadd.f32 %v2002_v0, %v1098_v12 }
 0x583   :  { %v1145_v24 = vsel %vm1144_vm15, %v2000_v62, %v1141_v16 }
 0x584   :  { %v1150_v20 = vsel %vm1147_vm3, %v1149_v26, %v1145_v24  ;;  %v1103_v31 = vsel %vm1102_vm4, %v2002_v0, %v1099_v18 }
 0x585   :  { %v1108_v23 = vsel %vm1105_vm6, %v1107_v25, %v1103_v31  ;;  %v2638_v38 = vmul.f32 %v2601_v36, %v1150_v20  ;;  %v1325_v36 = vpop.permute.xlu2 %1324 }
 0x586   :  { %v2641_v41 = vmul.f32 %v2603_v37, %v1108_v23 }
 0x587   :  { %1896 = vmatmul.msk.f32.vlgmr.msra.gmra.mxu2 %vm293_vm1, %v2638_v38 }
 0x588   :  { %1893 = vmatmul.msk.f32.vlgmr.msrb.gmra.mxu3 %vm293_vm1, %v2641_v41 }
 0x58b   :  { %v1202_v43 = vpop.permute.xlu1 %1201 }
 0x58c   :  { %1221 = vmatpush.msrb.mxu0 %v1202_v43 }
 0x58d   :  { %1894 = vmatmul.msk.f32.vlgmr.msrb.gmra.mxu0 %vm293_vm1, %v2648_v29 }
 0x58e   :  { %1899 = vmatpush.xpose.msk.msra.mxu0 %vm293_vm1, %v1327_v45 }
 0x58f   :  { %1904 = vmatmul.msk.f32.vlgmr.msrb.gmra.mxu2 %vm293_vm1, %v2620_v44 }
 0x590   :  { %1898 = vmatmul.msk.f32.vlgmr.msra.gmra.mxu3 %vm293_vm1, %v2611_v40 }
 0x595   :  { %1900 = vmatmul.msk.f32.vlgmr.msra.gmra.mxu0 %vm293_vm1, %v1325_v36 }
 0x5f5   :  { %v1248_v37 = vpop.f32.mrf.mxu1 }
 0x5fd   :  { %v1377_v47 = vpop.f32.mrf.mxu1 }
 0x5fe   :  { %v1414_v21 = vsel %vm293_vm1, %v1377_v47, -inf }
 0x5ff   :  { %1415 = vmax.xlane.f32.xlu0 %v1414_v21 }
 0x60a   :  { %v1273_v48 = vpop.f32.mrf.mxu2  ;;  %v1223_v32 = vpop.f32.mrf.mxu0 }
 0x60b   :  { %v1198_v49 = vpop.f32.mrf.mxu3 }
 0x612   :  { %v1405_v50 = vpop.f32.mrf.mxu2  ;;  %v1349_v40 = vpop.f32.mrf.mxu0 }
 0x613   :  { %v1321_v54 = vpop.f32.mrf.mxu3  ;;  %v1417_v27 = vsel %vm293_vm1, %v1405_v50, -inf  ;;  %v1411_v55 = vsel %vm293_vm1, %v1349_v40, -inf }
 0x614   :  { %1418 = vmax.xlane.f32.xlu2 %v1417_v27  ;;  %v1408_v44 = vsel %vm293_vm1, %v1321_v54, -inf }
 0x615   :  { %1409 = vmax.xlane.f32.xlu1 %v1408_v44 }
 0x61d   :  { %1412 = vmax.xlane.f32.xlu1 %v1411_v55 }
 0x672   :  { %v1416_v57 = vpop.xlane.xlu0 %1415 }
 0x673   :  { %v1422_v52 = vsub.f32 %v1377_v47, %v1416_v57 }
 0x675   :  { %v1428_v58 = vmul.f32 1.442695, %v1422_v52 }
 0x677   :  { %2003 = vpow2.f32 %v1428_v58 }
 0x67d   :  { %v2004_v59 = vpop.eup %2003 }
 0x67e   :  { %v1438_v34 = vsel %vm293_vm1, %v2004_v59, 0.0 }
 0x67f   :  { %1439 = vadd.xlane.f32.xlu2 %v1438_v34 }
 0x687   :  { %v1419_v62 = vpop.xlane.xlu2 %1418 }
 0x688   :  { %v1423_v0 = vsub.f32 %v1405_v50, %v1419_v62  ;;  %v1410_v2 = vpop.xlane.xlu1 %1409 }
 0x689   :  { %v1420_v9 = vsub.f32 %v1321_v54, %v1410_v2 }
 0x68a   :  { %v1430_v4 = vmul.f32 1.442695, %v1423_v0 }
 0x68b   :  { %v1424_v12 = vmul.f32 1.442695, %v1420_v9 }
 0x68c   :  { %2005 = vpow2.f32 %v1430_v4 }
 0x690   :  { %v1413_v6 = vpop.xlane.xlu1 %1412 }
 0x691   :  { %v1421_v7 = vsub.f32 %v1349_v40, %v1413_v6 }
 0x692   :  { %v2663_v8 = vpop.eup %2005 }
 0x693   :  { %v1426_v10 = vmul.f32 1.442695, %v1421_v7  ;;  %v1441_v63 = vsel %vm293_vm1, %v2663_v8, 0.0 }
 0x694   :  { %1442 = vadd.xlane.f32.xlu1 %v1441_v63 }
 0x695   :  { %2007 = vpow2.f32 %v1426_v10 }
 0x696   :  { %2009 = vpow2.f32 %v1424_v12 }
 0x697   :  { %1949 = vrot.lane.b32.xlu2 %v1948_v11, %s2272_s1 }
 0x69b   :  { %v2670_v13 = vpop.eup %2007 }
 0x69c   :  { %v1435_v14 = vsel %vm293_vm1, %v2670_v13, 0.0  ;;  %v2676_v15 = vpop.eup %2009 }
 0x69d   :  { %1436 = vadd.xlane.f32.xlu0 %v1435_v14  ;;  %v1432_v16 = vsel %vm293_vm1, %v2676_v15, 0.0 }
 0x69f   :  { %935 = vrot.lane.b32.xlu2 %v2575_v46, %s2263_s22 }
 0x6a5   :  { %1433 = vadd.xlane.f32.xlu0 %v1432_v16 }
 0x6a7   :  { %931 = vrot.lane.b32.xlu2 %v2582_v5, %s2263_s22 }
 0x6ad   :  { %1600 = vrot.lane.b32.xlu1 %v2430_v35, %s2272_s1 }
 0x6b5   :  { %937 = vrot.lane.b32.xlu1 %v2577_v1, %s2263_s22 }
 0x6b9   :  { %1550 = vrot.lane.b32.xlu0 %v2407_v30, %s2272_s1 }
 0x6c1   :  { %1284 = vrot.lane.b32.xlu0 %v1248_v37, %s2273_s3 }
 0x6c9   :  { %1280 = vrot.lane.b32.xlu0 %v1198_v49, %s2273_s3 }
 0x6d1   :  { %1286 = vrot.lane.b32.xlu0 %v1273_v48, %s2273_s3 }
 0x6d9   :  { %1282 = vrot.lane.b32.xlu0 %v1223_v32, %s2273_s3 }
 0x6e1   :  { %810 = vrot.lane.b32.xlu0 %v2556_v56, %s2263_s22 }
 0x6e9   :  { %812 = vrot.lane.b32.xlu0 %v2551_v53, %s2263_s22 }
 0x6f2   :  { %v1440_v28 = vpop.xlane.xlu2 %1439 }
 0x6f3   :  { %2011 = vrcp.f32 %v1440_v28  ;;  %v1483_v17 = vand.u32 2147483648, %v1440_v28  ;;  %v1481_v18 = vand.u32 2147483647, %v1440_v28  ;;  %vm1477_vm9 = vweird.f32 %v1440_v28 }
 0x6f5   :  { %v1484_v56 = vor.u32 1.1754944e-38, %v1483_v17  ;;  %vm1482_vm12 = vcmp.eq.f32.partialorder %v1481_v18, 8.507059e+37  ;;  %v1652_v18 = vld [vmem:[#allocation14 + $0x18] sm:$0xff] }
 0x6f9   :  { %v2012_v33 = vpop.eup %2011 }
 0x6fa   :  { %v1473_v35 = vmul.f32 %v2012_v33, %v1440_v28  ;;  %v1950_v30 = vpop.permute.xlu2 %1949  ;;  %vm1478_vm8 = vweird.f32 %v2012_v33 }
 0x6fb   :  { %v1952_v46 = vunpack.i.h.bf16 %v1950_v30  ;;  %v1951_v1 = vunpack.i.l.bf16 %v1950_v30  ;;  %vm1479_vm11 = vmor %vm1477_vm9, %vm1478_vm8 }
 0x6fc   :  { %v1474_v5 = vsub.f32 1.0, %v1473_v35 }
 0x6fd   :  { %1545 = vmatpush.msrb.mxu3 %v1951_v1  ;;  %1595 = vmatpush.msra.mxu1 %v1952_v46 }
 0x6fe   :  { %v1475_v26 = vmul.f32 %v2012_v33, %v1474_v5 }
 0x6ff   :  { %1917 = vmatpush.msra.mxu3 %v1652_v18 }
 0x700   :  { %v1476_v19 = vadd.f32 %v2012_v33, %v1475_v26 }
 0x702   :  { %v1480_v53 = vsel %vm1479_vm11, %v2012_v33, %v1476_v19  ;;  %v936_v24 = vpop.permute.xlu2 %935  ;;  %v1651_v19 = vld [vmem:[#allocation14 + $0x10] sm:$0xff] }
 0x703   :  { %v1485_v25 = vsel %vm1482_vm12, %v1484_v56, %v1480_v53  ;;  %945 = vst.msk [vmem:[#allocation2 + $0x10] sm:$0xff] %vm818_vm10, %v936_v24  ;;  %vm1171_vm12 = vcmask 195712   ;;  %v1650_v56 = vld [vmem:[#allocation14 + $0x8] sm:$0xff]  ;;  %1918 = vmatpush.msra.mxu3 %v1651_v19 }
 0x704   :  { %v2697_v20 = vmul.f32 %v2004_v59, %v1485_v25 }
 0x705   :  { %1919 = vmatpush.msra.mxu3 %v1650_v56 }
 0x706   :  { %1907 = vmatmul.msk.f32.vlgmr.msra.gmra.mxu1 %vm293_vm1, %v2697_v20 }
 0x707   :  { %v1443_v31 = vpop.xlane.xlu1 %1442 }
 0x708   :  { %2013 = vrcp.f32 %v1443_v31  ;;  %v1497_v37 = vand.u32 2147483648, %v1443_v31  ;;  %vm1491_vm14 = vweird.f32 %v1443_v31  ;;  %v1495_v21 = vand.u32 2147483647, %v1443_v31 }
 0x70a   :  { %v932_v22 = vpop.permute.xlu2 %931  ;;  %v1498_v50 = vor.u32 1.1754944e-38, %v1497_v37  ;;  %vm1496_vm2 = vcmp.eq.f32.partialorder %v1495_v21, 8.507059e+37 }
 0x70b   :  { %943 = vst.msk [vmem:[#allocation2] sm:$0xff] %vm818_vm10, %v932_v22 }
 0x70e   :  { %v2014_v23 = vpop.eup %2013 }
 0x70f   :  { %v1487_v39 = vmul.f32 %v2014_v23, %v1443_v31  ;;  %vm1492_vm13 = vweird.f32 %v2014_v23 }
 0x710   :  { %v1437_v42 = vpop.xlane.xlu0 %1436  ;;  %vm1493_vm15 = vmor %vm1491_vm14, %vm1492_vm13 }
 0x711   :  { %v1488_v43 = vsub.f32 1.0, %v1487_v39  ;;  %2015 = vrcp.f32 %v1437_v42  ;;  %v1469_v59 = vand.u32 2147483648, %v1437_v42  ;;  %vm1463_vm4 = vweird.f32 %v1437_v42 }
 0x712   :  { %v1467_v62 = vand.u32 2147483647, %v1437_v42 }
 0x713   :  { %v1489_v45 = vmul.f32 %v2014_v23, %v1488_v43  ;;  %v1470_v7 = vor.u32 1.1754944e-38, %v1469_v59  ;;  %v2275_v59 = vmov 32.0  }
 0x714   :  { %vm1468_vm8 = vcmp.eq.f32.partialorder %v1467_v62, 8.507059e+37 }
 0x715   :  { %v1490_v36 = vadd.f32 %v2014_v23, %v1489_v45 }
 0x717   :  { %v2016_v47 = vpop.eup %2015  ;;  %v1494_v32 = vsel %vm1493_vm15, %v2014_v23, %v1490_v36  ;;  %v2029_v36 = vld [vmem:[#allocation3 + $0x10] sm:$0xff] }
 0x718   :  { %v1459_v48 = vmul.f32 %v2016_v47, %v1437_v42  ;;  %v1434_v49 = vpop.xlane.xlu0 %1433  ;;  %v1499_v27 = vsel %vm1496_vm2, %v1498_v50, %v1494_v32  ;;  %vm1464_vm3 = vweird.f32 %v2016_v47 }
 0x719   :  { %2017 = vrcp.f32 %v1434_v49  ;;  %v2703_v57 = vmul.f32 %v2663_v8, %v1499_v27  ;;  %v1455_v0 = vand.u32 2147483648, %v1434_v49  ;;  %vm1465_vm5 = vmor %vm1463_vm4, %vm1464_vm3  ;;  %v1453_v4 = vand.u32 2147483647, %v1434_v49 }
 0x71a   :  { %v1460_v54 = vsub.f32 1.0, %v1459_v48  ;;  %vm1449_vm7 = vweird.f32 %v1434_v49  ;;  %v2030_v48 = vld [vmem:[#allocation3] sm:$0xff]  ;;  %2019 = vrcp.f32 %v2275_v59 }
 0x71b   :  { %v1456_v9 = vor.u32 1.1754944e-38, %v1455_v0  ;;  %vm1454_vm11 = vcmp.eq.f32.partialorder %v1453_v4, 8.507059e+37 }
 0x71c   :  { %v1461_v44 = vmul.f32 %v2016_v47, %v1460_v54  ;;  %v2031_v54 = vld [vmem:[#allocation3 + $0x18] sm:$0xff] }
 0x71e   :  { %v1462_v58 = vadd.f32 %v2016_v47, %v1461_v44 }
 0x71f   :  { %v2018_v40 = vpop.eup %2017  ;;  %v1601_v55 = vpop.permute.xlu1 %1600 }
 0x720   :  { %v1445_v52 = vmul.f32 %v2018_v40, %v1434_v49  ;;  %1620 = vmatpush.msra.mxu2 %v1601_v55  ;;  %vm1450_vm6 = vweird.f32 %v2018_v40  ;;  %v1466_v6 = vsel %vm1465_vm5, %v2016_v47, %v1462_v58 }
 0x721   :  { %1908 = vmatmul.msk.f32.vlgmr.msra.gmra.mxu2 %vm293_vm1, %v2703_v57  ;;  %vm1451_vm9 = vmor %vm1449_vm7, %vm1450_vm6  ;;  %v1471_v63 = vsel %vm1468_vm8, %v1470_v7, %v1466_v6 }
 0x722   :  { %v1446_v34 = vsub.f32 1.0, %v1445_v52  ;;  %v2712_v28 = vmul.f32 %v2670_v13, %v1471_v63 }
 0x724   :  { %v1447_v2 = vmul.f32 %v2018_v40, %v1446_v34  ;;  %v2020_v34 = vpop.eup %2019 }
 0x725   :  { %v1707_v62 = vmul.f32 32.0, %v2020_v34 }
 0x726   :  { %v1448_v8 = vadd.f32 %v2018_v40, %v1447_v2 }
 0x727   :  { %v938_v10 = vpop.permute.xlu1 %937  ;;  %v1708_v0 = vsub.f32 1.0, %v1707_v62 }
 0x728   :  { %v1452_v11 = vsel %vm1451_vm9, %v2018_v40, %v1448_v8  ;;  %946 = vst.msk [vmem:[#allocation2 + $0x18] sm:$0xff] %vm818_vm10, %v938_v10  ;;  %v2032_v40 = vld [vmem:[#allocation3 + $0x8] sm:$0xff] }
 0x729   :  { %v1457_v12 = vsel %vm1454_vm11, %v1456_v9, %v1452_v11  ;;  %v1709_v2 = vmul.f32 %v2020_v34, %v1708_v0 }
 0x72a   :  { %v2709_v14 = vmul.f32 %v2676_v15, %v1457_v12 }
 0x72b   :  { %v1551_v16 = vpop.permute.xlu0 %1550  ;;  %v1710_v4 = vadd.f32 %v2020_v34, %v1709_v2 }
 0x72c   :  { %1905 = vmatmul.msk.f32.vlgmr.msrb.gmra.mxu3 %vm293_vm1, %v2709_v14  ;;  %1570 = vmatpush.msrb.mxu0 %v1551_v16 }
 0x72d   :  { %1906 = vmatmul.msk.f32.vlgmr.msrb.gmra.mxu0 %vm293_vm1, %v2712_v28  ;;  %vm1520_vm1 = vcmask 261312  }
 0x72e   :  { %1677 = vmatpush.msra.mxu0 %v1652_v18 }
 0x730   :  { %1678 = vmatpush.msra.mxu0 %v1651_v19 }
 0x732   :  { %1679 = vmatpush.msra.mxu0 %v1650_v56 }
 0x733   :  { %v1285_v33 = vpop.permute.xlu0 %1284 }
 0x734   :  { %1294 = vst.msk [vmem:[#allocation2 + $0x10] sm:$0xff] %vm1171_vm12, %v1285_v33 }
 0x73b   :  { %v1281_v35 = vpop.permute.xlu0 %1280 }
 0x73c   :  { %1292 = vst.msk [vmem:[#allocation2] sm:$0xff] %vm1171_vm12, %v1281_v35 }
 0x743   :  { %v1287_v15 = vpop.permute.xlu0 %1286 }
 0x744   :  { %1295 = vst.msk [vmem:[#allocation2 + $0x18] sm:$0xff] %vm1171_vm12, %v1287_v15 }
 0x74b   :  { %v1283_v30 = vpop.permute.xlu0 %1282 }
 0x753   :  { %v811_v13 = vpop.permute.xlu0 %810 }
 0x754   :  { %821 = vst.msk [vmem:[#allocation16 + $0x10] sm:$0xff] %vm818_vm10, %v811_v13 }
 0x75b   :  { %v813_v46 = vpop.permute.xlu0 %812 }
 0x75c   :  { %822 = vst.msk [vmem:[#allocation16 + $0x18] sm:$0xff] %vm818_vm10, %v813_v46 }
 0x783   :  { %v1597_v1 = vpop.f32.mrf.mxu1 }
 0x784   :  { %1633 = vrot.lane.b32.xlu1 %v1597_v1, %s2274_s27 }
 0x7a4   :  { %v1622_v5 = vpop.f32.mrf.mxu2 }
 0x7a5   :  { %1635 = vrot.lane.b32.xlu1 %v1622_v5, %s2274_s27 }
 0x7aa   :  { %v1572_v17 = vpop.f32.mrf.mxu0 }
 0x7ad   :  { %1631 = vrot.lane.b32.xlu1 %v1572_v17, %s2274_s27 }
 0x7af   :  { %v1547_v26 = vpop.f32.mrf.mxu3 }
 0x7b0   :  { %1629 = vrot.lane.b32.xlu2 %v1547_v26, %s2274_s27 }
 0x7b5   :  { %806 = vrot.lane.b32.xlu1 %v2542_v60, %s2263_s22  ;;  %v1649_v60 = vld [vmem:[#allocation14] sm:$0xff] }
 0x7b6   :  { %1920 = vmatpush.msra.mxu3 %v1649_v60  ;;  %1680 = vmatpush.msra.mxu0 %v1649_v60 }
 0x7b8   :  { %933 = vrot.lane.b32.xlu2 %v2579_v3, %s2263_s22 }
 0x7bd   :  { %1161 = vrot.lane.b32.xlu1 %v2648_v29, %s2273_s3 }
 0x7c0   :  { %808 = vrot.lane.b32.xlu2 %v2565_v51, %s2263_s22 }
 0x7c8   :  { %1159 = vrot.lane.b32.xlu2 %v2641_v41, %s2273_s3 }
 0x7f6   :  { %v1634_v3 = vpop.permute.xlu1 %1633 }
 0x7f7   :  { %1643 = vst.msk [vmem:[#allocation2 + $0x10] sm:$0xff] %vm1520_vm1, %v1634_v3 }
 0x7fe   :  { %v1647_v51 = vld [vmem:[#allocation2 + $0x10] sm:$0xff] }
 0x7ff   :  { %1911 = vmatmul.msk.f32.vlgmr.msra.gmra.mxu3 %vm161_vm0, %v1647_v51 }
 0x80a   :  { %v1630_v41 = vpop.permute.xlu2 %1629 }
 0x80b   :  { %1641 = vst.msk [vmem:[#allocation2] sm:$0xff] %vm1520_vm1, %v1630_v41 }
 0x812   :  { %v934_v29 = vpop.permute.xlu2 %933  ;;  %v1645_v53 = vld [vmem:[#allocation2] sm:$0xff] }
 0x813   :  { %944 = vst.msk [vmem:[#allocation2 + $0x8] sm:$0xff] %vm818_vm10, %v934_v29  ;;  %1909 = vmatmul.msk.f32.vlgmr.msra.gmra.mxu0 %vm161_vm0, %v1645_v53 }
 0x814   :  { %1293 = vst.msk [vmem:[#allocation2 + $0x8] sm:$0xff] %vm1171_vm12, %v1283_v30 }
 0x817   :  { %v1636_v24 = vpop.permute.xlu1 %1635 }
 0x818   :  { %1644 = vst.msk [vmem:[#allocation2 + $0x18] sm:$0xff] %vm1520_vm1, %v1636_v24 }
 0x81a   :  { %v809_v25 = vpop.permute.xlu2 %808 }
 0x81b   :  { %820 = vst.msk [vmem:[#allocation16 + $0x8] sm:$0xff] %vm818_vm10, %v809_v25 }
 0x81f   :  { %v1632_v31 = vpop.permute.xlu1 %1631  ;;  %v1648_v22 = vld [vmem:[#allocation2 + $0x18] sm:$0xff] }
 0x820   :  { %1642 = vst.msk [vmem:[#allocation2 + $0x8] sm:$0xff] %vm1520_vm1, %v1632_v31  ;;  %1912 = vmatmul.msk.f32.gmra.mxu3 %vm161_vm0, %v1648_v22  ;;  %v2798_v22 = vld [vmem:[%s2843_s7] ss:$0 sm:$0xff]  ;;  %s2276_s7 = smov [#allocation16]  }
 0x822   :  { %v1160_v42 = vpop.permute.xlu2 %1159 }
 0x827   :  { %v807_v23 = vpop.permute.xlu1 %806  ;;  %v1646_v39 = vld [vmem:[#allocation2 + $0x8] sm:$0xff] }
 0x828   :  { %819 = vst.msk [vmem:[#allocation16] sm:$0xff] %vm818_vm10, %v807_v23  ;;  %1910 = vmatmul.msk.f32.gmra.mxu0 %vm161_vm0, %v1646_v39  ;;  %vm1711_vm10 = vweird.f32 %v2020_v34  ;;  %v2803_v39 = vld [vmem:[%s2844_s8] ss:$0 sm:$0xff]  ;;  %s1826_s8 = sshll.u32 %s2276_s7, 4  ;;  %s1827_s8 = int_to_ptr.vmem [resolvable:$true] %s1826_s8 }
 0x829   :  { %1172 = vst.msk [vmem:[#allocation16] sm:$0xff] %vm1171_vm12, %v1160_v42  ;;  %v2761_v6 = vsel %vm1711_vm10, %v2020_v34, %v1710_v4 }
 0x82f   :  { %v1162_v43 = vpop.permute.xlu1 %1161 }
 0x830   :  { %1173 = vst.msk [vmem:[#allocation16 + $0x8] sm:$0xff] %vm1171_vm12, %v1162_v43 }
 0x882   :  { %v1688_v45 = vpop.f32.mrf.mxu3 }
 0x883   :  { %v1689_v37 = vadd.f32 %v2029_v36, %v1688_v45 }
 0x885   :  { %v1700_v47 = vsel %vm161_vm0, %v1689_v37, 0.0 }
 0x886   :  { %1701 = vadd.xlane.f32.xlu1 %v1700_v47 }
 0x890   :  { %v1682_v21 = vpop.f32.mrf.mxu0 }
 0x891   :  { %v1683_v49 = vadd.f32 %v2030_v48, %v1682_v21 }
 0x893   :  { %v1694_v32 = vsel %vm161_vm0, %v1683_v49, 0.0 }
 0x894   :  { %1695 = vadd.xlane.f32.xlu2 %v1694_v32 }
 0x89f   :  { %1508 = vrot.lane.b32.xlu1 %v2709_v14, %s2274_s27 }
 0x8a3   :  { %v1691_v50 = vpop.f32.mrf.mxu3 }
 0x8a4   :  { %v1692_v27 = vadd.f32 %v2031_v54, %v1691_v50 }
 0x8a5   :  { %v1685_v44 = vpop.f32.mrf.mxu0 }
 0x8a6   :  { %v1686_v55 = vadd.f32 %v2032_v40, %v1685_v44  ;;  %v1703_v52 = vsel %vm161_vm0, %v1692_v27, 0.0 }
 0x8a7   :  { %1704 = vadd.xlane.f32.xlu2 %v1703_v52 }
 0x8a8   :  { %v1697_v58 = vsel %vm161_vm0, %v1686_v55, 0.0 }
 0x8a9   :  { %1698 = vadd.xlane.f32.xlu0 %v1697_v58 }
 0x8bd   :  { %1163 = vrot.lane.b32.xlu0 %v2626_v61, %s2273_s3 }
 0x8bf   :  { %1165 = vrot.lane.b32.xlu2 %v2638_v38, %s2273_s3 }
 0x8f9   :  { %v1702_v7 = vpop.xlane.xlu1 %1701 }
 0x8fa   :  { %v1715_v8 = vmul.f32 %v2761_v6, %v1702_v7 }
 0x8fc   :  { %v1719_v9 = vsub.f32 %v1689_v37, %v1715_v8 }
 0x8fe   :  { %v1723_v10 = vmul.f32 %v1719_v9, %v1719_v9 }
 0x900   :  { %v1731_v61 = vsel %vm161_vm0, %v1723_v10, 0.0 }
 0x901   :  { %1732 = vadd.xlane.f32.xlu2 %v1731_v61 }
 0x907   :  { %v1696_v63 = vpop.xlane.xlu2 %1695 }
 0x908   :  { %v1713_v38 = vmul.f32 %v2761_v6, %v1696_v63 }
 0x90a   :  { %v2766_v11 = vsub.f32 %v1683_v49, %v1713_v38 }
 0x90c   :  { %v1721_v12 = vmul.f32 %v2766_v11, %v2766_v11 }
 0x90e   :  { %v1725_v14 = vsel %vm161_vm0, %v1721_v12, 0.0 }
 0x90f   :  { %1726 = vadd.xlane.f32.xlu0 %v1725_v14 }
 0x911   :  { %v1509_v16 = vpop.permute.xlu1 %1508 }
 0x912   :  { %1521 = vst.msk [vmem:[#allocation16] sm:$0xff] %vm1520_vm1, %v1509_v16 }
 0x919   :  { %1512 = vrot.lane.b32.xlu2 %v2697_v20, %s2274_s27 }
 0x91a   :  { %v1705_v33 = vpop.xlane.xlu2 %1704 }
 0x91b   :  { %v1716_v35 = vmul.f32 %v2761_v6, %v1705_v33 }
 0x91c   :  { %v1699_v15 = vpop.xlane.xlu0 %1698 }
 0x91d   :  { %v2775_v30 = vsub.f32 %v1692_v27, %v1716_v35  ;;  %v1714_v13 = vmul.f32 %v2761_v6, %v1699_v15 }
 0x91f   :  { %v2778_v46 = vsub.f32 %v1686_v55, %v1714_v13  ;;  %v1724_v1 = vmul.f32 %v2775_v30, %v2775_v30 }
 0x921   :  { %v1734_v5 = vsel %vm161_vm0, %v1724_v1, 0.0  ;;  %v1722_v17 = vmul.f32 %v2778_v46, %v2778_v46 }
 0x922   :  { %v1166_v26 = vpop.permute.xlu2 %1165  ;;  %1735 = vadd.xlane.f32.xlu0 %v1734_v5 }
 0x923   :  { %1175 = vst.msk [vmem:[#allocation16 + $0x18] sm:$0xff] %vm1171_vm12, %v1166_v26  ;;  %v1728_v20 = vsel %vm161_vm0, %v1722_v17, 0.0 }
 0x924   :  { %1729 = vadd.xlane.f32.xlu1 %v1728_v20 }
 0x92f   :  { %v1164_v18 = vpop.permute.xlu0 %1163 }
 0x930   :  { %1174 = vst.msk [vmem:[#allocation16 + $0x10] sm:$0xff] %vm1171_vm12, %v1164_v18 }
 0x936   :  { %1510 = vrot.lane.b32.xlu0 %v2712_v28, %s2274_s27 }
 0x93d   :  { %1514 = vrot.lane.b32.xlu1 %v2703_v57, %s2274_s27 }
 0x974   :  { %v1733_v19 = vpop.xlane.xlu2 %1732 }
 0x975   :  { %v1739_v56 = vmul.f32 %v1733_v19, %v2761_v6 }
 0x977   :  { %v1743_v60 = vadd.f32 1e-06, %v1739_v56 }
 0x979   :  { %2021 = vrsqrt.f32 %v1743_v60  ;;  %vm1771_vm14 = vweird.f32 %v1743_v60 }
 0x97c   :  { %v1513_v3 = vpop.permute.xlu2 %1512 }
 0x97d   :  { %1523 = vst.msk [vmem:[#allocation16 + $0x10] sm:$0xff] %vm1520_vm1, %v1513_v3 }
 0x97f   :  { %v2022_v51 = vpop.eup %2021 }
 0x980   :  { %v1766_v41 = vmul.f32 %v2022_v51, %v1743_v60  ;;  %vm1772_vm13 = vweird.f32 %v2022_v51 }
 0x981   :  { %vm1773_vm15 = vmor %vm1771_vm14, %vm1772_vm13 }
 0x982   :  { %v1727_v29 = vpop.xlane.xlu0 %1726  ;;  %v1767_v53 = vmul.f32 %v2022_v51, %v1766_v41 }
 0x983   :  { %v1737_v24 = vmul.f32 %v1727_v29, %v2761_v6 }
 0x984   :  { %v1768_v25 = vmul.f32 0.5, %v1767_v53 }
 0x985   :  { %v1741_v31 = vadd.f32 1e-06, %v1737_v24 }
 0x986   :  { %v1769_v28 = vsub.f32 1.5, %v1768_v25 }
 0x987   :  { %2023 = vrsqrt.f32 %v1741_v31  ;;  %vm1751_vm3 = vweird.f32 %v1741_v31 }
 0x988   :  { %v1770_v57 = vmul.f32 %v2022_v51, %v1769_v28 }
 0x98a   :  { %v1774_v23 = vsel %vm1773_vm15, %v2022_v51, %v1770_v57 }
 0x98b   :  { %v1787_v42 = vmul.f32 %v1774_v23, %v1719_v9 }
 0x98d   :  { %v2024_v43 = vpop.eup %2023  ;;  %v1795_v45 = vmul.f32 %v2798_v22, %v1787_v42 }
 0x98e   :  { %v1746_v36 = vmul.f32 %v2024_v43, %v1741_v31  ;;  %vm1752_vm2 = vweird.f32 %v2024_v43 }
 0x98f   :  { %v1803_v37 = vadd.f32 %v2803_v39, %v1795_v45  ;;  %vm1753_vm4 = vmor %vm1751_vm3, %vm1752_vm2 }
 0x990   :  { %v1747_v47 = vmul.f32 %v2024_v43, %v1746_v36 }
 0x991   :  { %1807 = vst.msk [vmem:[#allocation15 + $0x10] sm:$0xff] %vm161_vm0, %v1803_v37 }
 0x992   :  { %v1748_v21 = vmul.f32 0.5, %v1747_v47 }
 0x994   :  { %v1749_v48 = vsub.f32 1.5, %v1748_v21 }
 0x995   :  { %v1736_v49 = vpop.xlane.xlu0 %1735 }
 0x996   :  { %v1750_v32 = vmul.f32 %v2024_v43, %v1749_v48  ;;  %v1740_v50 = vmul.f32 %v1736_v49, %v2761_v6 }
 0x997   :  { %v1730_v54 = vpop.xlane.xlu1 %1729 }
 0x998   :  { %v1754_v27 = vsel %vm1753_vm4, %v2024_v43, %v1750_v32  ;;  %v1744_v44 = vadd.f32 1e-06, %v1740_v50  ;;  %v1738_v40 = vmul.f32 %v1730_v54, %v2761_v6 }
 0x999   :  { %v1785_v55 = vmul.f32 %v1754_v27, %v2766_v11 }
 0x99a   :  { %2025 = vrsqrt.f32 %v1744_v44  ;;  %v1742_v52 = vadd.f32 1e-06, %v1738_v40  ;;  %vm1781_vm6 = vweird.f32 %v1744_v44 }
 0x99b   :  { %v1793_v58 = vmul.f32 %v2798_v22, %v1785_v55 }
 0x99c   :  { %2027 = vrsqrt.f32 %v1742_v52  ;;  %vm1761_vm9 = vweird.f32 %v1742_v52 }
 0x99d   :  { %v1801_v59 = vadd.f32 %v2803_v39, %v1793_v58 }
 0x99f   :  { %1805 = vst.msk [vmem:[#allocation15] sm:$0xff] %vm161_vm0, %v1801_v59 }
 0x9a0   :  { %v2026_v34 = vpop.eup %2025 }
 0x9a1   :  { %v1776_v62 = vmul.f32 %v2026_v34, %v1744_v44  ;;  %vm1782_vm5 = vweird.f32 %v2026_v34 }
 0x9a2   :  { %v2028_v0 = vpop.eup %2027  ;;  %vm1783_vm8 = vmor %vm1781_vm6, %vm1782_vm5 }
 0x9a3   :  { %v1777_v2 = vmul.f32 %v2026_v34, %v1776_v62  ;;  %v1756_v4 = vmul.f32 %v2028_v0, %v1742_v52  ;;  %vm1762_vm7 = vweird.f32 %v2028_v0 }
 0x9a4   :  { %vm1763_vm11 = vmor %vm1761_vm9, %vm1762_vm7 }
 0x9a5   :  { %v1778_v7 = vmul.f32 0.5, %v1777_v2  ;;  %v1757_v8 = vmul.f32 %v2028_v0, %v1756_v4 }
 0x9a7   :  { %v1779_v9 = vsub.f32 1.5, %v1778_v7  ;;  %v1758_v6 = vmul.f32 0.5, %v1757_v8 }
 0x9a8   :  { %v1511_v10 = vpop.permute.xlu0 %1510 }
 0x9a9   :  { %v1780_v61 = vmul.f32 %v2026_v34, %v1779_v9  ;;  %v1759_v63 = vsub.f32 1.5, %v1758_v6  ;;  %1522 = vst.msk [vmem:[#allocation16 + $0x8] sm:$0xff] %vm1520_vm1, %v1511_v10 }
 0x9ab   :  { %v1784_v38 = vsel %vm1783_vm8, %v2026_v34, %v1780_v61  ;;  %v1760_v11 = vmul.f32 %v2028_v0, %v1759_v63 }
 0x9ac   :  { %v1788_v12 = vmul.f32 %v1784_v38, %v2775_v30 }
 0x9ad   :  { %v1764_v14 = vsel %vm1763_vm11, %v2028_v0, %v1760_v11 }
 0x9ae   :  { %v1796_v16 = vmul.f32 %v2798_v22, %v1788_v12  ;;  %v1786_v33 = vmul.f32 %v1764_v14, %v2778_v46 }
 0x9af   :  { %v1515_v35 = vpop.permute.xlu1 %1514 }
 0x9b0   :  { %v1804_v15 = vadd.f32 %v2803_v39, %v1796_v16  ;;  %v1794_v13 = vmul.f32 %v2798_v22, %v1786_v33  ;;  %1524 = vst.msk [vmem:[#allocation16 + $0x18] sm:$0xff] %vm1520_vm1, %v1515_v35 }
 0x9b1   :  { %1834 = dma.vmem_to_hbm [thread:$0]  %s1827_s8, 512, %s1829_s13, [#allocation17], %s2262_s21, %s2262_s21, %s2263_s22  }
 0x9b2   :  { %1808 = vst.msk [vmem:[#allocation15 + $0x18] sm:$0xff] %vm161_vm0, %v1804_v15  ;;  %v1802_v30 = vadd.f32 %v2803_v39, %v1794_v13 }
 0x9b4   :  { %1806 = vst.msk [vmem:[#allocation15 + $0x8] sm:$0xff] %vm161_vm0, %v1802_v30 }
 0x9b5   :  { %1821 = dma.vmem_to_hbm [thread:$0]  %s1814_s0, 512, %s1816_s17, [#allocation5], %s2262_s21, %s2262_s21, %s2263_s22  }
 0x9b6   :  { %2257 = dma.done.wait [#allocation5], 512  }
 0x9b7   :  { %2258 = vsyncadd [#allocation5], 4294966784 }
 0x9b8   :  { %2259 = dma.done.wait [#allocation17], 512  }
 0x9b9   :  { %2260 = vsyncadd [#allocation17], 4294966784 }
 0x9ba   :  { %1843 = vsyncpa [#allocation4], 1 }
 0x9bb   :  { %1844 = vsyncpa [#allocation7], 1 }
 0x9bc   :  { %1845 = vsyncpa [#allocation10], 1 }
 0x9bd   :  { %1846 = vsyncpa [#allocation13], 1 }
 0x9be   :  { %1847 = vsyncpa [#allocation5], 1 }
 0x9bf   :  { %1848 = vsyncpa [#allocation17], 1 }

</bundles_post_ra>
